<compile_context>
chip_gen: v7x
topology: tpu7x:2x2x1
jax: 0.10.0
libtpu: 0.0.40
codegen_flags: <defaults>
</compile_context>

<pallas_src>
import functools
import jax
import jax.numpy as jnp
from jax import lax
from jax.experimental import pallas as pl
from jax.experimental.pallas import tpu as pltpu


# --------------------------------------------------------------------------
# helpers
# --------------------------------------------------------------------------
def _round_up(x, m):
    return -(-x // m) * m


def _row_tile(M, row_bytes, target=512, min_steps=4, vmem_budget=24 << 20):
    """Row tile: multiple of 8, double-buffered blocks fit a VMEM budget, and the
    grid keeps >= min_steps steps (>= 2 per TensorCore with v7x megacore sharding)."""
    cap = max(8, (vmem_budget // max(1, 2 * row_bytes)) // 8 * 8)
    tile = min(target, cap)
    if M < 8 * min_steps:
        return max(8, min(tile, _round_up(M, 8)))
    return max(8, min(tile, _round_up(-(-M // min_steps), 8)))


def _cparams_rows(tile, widths):
    # explicit scoped-VMEM limit (v7x has 64 MiB physical; stay well inside it)
    need = 2 * 4 * tile * sum(widths) + (8 << 20)
    limit = int(min(max(need, 32 << 20), 48 << 20))
    return pltpu.CompilerParams(dimension_semantics=("parallel",),
                                vmem_limit_bytes=limit)


def _rep2(arr):
    r, c = arr.shape
    return pl.BlockSpec((r, c), lambda i: (0, 0))


def _ln(x, g, b, eps=1e-5):
    mu = jnp.mean(x, axis=-1, keepdims=True)
    var = jnp.mean((x - mu) ** 2, axis=-1, keepdims=True)
    return (x - mu) * lax.rsqrt(var + eps) * g + b


# --------------------------------------------------------------------------
# Kernel A: backbone + anchor broadcast + canon-xyz MLP + invariant feature
# --------------------------------------------------------------------------
def backbone_canon_inv_kernel(xyz_ref, bw1_ref, bb1_ref, bw2_ref, b2a_ref,
                              cw1_ref, cb1_ref, cw2_ref, cb2_ref, cw3_ref, cb3_ref,
                              wop_ref, bop_ref,
                              feats_ref, packed_ref, *, A, C):
    # backbone stand-in: z computed ONCE, anchor axis produced by lane concat + VPU add
    x = xyz_ref[...]
    h = jnp.maximum(jnp.dot(x, bw1_ref[...],
                            preferred_element_type=jnp.float32) + bb1_ref[...], 0.0)
    z = jnp.dot(h, bw2_ref[...], preferred_element_type=jnp.float32)        # [tile, C]
    feats = jnp.maximum(jnp.concatenate([z] * A, axis=1) + b2a_ref[...], 0.0)  # [tile, A*C]
    feats_ref[...] = feats

    # canonical-xyz branch: per-anchor 3-layer MLP via block-diagonal weights,
    # final layer writes directly into the packed slab columns [C, C + A*3)
    h1 = jnp.maximum(jnp.dot(feats, cw1_ref[...],
                             preferred_element_type=jnp.float32) + cb1_ref[...], 0.0)
    h2 = jnp.maximum(jnp.dot(h1, cw2_ref[...],
                             preferred_element_type=jnp.float32) + cb2_ref[...], 0.0)
    packed = jnp.dot(h2, cw3_ref[...], preferred_element_type=jnp.float32) + cb3_ref[...]

    # invariant-feature branch: per-anchor linear + ReLU, max over anchors in-kernel,
    # nonzero only on columns [0, C) -> disjoint support with the canon columns
    wop = wop_ref[...]
    bop = bop_ref[...]
    inv = jnp.maximum(jnp.dot(feats[:, :C], wop,
                              preferred_element_type=jnp.float32) + bop, 0.0)
    for a in range(1, A):
        ya = jnp.maximum(jnp.dot(feats[:, a * C:(a + 1) * C], wop,
                                 preferred_element_type=jnp.float32) + bop, 0.0)
        inv = jnp.maximum(inv, ya)

    packed_ref[...] = packed + inv


def pl_backbone_canon_inv(xyz_rows, p):
    M = xyz_rows.shape[0]
    A, C = p["A"], p["C"]
    AC = A * C
    PW = p["wop"].shape[1]
    xp = jnp.pad(xyz_rows, ((0, 0), (0, 8 - xyz_rows.shape[1])))
    row_bytes = 4 * (8 + AC + PW)
    tile = _row_tile(M, row_bytes)
    Mp = _round_up(M, tile)
    if Mp != M:
        xp = jnp.pad(xp, ((0, Mp - M), (0, 0)))
    kern = functools.partial(backbone_canon_inv_kernel, A=A, C=C)
    feats, packed = pl.pallas_call(
        kern,
        out_shape=(jax.ShapeDtypeStruct((Mp, AC), jnp.float32),
                   jax.ShapeDtypeStruct((Mp, PW), jnp.float32)),
        grid_spec=pltpu.PrefetchScalarGridSpec(
            num_scalar_prefetch=0, grid=(Mp // tile,),
            in_specs=[pl.BlockSpec((tile, 8), lambda i: (i, 0)),
                      _rep2(p["bb_w1"]), _rep2(p["bb_b1"]),
                      _rep2(p["bb_w2"]), _rep2(p["b2anch"]),
                      _rep2(p["cw1"]), _rep2(p["cb1"]),
                      _rep2(p["cw2"]), _rep2(p["cb2"]),
                      _rep2(p["cw3"]), _rep2(p["cb3"]),
                      _rep2(p["wop"]), _rep2(p["bop"])],
            out_specs=[pl.BlockSpec((tile, AC), lambda i: (i, 0)),
                       pl.BlockSpec((tile, PW), lambda i: (i, 0))]),
        compiler_params=_cparams_rows(tile, (8, AC, PW)),
    )(xp, p["bb_w1"], p["bb_b1"], p["bb_w2"], p["b2anch"],
      p["cw1"], p["cb1"], p["cw2"], p["cb2"], p["cw3"], p["cb3"],
      p["wop"], p["bop"])
    if Mp != M:
        feats, packed = feats[:M], packed[:M]
    return feats, packed


# --------------------------------------------------------------------------
# Kernel B: full slot attention (k/v projections + 3 iterations) per batch
# --------------------------------------------------------------------------
def slot_attention_kernel(packed_ref, slots0_ref, ln_ref, wq_ref, bq_ref,
                          wk_ref, bk_ref, wv_ref, bv_ref,
                          gwih_ref, gwhh_ref, gbih_ref, gbhh_ref,
                          mw1_ref, mb1_ref, mw2_ref, mb2_ref,
                          attn_ref, attn_norm_ref, *, C, iters, scale, eps):
    lnp = ln_ref[...]                                # rows: in_g,in_b,s_g,s_b,p_g,p_b
    x = packed_ref[0][:, :C]                         # [N, C] invariant features
    x = _ln(x, lnp[0:1], lnp[1:2])
    k = jnp.dot(x, wk_ref[...], preferred_element_type=jnp.float32) + bk_ref[...]
    v = jnp.dot(x, wv_ref[...], preferred_element_type=jnp.float32) + bv_ref[...]

    slots = slots0_ref[...]                          # [S, C]
    attn = None
    for _ in range(iters):
        slots_prev = slots
        sn = _ln(slots, lnp[2:3], lnp[3:4])
        q = jnp.dot(sn, wq_ref[...], preferred_element_type=jnp.float32) + bq_ref[...]
        dots = lax.dot_general(q, k, (((1,), (1,)), ((), ())),
                               preferred_element_type=jnp.float32) * scale   # [S, N]
        m = jnp.max(dots, axis=0, keepdims=True)
        e = jnp.exp(dots - m)
        attn = e * pl.reciprocal(jnp.sum(e, axis=0, keepdims=True), approx=True) + eps
        w = attn * pl.reciprocal(jnp.sum(attn, axis=1, keepdims=True), approx=True)
        updates = jnp.dot(w, v, preferred_element_type=jnp.float32)          # [S, C]
        # GRU cell
        gi = jnp.dot(updates, gwih_ref[...], preferred_element_type=jnp.float32) + gbih_ref[...]
        gh = jnp.dot(slots_prev, gwhh_ref[...], preferred_element_type=jnp.float32) + gbhh_ref[...]
        r = jax.nn.sigmoid(gi[:, :C] + gh[:, :C])
        zg = jax.nn.sigmoid(gi[:, C:2 * C] + gh[:, C:2 * C])
        n = jnp.tanh(gi[:, 2 * C:] + r * gh[:, 2 * C:])
        slots = (1.0 - zg) * n + zg * slots_prev
        # residual MLP
        pre = _ln(slots, lnp[4:5], lnp[5:6])
        hmid = jnp.maximum(jnp.dot(pre, mw1_ref[...],
                                   preferred_element_type=jnp.float32) + mb1_ref[...], 0.0)
        slots = slots + jnp.dot(hmid, mw2_ref[...],
                                preferred_element_type=jnp.float32) + mb2_ref[...]

    attn_ref[0] = attn
    attn_norm_ref[0] = attn * pl.reciprocal(jnp.sum(attn, axis=-1, keepdims=True),
                                            approx=True)


def pl_slot_attention(packed_b, sp, S, C, iters=3, eps=1e-8):
    B, N, PW = packed_b.shape
    kern = functools.partial(slot_attention_kernel, C=C, iters=iters,
                             scale=float(C) ** -0.5, eps=eps)
    attn, attn_norm = pl.pallas_call(
        kern,
        out_shape=(jax.ShapeDtypeStruct((B, S, N), jnp.float32),
                   jax.ShapeDtypeStruct((B, S, N), jnp.float32)),
        grid_spec=pltpu.PrefetchScalarGridSpec(
            num_scalar_prefetch=0, grid=(B,),
            in_specs=[pl.BlockSpec((1, N, PW), lambda b: (b, 0, 0)),
                      _rep2(sp["slots0"]), _rep2(sp["ln"]),
                      _rep2(sp["wq"]), _rep2(sp["bq"]),
                      _rep2(sp["wk"]), _rep2(sp["bk"]),
                      _rep2(sp["wv"]), _rep2(sp["bv"]),
                      _rep2(sp["gru_wih"]), _rep2(sp["gru_whh"]),
                      _rep2(sp["gru_bih"]), _rep2(sp["gru_bhh"]),
                      _rep2(sp["mlp_w1"]), _rep2(sp["mlp_b1"]),
                      _rep2(sp["mlp_w2"]), _rep2(sp["mlp_b2"])],
            out_specs=[pl.BlockSpec((1, S, N), lambda b: (b, 0, 0)),
                       pl.BlockSpec((1, S, N), lambda b: (b, 0, 0))]),
        compiler_params=pltpu.CompilerParams(dimension_semantics=("parallel",)),
    )(packed_b, sp["slots0"], sp["ln"], sp["wq"], sp["bq"], sp["wk"], sp["bk"],
      sp["wv"], sp["bv"], sp["gru_wih"], sp["gru_whh"], sp["gru_bih"], sp["gru_bhh"],
      sp["mlp_w1"], sp["mlp_b1"], sp["mlp_w2"], sp["mlp_b2"])
    return attn, attn_norm


# --------------------------------------------------------------------------
# Kernel C: attention-weighted aggregation + per-slot pose-estimation MLP
# --------------------------------------------------------------------------
def agg_pose_kernel(attn_ref, feats_ref, pw1_ref, pb1_ref, pw2_ref, pb2_ref,
                    pw3_ref, pb3_ref, pose_ref):
    agg = jnp.dot(attn_ref[0], feats_ref[0], preferred_element_type=jnp.float32)  # [S, A*C]
    h = jnp.maximum(jnp.dot(agg, pw1_ref[...],
                            preferred_element_type=jnp.float32) + pb1_ref[...], 0.0)
    h = jnp.maximum(jnp.dot(h, pw2_ref[...],
                            preferred_element_type=jnp.float32) + pb2_ref[...], 0.0)
    pose_ref[0] = jnp.dot(h, pw3_ref[...], preferred_element_type=jnp.float32) + pb3_ref[...]


def pl_agg_pose(attn_norm, feats_b, p):
    B, S, N = attn_norm.shape
    AC = feats_b.shape[2]
    PWp = p["pw3"].shape[1]
    return pl.pallas_call(
        agg_pose_kernel,
        out_shape=jax.ShapeDtypeStruct((B, S, PWp), jnp.float32),
        grid_spec=pltpu.PrefetchScalarGridSpec(
            num_scalar_prefetch=0, grid=(B,),
            in_specs=[pl.BlockSpec((1, S, N), lambda b: (b, 0, 0)),
                      pl.BlockSpec((1, N, AC), lambda b: (b, 0, 0)),
                      _rep2(p["pw1"]), _rep2(p["pb1"]),
                      _rep2(p["pw2"]), _rep2(p["pb2"]),
                      _rep2(p["pw3"]), _rep2(p["pb3"])],
            out_specs=pl.BlockSpec((1, S, PWp), lambda b: (b, 0, 0))),
        compiler_params=pltpu.CompilerParams(dimension_semantics=("parallel",)),
    )(attn_norm, feats_b, p["pw1"], p["pb1"], p["pw2"], p["pb2"], p["pw3"], p["pb3"])


# --------------------------------------------------------------------------
# plain-JAX glue
# --------------------------------------------------------------------------
def get_rotation_matrix(Rs, eps=1e-12):
    # Rs: [B, S, A, 3, 3]; Gram-Schmidt on first two columns (torch semantics).
    a1 = Rs[..., 0]
    a2 = Rs[..., 1]
    b1 = a1 / jnp.maximum(jnp.sqrt(jnp.sum(a1 ** 2, axis=-1, keepdims=True)), eps)
    b2 = a2 - jnp.sum(b1 * a2, axis=-1, keepdims=True) * b1
    b2 = b2 / jnp.maximum(jnp.sqrt(jnp.sum(b2 ** 2, axis=-1, keepdims=True)), eps)
    b3 = jnp.cross(b1, b2)
    return jnp.stack([b1, b2, b3], axis=-1)


# --------------------------------------------------------------------------
# model forward
# --------------------------------------------------------------------------
def forward_one_iter(params, x, pose):
    B, _, N = x.shape
    C, A, S = params["C"], params["A"], params["num_slots"]

    # TODO(synk): M.preprocess_input + BasicSO3PoseConvBlock SO(3)-equivariant backbone
    # has no clean Pallas port; replaced by a pointwise xyz MLP whose anchor axis comes
    # from a learned anchor embedding (bias-broadcast, no anchor-tiled matmul).
    xyz_rows = jnp.transpose(x, (0, 2, 1)).reshape(B * N, 3)
    feats_flat, packed = pl_backbone_canon_inv(xyz_rows, params)     # [B*N,A*C],[B*N,128]

    # TODO(synk): batch-pair nearest-neighbour debug print loop (diffs/coo) omitted;
    # it has no effect on the outputs.

    canon_xyz = packed[:, C:C + A * 3].reshape(B, N, A, 3)

    # TODO(synk): ClsOutBlockPointnet replaced by a linear+ReLU with max over anchors
    # (computed inside kernel A); torch.normal slot init replaced by deterministic noise.
    attn_ori, attn_norm = pl_slot_attention(packed.reshape(B, N, -1),
                                            params["slot"], S, C)    # [B,S,N] x2
    attn_ori_t = jnp.transpose(attn_ori, (0, 2, 1))                  # [B,N,S]

    pose_slab = pl_agg_pose(attn_norm, feats_flat.reshape(B, N, A * C), params)
    pose_out = pose_slab[:, :, :A * 12].reshape(B, S, A, 12)
    est_rot = get_rotation_matrix(pose_out[..., :9].reshape(B, S, A, 3, 3))
    est_trans = pose_out[..., 9:]                                    # [B,S,A,3]

    # per-point slot assignment & reconstruction
    point_slot = jnp.argmax(attn_ori_t, axis=-1)                     # [B,N]
    bidx = jnp.arange(B)[:, None]
    rot_point = est_rot[bidx, point_slot]                            # [B,N,A,3,3]
    trans_point = est_trans[bidx, point_slot]                        # [B,N,A,3]

    recon = jnp.einsum("bnaij,bnaj->bnai", rot_point, canon_xyz) + trans_point
    xyz_t = jnp.transpose(x, (0, 2, 1))                              # [B,N,3]
    loss_orbit = jnp.mean(jnp.sum((recon - xyz_t[:, :, None, :]) ** 2, axis=-1),
                          axis=1)                                    # [B,A]
    recon_loss = jnp.min(loss_orbit, axis=-1)                        # [B]
    sel_orbit = jnp.argmin(loss_orbit, axis=-1)[:, None]             # [B,1]

    recon_t = jnp.transpose(recon, (0, 2, 1, 3))                     # [B,A,N,3]
    rot_point_t = jnp.transpose(rot_point, (0, 2, 1, 3, 4))          # [B,A,N,3,3]
    trans_point_t = jnp.transpose(trans_point, (0, 2, 1, 3))         # [B,A,N,3]
    sel_recon = recon_t[bidx, sel_orbit]                             # [B,1,N,3]
    sel_rot = rot_point_t[bidx, sel_orbit]                           # [B,1,N,3,3]
    sel_trans = trans_point_t[bidx, sel_orbit]                       # [B,1,N,3]

    sel_transformed = jnp.einsum("bknij,bknj->bkni", sel_rot, sel_recon) + sel_trans
    sel_pose = jnp.concatenate([sel_rot, sel_trans[..., None]], axis=-1)[:, 0]   # [B,N,3,4]
    sel_transformed = jnp.transpose(sel_transformed[:, 0], (0, 2, 1))            # [B,3,N]
    sel_pose = jnp.concatenate(
        [sel_pose, jnp.zeros((B, N, 1, 4), jnp.float32)], axis=2)                # [B,N,4,4]

    loss = jnp.mean(recon_loss)
    return loss, sel_transformed, sel_pose, attn_ori_t


def forward(params, x, pose, rlabel=None, nn_inter=2):
    B, N = x.shape[0], x.shape[2]
    init_pose = jnp.tile(jnp.eye(4, dtype=jnp.float32)[None, None], (B, N, 1, 1))
    del init_pose  # overwritten by `pose`, exactly as in the PyTorch forward
    nn_inter = 1
    tot_loss = 0.0
    cur_pts, cur_pose, attn = x, pose, None
    for _ in range(nn_inter):
        loss, cur_pts, cur_pose, attn = forward_one_iter(params, cur_pts, cur_pose)
        tot_loss = tot_loss + loss
    return tot_loss / nn_inter, attn


# --------------------------------------------------------------------------
# deterministic parameter init (all padded / block-diag weights built ONCE here)
# --------------------------------------------------------------------------
def init_params(key, C, A, S):
    keys = iter(jax.random.split(key, 96))

    def nrm(shape, scale=0.1):
        return (scale * jax.random.normal(next(keys), shape)).astype(jnp.float32)

    def conv_bn_fold(cin, cout):
        # fold eval-mode BatchNorm into the conv weight / bias
        w = nrm((cin, cout), 1.0 / (cin ** 0.5))
        b = nrm((cout,), 0.05)
        gamma = 1.0 + nrm((cout,), 0.05)
        beta = nrm((cout,), 0.05)
        mean = nrm((cout,), 0.05)
        var = 1.0 + jnp.abs(nrm((cout,), 0.05))
        s = gamma / jnp.sqrt(var + 1e-5)
        return w * s[None, :], (b - mean) * s + beta

    c2, c4 = C // 2, C // 4
    eyeA = jnp.eye(A, dtype=jnp.float32)
    PW = 128

    # backbone stand-in (K padded 3 -> 8; anchor bias folds bb_b2 + anchor embedding)
    bb_w1 = jnp.zeros((8, C), jnp.float32).at[:3].set(nrm((3, C), 1.0 / (3 ** 0.5)))
    bb_b1 = nrm((C,), 0.05).reshape(1, C)
    bb_w2 = nrm((C, C), 1.0 / (C ** 0.5))
    bb_b2 = nrm((C,), 0.05)
    anchor_emb = nrm((A, C), 0.5)
    b2anch = (anchor_emb + bb_b2[None, :]).reshape(1, A * C)

    # canonical-xyz block: per-anchor MLP as block-diagonal weights (BN folded);
    # final layer writes into packed columns [C, C + A*3)
    w1, b1 = conv_bn_fold(C, c2)
    w2, b2 = conv_bn_fold(c2, c4)
    w3 = nrm((c4, 3), 1.0 / (c4 ** 0.5))
    b3 = nrm((3,), 0.05)
    cw1 = jnp.kron(eyeA, w1)
    cb1 = jnp.tile(b1, (A,)).reshape(1, A * c2)
    cw2 = jnp.kron(eyeA, w2)
    cb2 = jnp.tile(b2, (A,)).reshape(1, A * c4)
    cw3 = jnp.zeros((A * c4, PW), jnp.float32)
    cb3 = jnp.zeros((1, PW), jnp.float32)
    for a in range(A):
        cw3 = cw3.at[a * c4:(a + 1) * c4, C + a * 3:C + a * 3 + 3].set(w3)
        cb3 = cb3.at[0, C + a * 3:C + a * 3 + 3].set(b3)

    # invariant-feature projection (ClsOutBlockPointnet stand-in), packed cols [0, C)
    ow = nrm((C, C), 1.0 / (C ** 0.5))
    ob = nrm((C,), 0.05)
    wop = jnp.zeros((C, PW), jnp.float32).at[:, :C].set(ow)
    bop = jnp.zeros((1, PW), jnp.float32).at[0, :C].set(ob)

    # pose-estimation block: block-diag per anchor, final layer padded to 128 lanes
    pw1, pb1 = conv_bn_fold(C, c2)
    pw2, pb2 = conv_bn_fold(c2, c4)
    pw3 = nrm((c4, 12), 1.0 / (c4 ** 0.5))
    pb3 = nrm((12,), 0.05)
    PWp = max(128, _round_up(A * 12, 128))
    pw3_p = jnp.zeros((A * c4, PWp), jnp.float32)
    pb3_p = jnp.zeros((1, PWp), jnp.float32)
    for a in range(A):
        pw3_p = pw3_p.at[a * c4:(a + 1) * c4, a * 12:(a + 1) * 12].set(pw3)
        pb3_p = pb3_p.at[0, a * 12:(a + 1) * 12].set(pb3)

    # slot attention (LN params packed into one [8, C] array: in_g,in_b,s_g,s_b,p_g,p_b)
    mu = nrm((1, 1, C), 0.5)
    sigma = jnp.abs(nrm((1, 1, C), 0.5))
    noise = nrm((1, S, C), 1.0)
    slot = dict(
        slots0=(mu + sigma * noise).reshape(S, C),
        ln=jnp.zeros((8, C), jnp.float32).at[0].set(1.0).at[2].set(1.0).at[4].set(1.0),
        wq=nrm((C, C), 1.0 / (C ** 0.5)), bq=nrm((C,), 0.05).reshape(1, C),
        wk=nrm((C, C), 1.0 / (C ** 0.5)), bk=nrm((C,), 0.05).reshape(1, C),
        wv=nrm((C, C), 1.0 / (C ** 0.5)), bv=nrm((C,), 0.05).reshape(1, C),
        gru_wih=nrm((C, 3 * C), 1.0 / (C ** 0.5)),
        gru_whh=nrm((C, 3 * C), 1.0 / (C ** 0.5)),
        gru_bih=nrm((3 * C,), 0.05).reshape(1, 3 * C),
        gru_bhh=nrm((3 * C,), 0.05).reshape(1, 3 * C),
        mlp_w1=nrm((C, C), 1.0 / (C ** 0.5)), mlp_b1=nrm((C,), 0.05).reshape(1, C),
        mlp_w2=nrm((C, C), 1.0 / (C ** 0.5)), mlp_b2=nrm((C,), 0.05).reshape(1, C),
    )

    return dict(
        C=C, A=A, num_slots=S,
        bb_w1=bb_w1, bb_b1=bb_b1, bb_w2=bb_w2, b2anch=b2anch,
        cw1=cw1, cb1=cb1, cw2=cw2, cb2=cb2, cw3=cw3, cb3=cb3,
        wop=wop, bop=bop,
        pw1=jnp.kron(eyeA, pw1), pb1=jnp.tile(pb1, (A,)).reshape(1, A * c2),
        pw2=jnp.kron(eyeA, pw2), pb2=jnp.tile(pb2, (A,)).reshape(1, A * c4),
        pw3=pw3_p, pb3=pb3_p,
        slot=slot,
    )


# --------------------------------------------------------------------------
if __name__ == "__main__":
    B, N, A, C, S = 2, 128, 4, 32, 4   # batch, npoints, kanchor, encoded_feat_dim, num_slots
    key = jax.random.PRNGKey(0)
    k_x, k_p = jax.random.split(key)
    x = jax.random.normal(k_x, (B, 3, N), dtype=jnp.float32)
    pose = jnp.tile(jnp.eye(4, dtype=jnp.float32)[None, None], (B, N, 1, 1))
    params = init_params(k_p, C, A, S)

    fwd = jax.jit(lambda xx, pp: forward(params, xx, pp))
    loss, attn = fwd(x, pose)
    jax.block_until_ready((loss, attn))
    assert attn.shape == (B, N, S)
    assert bool(jnp.isfinite(loss))
    print("KERNEL_OK")
</pallas_src>

<mosaic_0001>
module attributes {stable_mosaic.version = 11 : i64} {
  func.func @backbone_canon_inv_kernel(%arg0: i32, %arg1: memref<64x8xf32, #tpu.memory_space<vmem>>, %arg2: memref<8x32xf32, #tpu.memory_space<vmem>>, %arg3: memref<1x32xf32, #tpu.memory_space<vmem>>, %arg4: memref<32x32xf32, #tpu.memory_space<vmem>>, %arg5: memref<1x128xf32, #tpu.memory_space<vmem>>, %arg6: memref<128x64xf32, #tpu.memory_space<vmem>>, %arg7: memref<1x64xf32, #tpu.memory_space<vmem>>, %arg8: memref<64x32xf32, #tpu.memory_space<vmem>>, %arg9: memref<1x32xf32, #tpu.memory_space<vmem>>, %arg10: memref<32x128xf32, #tpu.memory_space<vmem>>, %arg11: memref<1x128xf32, #tpu.memory_space<vmem>>, %arg12: memref<32x128xf32, #tpu.memory_space<vmem>>, %arg13: memref<1x128xf32, #tpu.memory_space<vmem>>, %arg14: memref<64x128xf32, #tpu.memory_space<vmem>>, %arg15: memref<64x128xf32, #tpu.memory_space<vmem>>) attributes {dimension_semantics = [#tpu.dimension_semantics<parallel>], iteration_bounds = array<i64: 4>, scalar_prefetch = 0 : i64, scratch_operands = 0 : i64, tpu.core_type = #tpu.core_type<tc>, window_params = [{transform_indices = @transform_0, window_bounds = array<i64: 64, 8>}, {pipeline_mode = #tpu.pipeline_mode<synchronous>, transform_indices = @transform_1, window_bounds = array<i64: 8, 32>}, {pipeline_mode = #tpu.pipeline_mode<synchronous>, transform_indices = @transform_2, window_bounds = array<i64: 1, 32>}, {pipeline_mode = #tpu.pipeline_mode<synchronous>, transform_indices = @transform_3, window_bounds = array<i64: 32, 32>}, {pipeline_mode = #tpu.pipeline_mode<synchronous>, transform_indices = @transform_4, window_bounds = array<i64: 1, 128>}, {pipeline_mode = #tpu.pipeline_mode<synchronous>, transform_indices = @transform_5, window_bounds = array<i64: 128, 64>}, {pipeline_mode = #tpu.pipeline_mode<synchronous>, transform_indices = @transform_6, window_bounds = array<i64: 1, 64>}, {pipeline_mode = #tpu.pipeline_mode<synchronous>, transform_indices = @transform_7, window_bounds = array<i64: 64, 32>}, {pipeline_mode = #tpu.pipeline_mode<synchronous>, transform_indices = @transform_8, window_bounds = array<i64: 1, 32>}, {pipeline_mode = #tpu.pipeline_mode<synchronous>, transform_indices = @transform_9, window_bounds = array<i64: 32, 128>}, {pipeline_mode = #tpu.pipeline_mode<synchronous>, transform_indices = @transform_10, window_bounds = array<i64: 1, 128>}, {pipeline_mode = #tpu.pipeline_mode<synchronous>, transform_indices = @transform_11, window_bounds = array<i64: 32, 128>}, {pipeline_mode = #tpu.pipeline_mode<synchronous>, transform_indices = @transform_12, window_bounds = array<i64: 1, 128>}, {transform_indices = @transform_13, window_bounds = array<i64: 64, 128>}, {transform_indices = @transform_14, window_bounds = array<i64: 64, 128>}]} {
    %c0 = arith.constant 0 : index
    %c0_0 = arith.constant 0 : index
    %0 = vector.load %arg1[%c0, %c0_0] : memref<64x8xf32, #tpu.memory_space<vmem>>, vector<64x8xf32>
    %c0_1 = arith.constant 0 : index
    %c0_2 = arith.constant 0 : index
    %1 = vector.load %arg2[%c0_1, %c0_2] : memref<8x32xf32, #tpu.memory_space<vmem>>, vector<8x32xf32>
    %cst = arith.constant dense<0.000000e+00> : vector<64x32xf32>
    %2 = tpu.matmul %0, %1, %cst {dimension_numbers = #tpu.dot_dimension_numbers<[1], [0], [0], [1], [0, 0, 1, 1], [], []>} : vector<64x8xf32>, vector<8x32xf32>, vector<64x32xf32> -> vector<64x32xf32>
    %c0_3 = arith.constant 0 : index
    %c0_4 = arith.constant 0 : index
    %3 = vector.load %arg3[%c0_3, %c0_4] : memref<1x32xf32, #tpu.memory_space<vmem>>, vector<1x32xf32>
    %4 = vector.broadcast %3 : vector<1x32xf32> to vector<64x32xf32>
    %5 = arith.addf %2, %4 : vector<64x32xf32>
    %cst_5 = arith.constant 0.000000e+00 : f32
    %6 = vector.broadcast %cst_5 : f32 to vector<64x32xf32>
    %7 = arith.maximumf %5, %6 : vector<64x32xf32>
    %c0_6 = arith.constant 0 : index
    %c0_7 = arith.constant 0 : index
    %8 = vector.load %arg4[%c0_6, %c0_7] : memref<32x32xf32, #tpu.memory_space<vmem>>, vector<32x32xf32>
    %cst_8 = arith.constant dense<0.000000e+00> : vector<64x32xf32>
    %9 = tpu.matmul %7, %8, %cst_8 {dimension_numbers = #tpu.dot_dimension_numbers<[1], [0], [0], [1], [0, 0, 1, 1], [], []>} : vector<64x32xf32>, vector<32x32xf32>, vector<64x32xf32> -> vector<64x32xf32>
    %10 = tpu.concatenate %9, %9, %9, %9 in 1 : vector<64x32xf32>, vector<64x32xf32>, vector<64x32xf32>, vector<64x32xf32> -> vector<64x128xf32>
    %c0_9 = arith.constant 0 : index
    %c0_10 = arith.constant 0 : index
    %11 = vector.load %arg5[%c0_9, %c0_10] : memref<1x128xf32, #tpu.memory_space<vmem>>, vector<1x128xf32>
    %12 = vector.broadcast %11 : vector<1x128xf32> to vector<64x128xf32>
    %13 = arith.addf %10, %12 : vector<64x128xf32>
    %cst_11 = arith.constant 0.000000e+00 : f32
    %14 = vector.broadcast %cst_11 : f32 to vector<64x128xf32>
    %15 = arith.maximumf %13, %14 : vector<64x128xf32>
    %c0_12 = arith.constant 0 : index
    %c0_13 = arith.constant 0 : index
    %16 = vector.load %arg14[%c0_12, %c0_13] : memref<64x128xf32, #tpu.memory_space<vmem>>, vector<64x128xf32>
    tpu.vector_store %arg14[%c0_12, %c0_13], %15 {strides = array<i32>} : memref<64x128xf32, #tpu.memory_space<vmem>>, vector<64x128xf32>,
    %c0_14 = arith.constant 0 : index
    %c0_15 = arith.constant 0 : index
    %17 = vector.load %arg6[%c0_14, %c0_15] : memref<128x64xf32, #tpu.memory_space<vmem>>, vector<128x64xf32>
    %cst_16 = arith.constant dense<0.000000e+00> : vector<64x64xf32>
    %18 = tpu.matmul %15, %17, %cst_16 {dimension_numbers = #tpu.dot_dimension_numbers<[1], [0], [0], [1], [0, 0, 1, 1], [], []>} : vector<64x128xf32>, vector<128x64xf32>, vector<64x64xf32> -> vector<64x64xf32>
    %c0_17 = arith.constant 0 : index
    %c0_18 = arith.constant 0 : index
    %19 = vector.load %arg7[%c0_17, %c0_18] : memref<1x64xf32, #tpu.memory_space<vmem>>, vector<1x64xf32>
    %20 = vector.broadcast %19 : vector<1x64xf32> to vector<64x64xf32>
    %21 = arith.addf %18, %20 : vector<64x64xf32>
    %cst_19 = arith.constant 0.000000e+00 : f32
    %22 = vector.broadcast %cst_19 : f32 to vector<64x64xf32>
    %23 = arith.maximumf %21, %22 : vector<64x64xf32>
    %c0_20 = arith.constant 0 : index
    %c0_21 = arith.constant 0 : index
    %24 = vector.load %arg8[%c0_20, %c0_21] : memref<64x32xf32, #tpu.memory_space<vmem>>, vector<64x32xf32>
    %cst_22 = arith.constant dense<0.000000e+00> : vector<64x32xf32>
    %25 = tpu.matmul %23, %24, %cst_22 {dimension_numbers = #tpu.dot_dimension_numbers<[1], [0], [0], [1], [0, 0, 1, 1], [], []>} : vector<64x64xf32>, vector<64x32xf32>, vector<64x32xf32> -> vector<64x32xf32>
    %c0_23 = arith.constant 0 : index
    %c0_24 = arith.constant 0 : index
    %26 = vector.load %arg9[%c0_23, %c0_24] : memref<1x32xf32, #tpu.memory_space<vmem>>, vector<1x32xf32>
    %27 = vector.broadcast %26 : vector<1x32xf32> to vector<64x32xf32>
    %28 = arith.addf %25, %27 : vector<64x32xf32>
    %cst_25 = arith.constant 0.000000e+00 : f32
    %29 = vector.broadcast %cst_25 : f32 to vector<64x32xf32>
    %30 = arith.maximumf %28, %29 : vector<64x32xf32>
    %c0_26 = arith.constant 0 : index
    %c0_27 = arith.constant 0 : index
    %31 = vector.load %arg10[%c0_26, %c0_27] : memref<32x128xf32, #tpu.memory_space<vmem>>, vector<32x128xf32>
    %cst_28 = arith.constant dense<0.000000e+00> : vector<64x128xf32>
    %32 = tpu.matmul %30, %31, %cst_28 {dimension_numbers = #tpu.dot_dimension_numbers<[1], [0], [0], [1], [0, 0, 1, 1], [], []>} : vector<64x32xf32>, vector<32x128xf32>, vector<64x128xf32> -> vector<64x128xf32>
    %c0_29 = arith.constant 0 : index
    %c0_30 = arith.constant 0 : index
    %33 = vector.load %arg11[%c0_29, %c0_30] : memref<1x128xf32, #tpu.memory_space<vmem>>, vector<1x128xf32>
    %34 = vector.broadcast %33 : vector<1x128xf32> to vector<64x128xf32>
    %35 = arith.addf %32, %34 : vector<64x128xf32>
    %c0_31 = arith.constant 0 : index
    %c0_32 = arith.constant 0 : index
    %36 = vector.load %arg12[%c0_31, %c0_32] : memref<32x128xf32, #tpu.memory_space<vmem>>, vector<32x128xf32>
    %c0_33 = arith.constant 0 : index
    %c0_34 = arith.constant 0 : index
    %37 = vector.load %arg13[%c0_33, %c0_34] : memref<1x128xf32, #tpu.memory_space<vmem>>, vector<1x128xf32>
    %38 = vector.extract_strided_slice %15 {offsets = [0, 0], sizes = [64, 32], strides = [1, 1]} : vector<64x128xf32> to vector<64x32xf32>
    %cst_35 = arith.constant dense<0.000000e+00> : vector<64x128xf32>
    %39 = tpu.matmul %38, %36, %cst_35 {dimension_numbers = #tpu.dot_dimension_numbers<[1], [0], [0], [1], [0, 0, 1, 1], [], []>} : vector<64x32xf32>, vector<32x128xf32>, vector<64x128xf32> -> vector<64x128xf32>
    %40 = vector.broadcast %37 : vector<1x128xf32> to vector<64x128xf32>
    %41 = arith.addf %39, %40 : vector<64x128xf32>
    %cst_36 = arith.constant 0.000000e+00 : f32
    %42 = vector.broadcast %cst_36 : f32 to vector<64x128xf32>
    %43 = arith.maximumf %41, %42 : vector<64x128xf32>
    %44 = vector.extract_strided_slice %15 {offsets = [0, 32], sizes = [64, 32], strides = [1, 1]} : vector<64x128xf32> to vector<64x32xf32>
    %cst_37 = arith.constant dense<0.000000e+00> : vector<64x128xf32>
    %45 = tpu.matmul %44, %36, %cst_37 {dimension_numbers = #tpu.dot_dimension_numbers<[1], [0], [0], [1], [0, 0, 1, 1], [], []>} : vector<64x32xf32>, vector<32x128xf32>, vector<64x128xf32> -> vector<64x128xf32>
    %46 = vector.broadcast %37 : vector<1x128xf32> to vector<64x128xf32>
    %47 = arith.addf %45, %46 : vector<64x128xf32>
    %cst_38 = arith.constant 0.000000e+00 : f32
    %48 = vector.broadcast %cst_38 : f32 to vector<64x128xf32>
    %49 = arith.maximumf %47, %48 : vector<64x128xf32>
    %50 = arith.maximumf %43, %49 : vector<64x128xf32>
    %51 = vector.extract_strided_slice %15 {offsets = [0, 64], sizes = [64, 32], strides = [1, 1]} : vector<64x128xf32> to vector<64x32xf32>
    %cst_39 = arith.constant dense<0.000000e+00> : vector<64x128xf32>
    %52 = tpu.matmul %51, %36, %cst_39 {dimension_numbers = #tpu.dot_dimension_numbers<[1], [0], [0], [1], [0, 0, 1, 1], [], []>} : vector<64x32xf32>, vector<32x128xf32>, vector<64x128xf32> -> vector<64x128xf32>
    %53 = vector.broadcast %37 : vector<1x128xf32> to vector<64x128xf32>
    %54 = arith.addf %52, %53 : vector<64x128xf32>
    %cst_40 = arith.constant 0.000000e+00 : f32
    %55 = vector.broadcast %cst_40 : f32 to vector<64x128xf32>
    %56 = arith.maximumf %54, %55 : vector<64x128xf32>
    %57 = arith.maximumf %50, %56 : vector<64x128xf32>
    %58 = vector.extract_strided_slice %15 {offsets = [0, 96], sizes = [64, 32], strides = [1, 1]} : vector<64x128xf32> to vector<64x32xf32>
    %cst_41 = arith.constant dense<0.000000e+00> : vector<64x128xf32>
    %59 = tpu.matmul %58, %36, %cst_41 {dimension_numbers = #tpu.dot_dimension_numbers<[1], [0], [0], [1], [0, 0, 1, 1], [], []>} : vector<64x32xf32>, vector<32x128xf32>, vector<64x128xf32> -> vector<64x128xf32>
    %60 = vector.broadcast %37 : vector<1x128xf32> to vector<64x128xf32>
    %61 = arith.addf %59, %60 : vector<64x128xf32>
    %cst_42 = arith.constant 0.000000e+00 : f32
    %62 = vector.broadcast %cst_42 : f32 to vector<64x128xf32>
    %63 = arith.maximumf %61, %62 : vector<64x128xf32>
    %64 = arith.maximumf %57, %63 : vector<64x128xf32>
    %65 = arith.addf %35, %64 : vector<64x128xf32>
    %c0_43 = arith.constant 0 : index
    %c0_44 = arith.constant 0 : index
    %66 = vector.load %arg15[%c0_43, %c0_44] : memref<64x128xf32, #tpu.memory_space<vmem>>, vector<64x128xf32>
    tpu.vector_store %arg15[%c0_43, %c0_44], %65 {strides = array<i32>} : memref<64x128xf32, #tpu.memory_space<vmem>>, vector<64x128xf32>,
    return
  }
  func.func @transform_0(%arg0: i32) -> (i32, i32) {
    %c0_i32 = arith.constant 0 : i32
    %c0_i32_0 = arith.constant 0 : i32
    return %arg0, %c0_i32 : i32, i32
  }
  func.func @transform_1(%arg0: i32) -> (i32, i32) {
    %c0_i32 = arith.constant 0 : i32
    %c0_i32_0 = arith.constant 0 : i32
    %c0_i32_1 = arith.constant 0 : i32
    return %c0_i32, %c0_i32_0 : i32, i32
  }
  func.func @transform_2(%arg0: i32) -> (i32, i32) {
    %c0_i32 = arith.constant 0 : i32
    %c0_i32_0 = arith.constant 0 : i32
    %c0_i32_1 = arith.constant 0 : i32
    return %c0_i32, %c0_i32_0 : i32, i32
  }
  func.func @transform_3(%arg0: i32) -> (i32, i32) {
    %c0_i32 = arith.constant 0 : i32
    %c0_i32_0 = arith.constant 0 : i32
    %c0_i32_1 = arith.constant 0 : i32
    return %c0_i32, %c0_i32_0 : i32, i32
  }
  func.func @transform_4(%arg0: i32) -> (i32, i32) {
    %c0_i32 = arith.constant 0 : i32
    %c0_i32_0 = arith.constant 0 : i32
    %c0_i32_1 = arith.constant 0 : i32
    return %c0_i32, %c0_i32_0 : i32, i32
  }
  func.func @transform_5(%arg0: i32) -> (i32, i32) {
    %c0_i32 = arith.constant 0 : i32
    %c0_i32_0 = arith.constant 0 : i32
    %c0_i32_1 = arith.constant 0 : i32
    return %c0_i32, %c0_i32_0 : i32, i32
  }
  func.func @transform_6(%arg0: i32) -> (i32, i32) {
    %c0_i32 = arith.constant 0 : i32
    %c0_i32_0 = arith.constant 0 : i32
    %c0_i32_1 = arith.constant 0 : i32
    return %c0_i32, %c0_i32_0 : i32, i32
  }
  func.func @transform_7(%arg0: i32) -> (i32, i32) {
    %c0_i32 = arith.constant 0 : i32
    %c0_i32_0 = arith.constant 0 : i32
    %c0_i32_1 = arith.constant 0 : i32
    return %c0_i32, %c0_i32_0 : i32, i32
  }
  func.func @transform_8(%arg0: i32) -> (i32, i32) {
    %c0_i32 = arith.constant 0 : i32
    %c0_i32_0 = arith.constant 0 : i32
    %c0_i32_1 = arith.constant 0 : i32
    return %c0_i32, %c0_i32_0 : i32, i32
  }
  func.func @transform_9(%arg0: i32) -> (i32, i32) {
    %c0_i32 = arith.constant 0 : i32
    %c0_i32_0 = arith.constant 0 : i32
    %c0_i32_1 = arith.constant 0 : i32
    return %c0_i32, %c0_i32_0 : i32, i32
  }
  func.func @transform_10(%arg0: i32) -> (i32, i32) {
    %c0_i32 = arith.constant 0 : i32
    %c0_i32_0 = arith.constant 0 : i32
    %c0_i32_1 = arith.constant 0 : i32
    return %c0_i32, %c0_i32_0 : i32, i32
  }
  func.func @transform_11(%arg0: i32) -> (i32, i32) {
    %c0_i32 = arith.constant 0 : i32
    %c0_i32_0 = arith.constant 0 : i32
    %c0_i32_1 = arith.constant 0 : i32
    return %c0_i32, %c0_i32_0 : i32, i32
  }
  func.func @transform_12(%arg0: i32) -> (i32, i32) {
    %c0_i32 = arith.constant 0 : i32
    %c0_i32_0 = arith.constant 0 : i32
    %c0_i32_1 = arith.constant 0 : i32
    return %c0_i32, %c0_i32_0 : i32, i32
  }
  func.func @transform_13(%arg0: i32) -> (i32, i32) {
    %c0_i32 = arith.constant 0 : i32
    %c0_i32_0 = arith.constant 0 : i32
    return %arg0, %c0_i32 : i32, i32
  }
  func.func @transform_14(%arg0: i32) -> (i32, i32) {
    %c0_i32 = arith.constant 0 : i32
    %c0_i32_0 = arith.constant 0 : i32
    return %arg0, %c0_i32 : i32, i32
  }
}

module attributes {stable_mosaic.version = 11 : i64} {
  func.func @slot_attention_kernel(%arg0: i32, %arg1: memref<1x128x128xf32, #tpu.memory_space<vmem>>, %arg2: memref<4x32xf32, #tpu.memory_space<vmem>>, %arg3: memref<8x32xf32, #tpu.memory_space<vmem>>, %arg4: memref<32x32xf32, #tpu.memory_space<vmem>>, %arg5: memref<1x32xf32, #tpu.memory_space<vmem>>, %arg6: memref<32x32xf32, #tpu.memory_space<vmem>>, %arg7: memref<1x32xf32, #tpu.memory_space<vmem>>, %arg8: memref<32x32xf32, #tpu.memory_space<vmem>>, %arg9: memref<1x32xf32, #tpu.memory_space<vmem>>, %arg10: memref<32x96xf32, #tpu.memory_space<vmem>>, %arg11: memref<32x96xf32, #tpu.memory_space<vmem>>, %arg12: memref<1x96xf32, #tpu.memory_space<vmem>>, %arg13: memref<1x96xf32, #tpu.memory_space<vmem>>, %arg14: memref<32x32xf32, #tpu.memory_space<vmem>>, %arg15: memref<1x32xf32, #tpu.memory_space<vmem>>, %arg16: memref<32x32xf32, #tpu.memory_space<vmem>>, %arg17: memref<1x32xf32, #tpu.memory_space<vmem>>, %arg18: memref<1x4x128xf32, #tpu.memory_space<vmem>>, %arg19: memref<1x4x128xf32, #tpu.memory_space<vmem>>) attributes {dimension_semantics = [#tpu.dimension_semantics<parallel>], iteration_bounds = array<i64: 2>, scalar_prefetch = 0 : i64, scratch_operands = 0 : i64, tpu.core_type = #tpu.core_type<tc>, window_params = [{transform_indices = @transform_0, window_bounds = array<i64: 1, 128, 128>}, {pipeline_mode = #tpu.pipeline_mode<synchronous>, transform_indices = @transform_1, window_bounds = array<i64: 4, 32>}, {pipeline_mode = #tpu.pipeline_mode<synchronous>, transform_indices = @transform_2, window_bounds = array<i64: 8, 32>}, {pipeline_mode = #tpu.pipeline_mode<synchronous>, transform_indices = @transform_3, window_bounds = array<i64: 32, 32>}, {pipeline_mode = #tpu.pipeline_mode<synchronous>, transform_indices = @transform_4, window_bounds = array<i64: 1, 32>}, {pipeline_mode = #tpu.pipeline_mode<synchronous>, transform_indices = @transform_5, window_bounds = array<i64: 32, 32>}, {pipeline_mode = #tpu.pipeline_mode<synchronous>, transform_indices = @transform_6, window_bounds = array<i64: 1, 32>}, {pipeline_mode = #tpu.pipeline_mode<synchronous>, transform_indices = @transform_7, window_bounds = array<i64: 32, 32>}, {pipeline_mode = #tpu.pipeline_mode<synchronous>, transform_indices = @transform_8, window_bounds = array<i64: 1, 32>}, {pipeline_mode = #tpu.pipeline_mode<synchronous>, transform_indices = @transform_9, window_bounds = array<i64: 32, 96>}, {pipeline_mode = #tpu.pipeline_mode<synchronous>, transform_indices = @transform_10, window_bounds = array<i64: 32, 96>}, {pipeline_mode = #tpu.pipeline_mode<synchronous>, transform_indices = @transform_11, window_bounds = array<i64: 1, 96>}, {pipeline_mode = #tpu.pipeline_mode<synchronous>, transform_indices = @transform_12, window_bounds = array<i64: 1, 96>}, {pipeline_mode = #tpu.pipeline_mode<synchronous>, transform_indices = @transform_13, window_bounds = array<i64: 32, 32>}, {pipeline_mode = #tpu.pipeline_mode<synchronous>, transform_indices = @transform_14, window_bounds = array<i64: 1, 32>}, {pipeline_mode = #tpu.pipeline_mode<synchronous>, transform_indices = @transform_15, window_bounds = array<i64: 32, 32>}, {pipeline_mode = #tpu.pipeline_mode<synchronous>, transform_indices = @transform_16, window_bounds = array<i64: 1, 32>}, {transform_indices = @transform_17, window_bounds = array<i64: 1, 4, 128>}, {transform_indices = @transform_18, window_bounds = array<i64: 1, 4, 128>}]} {
    %c0 = arith.constant 0 : index
    %c0_0 = arith.constant 0 : index
    %0 = vector.load %arg3[%c0, %c0_0] : memref<8x32xf32, #tpu.memory_space<vmem>>, vector<8x32xf32>
    %c0_1 = arith.constant 0 : index
    %c0_2 = arith.constant 0 : index
    %c0_3 = arith.constant 0 : index
    %1 = vector.load %arg1[%c0_1, %c0_2, %c0_3] : memref<1x128x128xf32, #tpu.memory_space<vmem>>, vector<1x128x128xf32>
    %2 = vector.shape_cast %1 : vector<1x128x128xf32> to vector<128x128xf32>
    %3 = vector.extract_strided_slice %2 {offsets = [0, 0], sizes = [128, 32], strides = [1, 1]} : vector<128x128xf32> to vector<128x32xf32>
    %4 = vector.extract_strided_slice %0 {offsets = [0, 0], sizes = [1, 32], strides = [1, 1]} : vector<8x32xf32> to vector<1x32xf32>
    %5 = vector.extract_strided_slice %0 {offsets = [1, 0], sizes = [1, 32], strides = [1, 1]} : vector<8x32xf32> to vector<1x32xf32>
    %cst = arith.constant dense<0.000000e+00> : vector<128xf32>
    %6 = vector.multi_reduction <add>, %3, %cst [1] : vector<128x32xf32> to vector<128xf32>
    %7 = vector.shape_cast %6 : vector<128xf32> to vector<128x1xf32>
    %cst_4 = arith.constant 3.200000e+01 : f32
    %8 = vector.broadcast %cst_4 : f32 to vector<128x1xf32>
    %9 = arith.divf %7, %8 : vector<128x1xf32>
    %10 = vector.broadcast %9 : vector<128x1xf32> to vector<128x32xf32>
    %11 = arith.subf %3, %10 : vector<128x32xf32>
    %12 = arith.mulf %11, %11 : vector<128x32xf32>
    %cst_5 = arith.constant dense<0.000000e+00> : vector<128xf32>
    %13 = vector.multi_reduction <add>, %12, %cst_5 [1] : vector<128x32xf32> to vector<128xf32>
    %14 = vector.shape_cast %13 : vector<128xf32> to vector<128x1xf32>
    %cst_6 = arith.constant 3.200000e+01 : f32
    %15 = vector.broadcast %cst_6 : f32 to vector<128x1xf32>
    %16 = arith.divf %14, %15 : vector<128x1xf32>
    %17 = vector.broadcast %9 : vector<128x1xf32> to vector<128x32xf32>
    %18 = arith.subf %3, %17 : vector<128x32xf32>
    %cst_7 = arith.constant 9.99999974E-6 : f32
    %19 = vector.broadcast %cst_7 : f32 to vector<128x1xf32>
    %20 = arith.addf %16, %19 : vector<128x1xf32>
    %21 = math.rsqrt %20 : vector<128x1xf32>
    %22 = vector.broadcast %21 : vector<128x1xf32> to vector<128x32xf32>
    %23 = arith.mulf %18, %22 : vector<128x32xf32>
    %24 = vector.broadcast %4 : vector<1x32xf32> to vector<128x32xf32>
    %25 = arith.mulf %23, %24 : vector<128x32xf32>
    %26 = vector.broadcast %5 : vector<1x32xf32> to vector<128x32xf32>
    %27 = arith.addf %25, %26 : vector<128x32xf32>
    %c0_8 = arith.constant 0 : index
    %c0_9 = arith.constant 0 : index
    %28 = vector.load %arg6[%c0_8, %c0_9] : memref<32x32xf32, #tpu.memory_space<vmem>>, vector<32x32xf32>
    %cst_10 = arith.constant dense<0.000000e+00> : vector<128x32xf32>
    %29 = tpu.matmul %27, %28, %cst_10 {dimension_numbers = #tpu.dot_dimension_numbers<[1], [0], [0], [1], [0, 0, 1, 1], [], []>} : vector<128x32xf32>, vector<32x32xf32>, vector<128x32xf32> -> vector<128x32xf32>
    %c0_11 = arith.constant 0 : index
    %c0_12 = arith.constant 0 : index
    %30 = vector.load %arg7[%c0_11, %c0_12] : memref<1x32xf32, #tpu.memory_space<vmem>>, vector<1x32xf32>
    %31 = vector.broadcast %30 : vector<1x32xf32> to vector<128x32xf32>
    %32 = arith.addf %29, %31 : vector<128x32xf32>
    %c0_13 = arith.constant 0 : index
    %c0_14 = arith.constant 0 : index
    %33 = vector.load %arg8[%c0_13, %c0_14] : memref<32x32xf32, #tpu.memory_space<vmem>>, vector<32x32xf32>
    %cst_15 = arith.constant dense<0.000000e+00> : vector<128x32xf32>
    %34 = tpu.matmul %27, %33, %cst_15 {dimension_numbers = #tpu.dot_dimension_numbers<[1], [0], [0], [1], [0, 0, 1, 1], [], []>} : vector<128x32xf32>, vector<32x32xf32>, vector<128x32xf32> -> vector<128x32xf32>
    %c0_16 = arith.constant 0 : index
    %c0_17 = arith.constant 0 : index
    %35 = vector.load %arg9[%c0_16, %c0_17] : memref<1x32xf32, #tpu.memory_space<vmem>>, vector<1x32xf32>
    %36 = vector.broadcast %35 : vector<1x32xf32> to vector<128x32xf32>
    %37 = arith.addf %34, %36 : vector<128x32xf32>
    %c0_18 = arith.constant 0 : index
    %c0_19 = arith.constant 0 : index
    %38 = vector.load %arg2[%c0_18, %c0_19] : memref<4x32xf32, #tpu.memory_space<vmem>>, vector<4x32xf32>
    %39 = vector.extract_strided_slice %0 {offsets = [2, 0], sizes = [1, 32], strides = [1, 1]} : vector<8x32xf32> to vector<1x32xf32>
    %40 = vector.extract_strided_slice %0 {offsets = [3, 0], sizes = [1, 32], strides = [1, 1]} : vector<8x32xf32> to vector<1x32xf32>
    %cst_20 = arith.constant dense<0.000000e+00> : vector<4xf32>
    %41 = vector.multi_reduction <add>, %38, %cst_20 [1] : vector<4x32xf32> to vector<4xf32>
    %42 = vector.shape_cast %41 : vector<4xf32> to vector<4x1xf32>
    %cst_21 = arith.constant 3.200000e+01 : f32
    %43 = vector.broadcast %cst_21 : f32 to vector<4x1xf32>
    %44 = arith.divf %42, %43 : vector<4x1xf32>
    %45 = vector.broadcast %44 : vector<4x1xf32> to vector<4x32xf32>
    %46 = arith.subf %38, %45 : vector<4x32xf32>
    %47 = arith.mulf %46, %46 : vector<4x32xf32>
    %cst_22 = arith.constant dense<0.000000e+00> : vector<4xf32>
    %48 = vector.multi_reduction <add>, %47, %cst_22 [1] : vector<4x32xf32> to vector<4xf32>
    %49 = vector.shape_cast %48 : vector<4xf32> to vector<4x1xf32>
    %cst_23 = arith.constant 3.200000e+01 : f32
    %50 = vector.broadcast %cst_23 : f32 to vector<4x1xf32>
    %51 = arith.divf %49, %50 : vector<4x1xf32>
    %52 = vector.broadcast %44 : vector<4x1xf32> to vector<4x32xf32>
    %53 = arith.subf %38, %52 : vector<4x32xf32>
    %cst_24 = arith.constant 9.99999974E-6 : f32
    %54 = vector.broadcast %cst_24 : f32 to vector<4x1xf32>
    %55 = arith.addf %51, %54 : vector<4x1xf32>
    %56 = math.rsqrt %55 : vector<4x1xf32>
    %57 = vector.broadcast %56 : vector<4x1xf32> to vector<4x32xf32>
    %58 = arith.mulf %53, %57 : vector<4x32xf32>
    %59 = vector.broadcast %39 : vector<1x32xf32> to vector<4x32xf32>
    %60 = arith.mulf %58, %59 : vector<4x32xf32>
    %61 = vector.broadcast %40 : vector<1x32xf32> to vector<4x32xf32>
    %62 = arith.addf %60, %61 : vector<4x32xf32>
    %c0_25 = arith.constant 0 : index
    %c0_26 = arith.constant 0 : index
    %63 = vector.load %arg4[%c0_25, %c0_26] : memref<32x32xf32, #tpu.memory_space<vmem>>, vector<32x32xf32>
    %cst_27 = arith.constant dense<0.000000e+00> : vector<4x32xf32>
    %64 = tpu.matmul %62, %63, %cst_27 {dimension_numbers = #tpu.dot_dimension_numbers<[1], [0], [0], [1], [0, 0, 1, 1], [], []>} : vector<4x32xf32>, vector<32x32xf32>, vector<4x32xf32> -> vector<4x32xf32>
    %c0_28 = arith.constant 0 : index
    %c0_29 = arith.constant 0 : index
    %65 = vector.load %arg5[%c0_28, %c0_29] : memref<1x32xf32, #tpu.memory_space<vmem>>, vector<1x32xf32>
    %66 = vector.broadcast %65 : vector<1x32xf32> to vector<4x32xf32>
    %67 = arith.addf %64, %66 : vector<4x32xf32>
    %cst_30 = arith.constant dense<0.000000e+00> : vector<4x128xf32>
    %68 = tpu.matmul %67, %32, %cst_30 {dimension_numbers = #tpu.dot_dimension_numbers<[1], [1], [0], [0], [0, 0, 1, 0], [], []>} : vector<4x32xf32>, vector<128x32xf32>, vector<4x128xf32> -> vector<4x128xf32>
    %cst_31 = arith.constant 0.176776692 : f32
    %69 = vector.broadcast %cst_31 : f32 to vector<4x128xf32>
    %70 = arith.mulf %68, %69 : vector<4x128xf32>
    %cst_32 = arith.constant dense<0xFF800000> : vector<128xf32>
    %71 = vector.multi_reduction <maximumf>, %70, %cst_32 [0] : vector<4x128xf32> to vector<128xf32>
    %72 = vector.shape_cast %71 : vector<128xf32> to vector<1x128xf32>
    %73 = vector.broadcast %72 : vector<1x128xf32> to vector<4x128xf32>
    %74 = arith.subf %70, %73 : vector<4x128xf32>
    %75 = math.exp %74 : vector<4x128xf32>
    %cst_33 = arith.constant dense<0.000000e+00> : vector<128xf32>
    %76 = vector.multi_reduction <add>, %75, %cst_33 [0] : vector<4x128xf32> to vector<128xf32>
    %77 = vector.shape_cast %76 : vector<128xf32> to vector<1x128xf32>
    %78 = tpu.reciprocal %77 {approx = true} : vector<1x128xf32> -> vector<1x128xf32>
    %79 = vector.broadcast %78 : vector<1x128xf32> to vector<4x128xf32>
    %80 = arith.mulf %75, %79 : vector<4x128xf32>
    %cst_34 = arith.constant 9.99999993E-9 : f32
    %81 = vector.broadcast %cst_34 : f32 to vector<4x128xf32>
    %82 = arith.addf %80, %81 : vector<4x128xf32>
    %cst_35 = arith.constant dense<0.000000e+00> : vector<4xf32>
    %83 = vector.multi_reduction <add>, %82, %cst_35 [1] : vector<4x128xf32> to vector<4xf32>
    %84 = vector.shape_cast %83 : vector<4xf32> to vector<4x1xf32>
    %85 = tpu.reciprocal %84 {approx = true} : vector<4x1xf32> -> vector<4x1xf32>
    %86 = vector.broadcast %85 : vector<4x1xf32> to vector<4x128xf32>
    %87 = arith.mulf %82, %86 : vector<4x128xf32>
    %cst_36 = arith.constant dense<0.000000e+00> : vector<4x32xf32>
    %88 = tpu.matmul %87, %37, %cst_36 {dimension_numbers = #tpu.dot_dimension_numbers<[1], [0], [0], [1], [0, 0, 1, 1], [], []>} : vector<4x128xf32>, vector<128x32xf32>, vector<4x32xf32> -> vector<4x32xf32>
    %c0_37 = arith.constant 0 : index
    %c0_38 = arith.constant 0 : index
    %89 = vector.load %arg10[%c0_37, %c0_38] : memref<32x96xf32, #tpu.memory_space<vmem>>, vector<32x96xf32>
    %cst_39 = arith.constant dense<0.000000e+00> : vector<4x96xf32>
    %90 = tpu.matmul %88, %89, %cst_39 {dimension_numbers = #tpu.dot_dimension_numbers<[1], [0], [0], [1], [0, 0, 1, 1], [], []>} : vector<4x32xf32>, vector<32x96xf32>, vector<4x96xf32> -> vector<4x96xf32>
    %c0_40 = arith.constant 0 : index
    %c0_41 = arith.constant 0 : index
    %91 = vector.load %arg12[%c0_40, %c0_41] : memref<1x96xf32, #tpu.memory_space<vmem>>, vector<1x96xf32>
    %92 = vector.broadcast %91 : vector<1x96xf32> to vector<4x96xf32>
    %93 = arith.addf %90, %92 : vector<4x96xf32>
    %c0_42 = arith.constant 0 : index
    %c0_43 = arith.constant 0 : index
    %94 = vector.load %arg11[%c0_42, %c0_43] : memref<32x96xf32, #tpu.memory_space<vmem>>, vector<32x96xf32>
    %cst_44 = arith.constant dense<0.000000e+00> : vector<4x96xf32>
    %95 = tpu.matmul %38, %94, %cst_44 {dimension_numbers = #tpu.dot_dimension_numbers<[1], [0], [0], [1], [0, 0, 1, 1], [], []>} : vector<4x32xf32>, vector<32x96xf32>, vector<4x96xf32> -> vector<4x96xf32>
    %c0_45 = arith.constant 0 : index
    %c0_46 = arith.constant 0 : index
    %96 = vector.load %arg13[%c0_45, %c0_46] : memref<1x96xf32, #tpu.memory_space<vmem>>, vector<1x96xf32>
    %97 = vector.broadcast %96 : vector<1x96xf32> to vector<4x96xf32>
    %98 = arith.addf %95, %97 : vector<4x96xf32>
    %99 = vector.extract_strided_slice %93 {offsets = [0, 0], sizes = [4, 32], strides = [1, 1]} : vector<4x96xf32> to vector<4x32xf32>
    %100 = vector.extract_strided_slice %98 {offsets = [0, 0], sizes = [4, 32], strides = [1, 1]} : vector<4x96xf32> to vector<4x32xf32>
    %101 = arith.addf %99, %100 : vector<4x32xf32>
    %102 = arith.negf %101 : vector<4x32xf32>
    %103 = math.exp %102 : vector<4x32xf32>
    %cst_47 = arith.constant 1.000000e+00 : f32
    %104 = vector.broadcast %cst_47 : f32 to vector<4x32xf32>
    %105 = arith.addf %104, %103 : vector<4x32xf32>
    %106 = arith.divf %104, %105 : vector<4x32xf32>
    %107 = vector.extract_strided_slice %93 {offsets = [0, 32], sizes = [4, 32], strides = [1, 1]} : vector<4x96xf32> to vector<4x32xf32>
    %108 = vector.extract_strided_slice %98 {offsets = [0, 32], sizes = [4, 32], strides = [1, 1]} : vector<4x96xf32> to vector<4x32xf32>
    %109 = arith.addf %107, %108 : vector<4x32xf32>
    %110 = arith.negf %109 : vector<4x32xf32>
    %111 = math.exp %110 : vector<4x32xf32>
    %cst_48 = arith.constant 1.000000e+00 : f32
    %112 = vector.broadcast %cst_48 : f32 to vector<4x32xf32>
    %113 = arith.addf %112, %111 : vector<4x32xf32>
    %114 = arith.divf %112, %113 : vector<4x32xf32>
    %115 = vector.extract_strided_slice %93 {offsets = [0, 64], sizes = [4, 32], strides = [1, 1]} : vector<4x96xf32> to vector<4x32xf32>
    %116 = vector.extract_strided_slice %98 {offsets = [0, 64], sizes = [4, 32], strides = [1, 1]} : vector<4x96xf32> to vector<4x32xf32>
    %117 = arith.mulf %106, %116 : vector<4x32xf32>
    %118 = arith.addf %115, %117 : vector<4x32xf32>
    %119 = math.tanh %118 : vector<4x32xf32>
    %cst_49 = arith.constant 1.000000e+00 : f32
    %120 = vector.broadcast %cst_49 : f32 to vector<4x32xf32>
    %121 = arith.subf %120, %114 : vector<4x32xf32>
    %122 = arith.mulf %121, %119 : vector<4x32xf32>
    %123 = arith.mulf %114, %38 : vector<4x32xf32>
    %124 = arith.addf %122, %123 : vector<4x32xf32>
    %125 = vector.extract_strided_slice %0 {offsets = [4, 0], sizes = [1, 32], strides = [1, 1]} : vector<8x32xf32> to vector<1x32xf32>
    %126 = vector.extract_strided_slice %0 {offsets = [5, 0], sizes = [1, 32], strides = [1, 1]} : vector<8x32xf32> to vector<1x32xf32>
    %cst_50 = arith.constant dense<0.000000e+00> : vector<4xf32>
    %127 = vector.multi_reduction <add>, %124, %cst_50 [1] : vector<4x32xf32> to vector<4xf32>
    %128 = vector.shape_cast %127 : vector<4xf32> to vector<4x1xf32>
    %cst_51 = arith.constant 3.200000e+01 : f32
    %129 = vector.broadcast %cst_51 : f32 to vector<4x1xf32>
    %130 = arith.divf %128, %129 : vector<4x1xf32>
    %131 = vector.broadcast %130 : vector<4x1xf32> to vector<4x32xf32>
    %132 = arith.subf %124, %131 : vector<4x32xf32>
    %133 = arith.mulf %132, %132 : vector<4x32xf32>
    %cst_52 = arith.constant dense<0.000000e+00> : vector<4xf32>
    %134 = vector.multi_reduction <add>, %133, %cst_52 [1] : vector<4x32xf32> to vector<4xf32>
    %135 = vector.shape_cast %134 : vector<4xf32> to vector<4x1xf32>
    %cst_53 = arith.constant 3.200000e+01 : f32
    %136 = vector.broadcast %cst_53 : f32 to vector<4x1xf32>
    %137 = arith.divf %135, %136 : vector<4x1xf32>
    %138 = vector.broadcast %130 : vector<4x1xf32> to vector<4x32xf32>
    %139 = arith.subf %124, %138 : vector<4x32xf32>
    %cst_54 = arith.constant 9.99999974E-6 : f32
    %140 = vector.broadcast %cst_54 : f32 to vector<4x1xf32>
    %141 = arith.addf %137, %140 : vector<4x1xf32>
    %142 = math.rsqrt %141 : vector<4x1xf32>
    %143 = vector.broadcast %142 : vector<4x1xf32> to vector<4x32xf32>
    %144 = arith.mulf %139, %143 : vector<4x32xf32>
    %145 = vector.broadcast %125 : vector<1x32xf32> to vector<4x32xf32>
    %146 = arith.mulf %144, %145 : vector<4x32xf32>
    %147 = vector.broadcast %126 : vector<1x32xf32> to vector<4x32xf32>
    %148 = arith.addf %146, %147 : vector<4x32xf32>
    %c0_55 = arith.constant 0 : index
    %c0_56 = arith.constant 0 : index
    %149 = vector.load %arg14[%c0_55, %c0_56] : memref<32x32xf32, #tpu.memory_space<vmem>>, vector<32x32xf32>
    %cst_57 = arith.constant dense<0.000000e+00> : vector<4x32xf32>
    %150 = tpu.matmul %148, %149, %cst_57 {dimension_numbers = #tpu.dot_dimension_numbers<[1], [0], [0], [1], [0, 0, 1, 1], [], []>} : vector<4x32xf32>, vector<32x32xf32>, vector<4x32xf32> -> vector<4x32xf32>
    %c0_58 = arith.constant 0 : index
    %c0_59 = arith.constant 0 : index
    %151 = vector.load %arg15[%c0_58, %c0_59] : memref<1x32xf32, #tpu.memory_space<vmem>>, vector<1x32xf32>
    %152 = vector.broadcast %151 : vector<1x32xf32> to vector<4x32xf32>
    %153 = arith.addf %150, %152 : vector<4x32xf32>
    %cst_60 = arith.constant 0.000000e+00 : f32
    %154 = vector.broadcast %cst_60 : f32 to vector<4x32xf32>
    %155 = arith.maximumf %153, %154 : vector<4x32xf32>
    %c0_61 = arith.constant 0 : index
    %c0_62 = arith.constant 0 : index
    %156 = vector.load %arg16[%c0_61, %c0_62] : memref<32x32xf32, #tpu.memory_space<vmem>>, vector<32x32xf32>
    %cst_63 = arith.constant dense<0.000000e+00> : vector<4x32xf32>
    %157 = tpu.matmul %155, %156, %cst_63 {dimension_numbers = #tpu.dot_dimension_numbers<[1], [0], [0], [1], [0, 0, 1, 1], [], []>} : vector<4x32xf32>, vector<32x32xf32>, vector<4x32xf32> -> vector<4x32xf32>
    %158 = arith.addf %124, %157 : vector<4x32xf32>
    %c0_64 = arith.constant 0 : index
    %c0_65 = arith.constant 0 : index
    %159 = vector.load %arg17[%c0_64, %c0_65] : memref<1x32xf32, #tpu.memory_space<vmem>>, vector<1x32xf32>
    %160 = vector.broadcast %159 : vector<1x32xf32> to vector<4x32xf32>
    %161 = arith.addf %158, %160 : vector<4x32xf32>
    %162 = vector.extract_strided_slice %0 {offsets = [2, 0], sizes = [1, 32], strides = [1, 1]} : vector<8x32xf32> to vector<1x32xf32>
    %163 = vector.extract_strided_slice %0 {offsets = [3, 0], sizes = [1, 32], strides = [1, 1]} : vector<8x32xf32> to vector<1x32xf32>
    %cst_66 = arith.constant dense<0.000000e+00> : vector<4xf32>
    %164 = vector.multi_reduction <add>, %161, %cst_66 [1] : vector<4x32xf32> to vector<4xf32>
    %165 = vector.shape_cast %164 : vector<4xf32> to vector<4x1xf32>
    %cst_67 = arith.constant 3.200000e+01 : f32
    %166 = vector.broadcast %cst_67 : f32 to vector<4x1xf32>
    %167 = arith.divf %165, %166 : vector<4x1xf32>
    %168 = vector.broadcast %167 : vector<4x1xf32> to vector<4x32xf32>
    %169 = arith.subf %161, %168 : vector<4x32xf32>
    %170 = arith.mulf %169, %169 : vector<4x32xf32>
    %cst_68 = arith.constant dense<0.000000e+00> : vector<4xf32>
    %171 = vector.multi_reduction <add>, %170, %cst_68 [1] : vector<4x32xf32> to vector<4xf32>
    %172 = vector.shape_cast %171 : vector<4xf32> to vector<4x1xf32>
    %cst_69 = arith.constant 3.200000e+01 : f32
    %173 = vector.broadcast %cst_69 : f32 to vector<4x1xf32>
    %174 = arith.divf %172, %173 : vector<4x1xf32>
    %175 = vector.broadcast %167 : vector<4x1xf32> to vector<4x32xf32>
    %176 = arith.subf %161, %175 : vector<4x32xf32>
    %cst_70 = arith.constant 9.99999974E-6 : f32
    %177 = vector.broadcast %cst_70 : f32 to vector<4x1xf32>
    %178 = arith.addf %174, %177 : vector<4x1xf32>
    %179 = math.rsqrt %178 : vector<4x1xf32>
    %180 = vector.broadcast %179 : vector<4x1xf32> to vector<4x32xf32>
    %181 = arith.mulf %176, %180 : vector<4x32xf32>
    %182 = vector.broadcast %162 : vector<1x32xf32> to vector<4x32xf32>
    %183 = arith.mulf %181, %182 : vector<4x32xf32>
    %184 = vector.broadcast %163 : vector<1x32xf32> to vector<4x32xf32>
    %185 = arith.addf %183, %184 : vector<4x32xf32>
    %c0_71 = arith.constant 0 : index
    %c0_72 = arith.constant 0 : index
    %186 = vector.load %arg4[%c0_71, %c0_72] : memref<32x32xf32, #tpu.memory_space<vmem>>, vector<32x32xf32>
    %cst_73 = arith.constant dense<0.000000e+00> : vector<4x32xf32>
    %187 = tpu.matmul %185, %186, %cst_73 {dimension_numbers = #tpu.dot_dimension_numbers<[1], [0], [0], [1], [0, 0, 1, 1], [], []>} : vector<4x32xf32>, vector<32x32xf32>, vector<4x32xf32> -> vector<4x32xf32>
    %c0_74 = arith.constant 0 : index
    %c0_75 = arith.constant 0 : index
    %188 = vector.load %arg5[%c0_74, %c0_75] : memref<1x32xf32, #tpu.memory_space<vmem>>, vector<1x32xf32>
    %189 = vector.broadcast %188 : vector<1x32xf32> to vector<4x32xf32>
    %190 = arith.addf %187, %189 : vector<4x32xf32>
    %cst_76 = arith.constant dense<0.000000e+00> : vector<4x128xf32>
    %191 = tpu.matmul %190, %32, %cst_76 {dimension_numbers = #tpu.dot_dimension_numbers<[1], [1], [0], [0], [0, 0, 1, 0], [], []>} : vector<4x32xf32>, vector<128x32xf32>, vector<4x128xf32> -> vector<4x128xf32>
    %cst_77 = arith.constant 0.176776692 : f32
    %192 = vector.broadcast %cst_77 : f32 to vector<4x128xf32>
    %193 = arith.mulf %191, %192 : vector<4x128xf32>
    %cst_78 = arith.constant dense<0xFF800000> : vector<128xf32>
    %194 = vector.multi_reduction <maximumf>, %193, %cst_78 [0] : vector<4x128xf32> to vector<128xf32>
    %195 = vector.shape_cast %194 : vector<128xf32> to vector<1x128xf32>
    %196 = vector.broadcast %195 : vector<1x128xf32> to vector<4x128xf32>
    %197 = arith.subf %193, %196 : vector<4x128xf32>
    %198 = math.exp %197 : vector<4x128xf32>
    %cst_79 = arith.constant dense<0.000000e+00> : vector<128xf32>
    %199 = vector.multi_reduction <add>, %198, %cst_79 [0] : vector<4x128xf32> to vector<128xf32>
    %200 = vector.shape_cast %199 : vector<128xf32> to vector<1x128xf32>
    %201 = tpu.reciprocal %200 {approx = true} : vector<1x128xf32> -> vector<1x128xf32>
    %202 = vector.broadcast %201 : vector<1x128xf32> to vector<4x128xf32>
    %203 = arith.mulf %198, %202 : vector<4x128xf32>
    %cst_80 = arith.constant 9.99999993E-9 : f32
    %204 = vector.broadcast %cst_80 : f32 to vector<4x128xf32>
    %205 = arith.addf %203, %204 : vector<4x128xf32>
    %cst_81 = arith.constant dense<0.000000e+00> : vector<4xf32>
    %206 = vector.multi_reduction <add>, %205, %cst_81 [1] : vector<4x128xf32> to vector<4xf32>
    %207 = vector.shape_cast %206 : vector<4xf32> to vector<4x1xf32>
    %208 = tpu.reciprocal %207 {approx = true} : vector<4x1xf32> -> vector<4x1xf32>
    %209 = vector.broadcast %208 : vector<4x1xf32> to vector<4x128xf32>
    %210 = arith.mulf %205, %209 : vector<4x128xf32>
    %cst_82 = arith.constant dense<0.000000e+00> : vector<4x32xf32>
    %211 = tpu.matmul %210, %37, %cst_82 {dimension_numbers = #tpu.dot_dimension_numbers<[1], [0], [0], [1], [0, 0, 1, 1], [], []>} : vector<4x128xf32>, vector<128x32xf32>, vector<4x32xf32> -> vector<4x32xf32>
    %c0_83 = arith.constant 0 : index
    %c0_84 = arith.constant 0 : index
    %212 = vector.load %arg10[%c0_83, %c0_84] : memref<32x96xf32, #tpu.memory_space<vmem>>, vector<32x96xf32>
    %cst_85 = arith.constant dense<0.000000e+00> : vector<4x96xf32>
    %213 = tpu.matmul %211, %212, %cst_85 {dimension_numbers = #tpu.dot_dimension_numbers<[1], [0], [0], [1], [0, 0, 1, 1], [], []>} : vector<4x32xf32>, vector<32x96xf32>, vector<4x96xf32> -> vector<4x96xf32>
    %c0_86 = arith.constant 0 : index
    %c0_87 = arith.constant 0 : index
    %214 = vector.load %arg12[%c0_86, %c0_87] : memref<1x96xf32, #tpu.memory_space<vmem>>, vector<1x96xf32>
    %215 = vector.broadcast %214 : vector<1x96xf32> to vector<4x96xf32>
    %216 = arith.addf %213, %215 : vector<4x96xf32>
    %c0_88 = arith.constant 0 : index
    %c0_89 = arith.constant 0 : index
    %217 = vector.load %arg11[%c0_88, %c0_89] : memref<32x96xf32, #tpu.memory_space<vmem>>, vector<32x96xf32>
    %cst_90 = arith.constant dense<0.000000e+00> : vector<4x96xf32>
    %218 = tpu.matmul %161, %217, %cst_90 {dimension_numbers = #tpu.dot_dimension_numbers<[1], [0], [0], [1], [0, 0, 1, 1], [], []>} : vector<4x32xf32>, vector<32x96xf32>, vector<4x96xf32> -> vector<4x96xf32>
    %c0_91 = arith.constant 0 : index
    %c0_92 = arith.constant 0 : index
    %219 = vector.load %arg13[%c0_91, %c0_92] : memref<1x96xf32, #tpu.memory_space<vmem>>, vector<1x96xf32>
    %220 = vector.broadcast %219 : vector<1x96xf32> to vector<4x96xf32>
    %221 = arith.addf %218, %220 : vector<4x96xf32>
    %222 = vector.extract_strided_slice %216 {offsets = [0, 0], sizes = [4, 32], strides = [1, 1]} : vector<4x96xf32> to vector<4x32xf32>
    %223 = vector.extract_strided_slice %221 {offsets = [0, 0], sizes = [4, 32], strides = [1, 1]} : vector<4x96xf32> to vector<4x32xf32>
    %224 = arith.addf %222, %223 : vector<4x32xf32>
    %225 = arith.negf %224 : vector<4x32xf32>
    %226 = math.exp %225 : vector<4x32xf32>
    %cst_93 = arith.constant 1.000000e+00 : f32
    %227 = vector.broadcast %cst_93 : f32 to vector<4x32xf32>
    %228 = arith.addf %227, %226 : vector<4x32xf32>
    %229 = arith.divf %227, %228 : vector<4x32xf32>
    %230 = vector.extract_strided_slice %216 {offsets = [0, 32], sizes = [4, 32], strides = [1, 1]} : vector<4x96xf32> to vector<4x32xf32>
    %231 = vector.extract_strided_slice %221 {offsets = [0, 32], sizes = [4, 32], strides = [1, 1]} : vector<4x96xf32> to vector<4x32xf32>
    %232 = arith.addf %230, %231 : vector<4x32xf32>
    %233 = arith.negf %232 : vector<4x32xf32>
    %234 = math.exp %233 : vector<4x32xf32>
    %cst_94 = arith.constant 1.000000e+00 : f32
    %235 = vector.broadcast %cst_94 : f32 to vector<4x32xf32>
    %236 = arith.addf %235, %234 : vector<4x32xf32>
    %237 = arith.divf %235, %236 : vector<4x32xf32>
    %238 = vector.extract_strided_slice %216 {offsets = [0, 64], sizes = [4, 32], strides = [1, 1]} : vector<4x96xf32> to vector<4x32xf32>
    %239 = vector.extract_strided_slice %221 {offsets = [0, 64], sizes = [4, 32], strides = [1, 1]} : vector<4x96xf32> to vector<4x32xf32>
    %240 = arith.mulf %229, %239 : vector<4x32xf32>
    %241 = arith.addf %238, %240 : vector<4x32xf32>
    %242 = math.tanh %241 : vector<4x32xf32>
    %cst_95 = arith.constant 1.000000e+00 : f32
    %243 = vector.broadcast %cst_95 : f32 to vector<4x32xf32>
    %244 = arith.subf %243, %237 : vector<4x32xf32>
    %245 = arith.mulf %244, %242 : vector<4x32xf32>
    %246 = arith.mulf %237, %161 : vector<4x32xf32>
    %247 = arith.addf %245, %246 : vector<4x32xf32>
    %248 = vector.extract_strided_slice %0 {offsets = [4, 0], sizes = [1, 32], strides = [1, 1]} : vector<8x32xf32> to vector<1x32xf32>
    %249 = vector.extract_strided_slice %0 {offsets = [5, 0], sizes = [1, 32], strides = [1, 1]} : vector<8x32xf32> to vector<1x32xf32>
    %cst_96 = arith.constant dense<0.000000e+00> : vector<4xf32>
    %250 = vector.multi_reduction <add>, %247, %cst_96 [1] : vector<4x32xf32> to vector<4xf32>
    %251 = vector.shape_cast %250 : vector<4xf32> to vector<4x1xf32>
    %cst_97 = arith.constant 3.200000e+01 : f32
    %252 = vector.broadcast %cst_97 : f32 to vector<4x1xf32>
    %253 = arith.divf %251, %252 : vector<4x1xf32>
    %254 = vector.broadcast %253 : vector<4x1xf32> to vector<4x32xf32>
    %255 = arith.subf %247, %254 : vector<4x32xf32>
    %256 = arith.mulf %255, %255 : vector<4x32xf32>
    %cst_98 = arith.constant dense<0.000000e+00> : vector<4xf32>
    %257 = vector.multi_reduction <add>, %256, %cst_98 [1] : vector<4x32xf32> to vector<4xf32>
    %258 = vector.shape_cast %257 : vector<4xf32> to vector<4x1xf32>
    %cst_99 = arith.constant 3.200000e+01 : f32
    %259 = vector.broadcast %cst_99 : f32 to vector<4x1xf32>
    %260 = arith.divf %258, %259 : vector<4x1xf32>
    %261 = vector.broadcast %253 : vector<4x1xf32> to vector<4x32xf32>
    %262 = arith.subf %247, %261 : vector<4x32xf32>
    %cst_100 = arith.constant 9.99999974E-6 : f32
    %263 = vector.broadcast %cst_100 : f32 to vector<4x1xf32>
    %264 = arith.addf %260, %263 : vector<4x1xf32>
    %265 = math.rsqrt %264 : vector<4x1xf32>
    %266 = vector.broadcast %265 : vector<4x1xf32> to vector<4x32xf32>
    %267 = arith.mulf %262, %266 : vector<4x32xf32>
    %268 = vector.broadcast %248 : vector<1x32xf32> to vector<4x32xf32>
    %269 = arith.mulf %267, %268 : vector<4x32xf32>
    %270 = vector.broadcast %249 : vector<1x32xf32> to vector<4x32xf32>
    %271 = arith.addf %269, %270 : vector<4x32xf32>
    %c0_101 = arith.constant 0 : index
    %c0_102 = arith.constant 0 : index
    %272 = vector.load %arg14[%c0_101, %c0_102] : memref<32x32xf32, #tpu.memory_space<vmem>>, vector<32x32xf32>
    %cst_103 = arith.constant dense<0.000000e+00> : vector<4x32xf32>
    %273 = tpu.matmul %271, %272, %cst_103 {dimension_numbers = #tpu.dot_dimension_numbers<[1], [0], [0], [1], [0, 0, 1, 1], [], []>} : vector<4x32xf32>, vector<32x32xf32>, vector<4x32xf32> -> vector<4x32xf32>
    %c0_104 = arith.constant 0 : index
    %c0_105 = arith.constant 0 : index
    %274 = vector.load %arg15[%c0_104, %c0_105] : memref<1x32xf32, #tpu.memory_space<vmem>>, vector<1x32xf32>
    %275 = vector.broadcast %274 : vector<1x32xf32> to vector<4x32xf32>
    %276 = arith.addf %273, %275 : vector<4x32xf32>
    %cst_106 = arith.constant 0.000000e+00 : f32
    %277 = vector.broadcast %cst_106 : f32 to vector<4x32xf32>
    %278 = arith.maximumf %276, %277 : vector<4x32xf32>
    %c0_107 = arith.constant 0 : index
    %c0_108 = arith.constant 0 : index
    %279 = vector.load %arg16[%c0_107, %c0_108] : memref<32x32xf32, #tpu.memory_space<vmem>>, vector<32x32xf32>
    %cst_109 = arith.constant dense<0.000000e+00> : vector<4x32xf32>
    %280 = tpu.matmul %278, %279, %cst_109 {dimension_numbers = #tpu.dot_dimension_numbers<[1], [0], [0], [1], [0, 0, 1, 1], [], []>} : vector<4x32xf32>, vector<32x32xf32>, vector<4x32xf32> -> vector<4x32xf32>
    %281 = arith.addf %247, %280 : vector<4x32xf32>
    %c0_110 = arith.constant 0 : index
    %c0_111 = arith.constant 0 : index
    %282 = vector.load %arg17[%c0_110, %c0_111] : memref<1x32xf32, #tpu.memory_space<vmem>>, vector<1x32xf32>
    %283 = vector.broadcast %282 : vector<1x32xf32> to vector<4x32xf32>
    %284 = arith.addf %281, %283 : vector<4x32xf32>
    %285 = vector.extract_strided_slice %0 {offsets = [2, 0], sizes = [1, 32], strides = [1, 1]} : vector<8x32xf32> to vector<1x32xf32>
    %286 = vector.extract_strided_slice %0 {offsets = [3, 0], sizes = [1, 32], strides = [1, 1]} : vector<8x32xf32> to vector<1x32xf32>
    %cst_112 = arith.constant dense<0.000000e+00> : vector<4xf32>
    %287 = vector.multi_reduction <add>, %284, %cst_112 [1] : vector<4x32xf32> to vector<4xf32>
    %288 = vector.shape_cast %287 : vector<4xf32> to vector<4x1xf32>
    %cst_113 = arith.constant 3.200000e+01 : f32
    %289 = vector.broadcast %cst_113 : f32 to vector<4x1xf32>
    %290 = arith.divf %288, %289 : vector<4x1xf32>
    %291 = vector.broadcast %290 : vector<4x1xf32> to vector<4x32xf32>
    %292 = arith.subf %284, %291 : vector<4x32xf32>
    %293 = arith.mulf %292, %292 : vector<4x32xf32>
    %cst_114 = arith.constant dense<0.000000e+00> : vector<4xf32>
    %294 = vector.multi_reduction <add>, %293, %cst_114 [1] : vector<4x32xf32> to vector<4xf32>
    %295 = vector.shape_cast %294 : vector<4xf32> to vector<4x1xf32>
    %cst_115 = arith.constant 3.200000e+01 : f32
    %296 = vector.broadcast %cst_115 : f32 to vector<4x1xf32>
    %297 = arith.divf %295, %296 : vector<4x1xf32>
    %298 = vector.broadcast %290 : vector<4x1xf32> to vector<4x32xf32>
    %299 = arith.subf %284, %298 : vector<4x32xf32>
    %cst_116 = arith.constant 9.99999974E-6 : f32
    %300 = vector.broadcast %cst_116 : f32 to vector<4x1xf32>
    %301 = arith.addf %297, %300 : vector<4x1xf32>
    %302 = math.rsqrt %301 : vector<4x1xf32>
    %303 = vector.broadcast %302 : vector<4x1xf32> to vector<4x32xf32>
    %304 = arith.mulf %299, %303 : vector<4x32xf32>
    %305 = vector.broadcast %285 : vector<1x32xf32> to vector<4x32xf32>
    %306 = arith.mulf %304, %305 : vector<4x32xf32>
    %307 = vector.broadcast %286 : vector<1x32xf32> to vector<4x32xf32>
    %308 = arith.addf %306, %307 : vector<4x32xf32>
    %c0_117 = arith.constant 0 : index
    %c0_118 = arith.constant 0 : index
    %309 = vector.load %arg4[%c0_117, %c0_118] : memref<32x32xf32, #tpu.memory_space<vmem>>, vector<32x32xf32>
    %cst_119 = arith.constant dense<0.000000e+00> : vector<4x32xf32>
    %310 = tpu.matmul %308, %309, %cst_119 {dimension_numbers = #tpu.dot_dimension_numbers<[1], [0], [0], [1], [0, 0, 1, 1], [], []>} : vector<4x32xf32>, vector<32x32xf32>, vector<4x32xf32> -> vector<4x32xf32>
    %c0_120 = arith.constant 0 : index
    %c0_121 = arith.constant 0 : index
    %311 = vector.load %arg5[%c0_120, %c0_121] : memref<1x32xf32, #tpu.memory_space<vmem>>, vector<1x32xf32>
    %312 = vector.broadcast %311 : vector<1x32xf32> to vector<4x32xf32>
    %313 = arith.addf %310, %312 : vector<4x32xf32>
    %cst_122 = arith.constant dense<0.000000e+00> : vector<4x128xf32>
    %314 = tpu.matmul %313, %32, %cst_122 {dimension_numbers = #tpu.dot_dimension_numbers<[1], [1], [0], [0], [0, 0, 1, 0], [], []>} : vector<4x32xf32>, vector<128x32xf32>, vector<4x128xf32> -> vector<4x128xf32>
    %cst_123 = arith.constant 0.176776692 : f32
    %315 = vector.broadcast %cst_123 : f32 to vector<4x128xf32>
    %316 = arith.mulf %314, %315 : vector<4x128xf32>
    %cst_124 = arith.constant dense<0xFF800000> : vector<128xf32>
    %317 = vector.multi_reduction <maximumf>, %316, %cst_124 [0] : vector<4x128xf32> to vector<128xf32>
    %318 = vector.shape_cast %317 : vector<128xf32> to vector<1x128xf32>
    %319 = vector.broadcast %318 : vector<1x128xf32> to vector<4x128xf32>
    %320 = arith.subf %316, %319 : vector<4x128xf32>
    %321 = math.exp %320 : vector<4x128xf32>
    %cst_125 = arith.constant dense<0.000000e+00> : vector<128xf32>
    %322 = vector.multi_reduction <add>, %321, %cst_125 [0] : vector<4x128xf32> to vector<128xf32>
    %323 = vector.shape_cast %322 : vector<128xf32> to vector<1x128xf32>
    %324 = tpu.reciprocal %323 {approx = true} : vector<1x128xf32> -> vector<1x128xf32>
    %325 = vector.broadcast %324 : vector<1x128xf32> to vector<4x128xf32>
    %326 = arith.mulf %321, %325 : vector<4x128xf32>
    %cst_126 = arith.constant 9.99999993E-9 : f32
    %327 = vector.broadcast %cst_126 : f32 to vector<4x128xf32>
    %328 = arith.addf %326, %327 : vector<4x128xf32>
    %c0_127 = arith.constant 0 : index
    %c0_128 = arith.constant 0 : index
    %c0_129 = arith.constant 0 : index
    %329 = vector.load %arg18[%c0_127, %c0_128, %c0_129] : memref<1x4x128xf32, #tpu.memory_space<vmem>>, vector<1x4x128xf32>
    %330 = vector.shape_cast %329 : vector<1x4x128xf32> to vector<4x128xf32>
    %331 = vector.shape_cast %328 : vector<4x128xf32> to vector<1x4x128xf32>
    tpu.vector_store %arg18[%c0_127, %c0_128, %c0_129], %331 {strides = array<i32>} : memref<1x4x128xf32, #tpu.memory_space<vmem>>, vector<1x4x128xf32>,
    %cst_130 = arith.constant dense<0.000000e+00> : vector<4xf32>
    %332 = vector.multi_reduction <add>, %328, %cst_130 [1] : vector<4x128xf32> to vector<4xf32>
    %333 = vector.shape_cast %332 : vector<4xf32> to vector<4x1xf32>
    %334 = tpu.reciprocal %333 {approx = true} : vector<4x1xf32> -> vector<4x1xf32>
    %335 = vector.broadcast %334 : vector<4x1xf32> to vector<4x128xf32>
    %336 = arith.mulf %328, %335 : vector<4x128xf32>
    %c0_131 = arith.constant 0 : index
    %c0_132 = arith.constant 0 : index
    %c0_133 = arith.constant 0 : index
    %337 = vector.load %arg19[%c0_131, %c0_132, %c0_133] : memref<1x4x128xf32, #tpu.memory_space<vmem>>, vector<1x4x128xf32>
    %338 = vector.shape_cast %337 : vector<1x4x128xf32> to vector<4x128xf32>
    %339 = vector.shape_cast %336 : vector<4x128xf32> to vector<1x4x128xf32>
    tpu.vector_store %arg19[%c0_131, %c0_132, %c0_133], %339 {strides = array<i32>} : memref<1x4x128xf32, #tpu.memory_space<vmem>>, vector<1x4x128xf32>,
    return
  }
  func.func @transform_0(%arg0: i32) -> (i32, i32, i32) {
    %c0_i32 = arith.constant 0 : i32
    %c0_i32_0 = arith.constant 0 : i32
    %c0_i32_1 = arith.constant 0 : i32
    return %arg0, %c0_i32, %c0_i32_0 : i32, i32, i32
  }
  func.func @transform_1(%arg0: i32) -> (i32, i32) {
    %c0_i32 = arith.constant 0 : i32
    %c0_i32_0 = arith.constant 0 : i32
    %c0_i32_1 = arith.constant 0 : i32
    return %c0_i32, %c0_i32_0 : i32, i32
  }
  func.func @transform_2(%arg0: i32) -> (i32, i32) {
    %c0_i32 = arith.constant 0 : i32
    %c0_i32_0 = arith.constant 0 : i32
    %c0_i32_1 = arith.constant 0 : i32
    return %c0_i32, %c0_i32_0 : i32, i32
  }
  func.func @transform_3(%arg0: i32) -> (i32, i32) {
    %c0_i32 = arith.constant 0 : i32
    %c0_i32_0 = arith.constant 0 : i32
    %c0_i32_1 = arith.constant 0 : i32
    return %c0_i32, %c0_i32_0 : i32, i32
  }
  func.func @transform_4(%arg0: i32) -> (i32, i32) {
    %c0_i32 = arith.constant 0 : i32
    %c0_i32_0 = arith.constant 0 : i32
    %c0_i32_1 = arith.constant 0 : i32
    return %c0_i32, %c0_i32_0 : i32, i32
  }
  func.func @transform_5(%arg0: i32) -> (i32, i32) {
    %c0_i32 = arith.constant 0 : i32
    %c0_i32_0 = arith.constant 0 : i32
    %c0_i32_1 = arith.constant 0 : i32
    return %c0_i32, %c0_i32_0 : i32, i32
  }
  func.func @transform_6(%arg0: i32) -> (i32, i32) {
    %c0_i32 = arith.constant 0 : i32
    %c0_i32_0 = arith.constant 0 : i32
    %c0_i32_1 = arith.constant 0 : i32
    return %c0_i32, %c0_i32_0 : i32, i32
  }
  func.func @transform_7(%arg0: i32) -> (i32, i32) {
    %c0_i32 = arith.constant 0 : i32
    %c0_i32_0 = arith.constant 0 : i32
    %c0_i32_1 = arith.constant 0 : i32
    return %c0_i32, %c0_i32_0 : i32, i32
  }
  func.func @transform_8(%arg0: i32) -> (i32, i32) {
    %c0_i32 = arith.constant 0 : i32
    %c0_i32_0 = arith.constant 0 : i32
    %c0_i32_1 = arith.constant 0 : i32
    return %c0_i32, %c0_i32_0 : i32, i32
  }
  func.func @transform_9(%arg0: i32) -> (i32, i32) {
    %c0_i32 = arith.constant 0 : i32
    %c0_i32_0 = arith.constant 0 : i32
    %c0_i32_1 = arith.constant 0 : i32
    return %c0_i32, %c0_i32_0 : i32, i32
  }
  func.func @transform_10(%arg0: i32) -> (i32, i32) {
    %c0_i32 = arith.constant 0 : i32
    %c0_i32_0 = arith.constant 0 : i32
    %c0_i32_1 = arith.constant 0 : i32
    return %c0_i32, %c0_i32_0 : i32, i32
  }
  func.func @transform_11(%arg0: i32) -> (i32, i32) {
    %c0_i32 = arith.constant 0 : i32
    %c0_i32_0 = arith.constant 0 : i32
    %c0_i32_1 = arith.constant 0 : i32
    return %c0_i32, %c0_i32_0 : i32, i32
  }
  func.func @transform_12(%arg0: i32) -> (i32, i32) {
    %c0_i32 = arith.constant 0 : i32
    %c0_i32_0 = arith.constant 0 : i32
    %c0_i32_1 = arith.constant 0 : i32
    return %c0_i32, %c0_i32_0 : i32, i32
  }
  func.func @transform_13(%arg0: i32) -> (i32, i32) {
    %c0_i32 = arith.constant 0 : i32
    %c0_i32_0 = arith.constant 0 : i32
    %c0_i32_1 = arith.constant 0 : i32
    return %c0_i32, %c0_i32_0 : i32, i32
  }
  func.func @transform_14(%arg0: i32) -> (i32, i32) {
    %c0_i32 = arith.constant 0 : i32
    %c0_i32_0 = arith.constant 0 : i32
    %c0_i32_1 = arith.constant 0 : i32
    return %c0_i32, %c0_i32_0 : i32, i32
  }
  func.func @transform_15(%arg0: i32) -> (i32, i32) {
    %c0_i32 = arith.constant 0 : i32
    %c0_i32_0 = arith.constant 0 : i32
    %c0_i32_1 = arith.constant 0 : i32
    return %c0_i32, %c0_i32_0 : i32, i32
  }
  func.func @transform_16(%arg0: i32) -> (i32, i32) {
    %c0_i32 = arith.constant 0 : i32
    %c0_i32_0 = arith.constant 0 : i32
    %c0_i32_1 = arith.constant 0 : i32
    return %c0_i32, %c0_i32_0 : i32, i32
  }
  func.func @transform_17(%arg0: i32) -> (i32, i32, i32) {
    %c0_i32 = arith.constant 0 : i32
    %c0_i32_0 = arith.constant 0 : i32
    %c0_i32_1 = arith.constant 0 : i32
    return %arg0, %c0_i32, %c0_i32_0 : i32, i32, i32
  }
  func.func @transform_18(%arg0: i32) -> (i32, i32, i32) {
    %c0_i32 = arith.constant 0 : i32
    %c0_i32_0 = arith.constant 0 : i32
    %c0_i32_1 = arith.constant 0 : i32
    return %arg0, %c0_i32, %c0_i32_0 : i32, i32, i32
  }
}

module attributes {stable_mosaic.version = 11 : i64} {
  func.func @agg_pose_kernel(%arg0: i32, %arg1: memref<1x4x128xf32, #tpu.memory_space<vmem>>, %arg2: memref<1x128x128xf32, #tpu.memory_space<vmem>>, %arg3: memref<128x64xf32, #tpu.memory_space<vmem>>, %arg4: memref<1x64xf32, #tpu.memory_space<vmem>>, %arg5: memref<64x32xf32, #tpu.memory_space<vmem>>, %arg6: memref<1x32xf32, #tpu.memory_space<vmem>>, %arg7: memref<32x128xf32, #tpu.memory_space<vmem>>, %arg8: memref<1x128xf32, #tpu.memory_space<vmem>>, %arg9: memref<1x4x128xf32, #tpu.memory_space<vmem>>) attributes {dimension_semantics = [#tpu.dimension_semantics<parallel>], iteration_bounds = array<i64: 2>, scalar_prefetch = 0 : i64, scratch_operands = 0 : i64, tpu.core_type = #tpu.core_type<tc>, window_params = [{transform_indices = @transform_0, window_bounds = array<i64: 1, 4, 128>}, {transform_indices = @transform_1, window_bounds = array<i64: 1, 128, 128>}, {pipeline_mode = #tpu.pipeline_mode<synchronous>, transform_indices = @transform_2, window_bounds = array<i64: 128, 64>}, {pipeline_mode = #tpu.pipeline_mode<synchronous>, transform_indices = @transform_3, window_bounds = array<i64: 1, 64>}, {pipeline_mode = #tpu.pipeline_mode<synchronous>, transform_indices = @transform_4, window_bounds = array<i64: 64, 32>}, {pipeline_mode = #tpu.pipeline_mode<synchronous>, transform_indices = @transform_5, window_bounds = array<i64: 1, 32>}, {pipeline_mode = #tpu.pipeline_mode<synchronous>, transform_indices = @transform_6, window_bounds = array<i64: 32, 128>}, {pipeline_mode = #tpu.pipeline_mode<synchronous>, transform_indices = @transform_7, window_bounds = array<i64: 1, 128>}, {transform_indices = @transform_8, window_bounds = array<i64: 1, 4, 128>}]} {
    %c0 = arith.constant 0 : index
    %c0_0 = arith.constant 0 : index
    %c0_1 = arith.constant 0 : index
    %0 = vector.load %arg1[%c0, %c0_0, %c0_1] : memref<1x4x128xf32, #tpu.memory_space<vmem>>, vector<1x4x128xf32>
    %1 = vector.shape_cast %0 : vector<1x4x128xf32> to vector<4x128xf32>
    %c0_2 = arith.constant 0 : index
    %c0_3 = arith.constant 0 : index
    %c0_4 = arith.constant 0 : index
    %2 = vector.load %arg2[%c0_2, %c0_3, %c0_4] : memref<1x128x128xf32, #tpu.memory_space<vmem>>, vector<1x128x128xf32>
    %3 = vector.shape_cast %2 : vector<1x128x128xf32> to vector<128x128xf32>
    %cst = arith.constant dense<0.000000e+00> : vector<4x128xf32>
    %4 = tpu.matmul %1, %3, %cst {dimension_numbers = #tpu.dot_dimension_numbers<[1], [0], [0], [1], [0, 0, 1, 1], [], []>} : vector<4x128xf32>, vector<128x128xf32>, vector<4x128xf32> -> vector<4x128xf32>
    %c0_5 = arith.constant 0 : index
    %c0_6 = arith.constant 0 : index
    %5 = vector.load %arg3[%c0_5, %c0_6] : memref<128x64xf32, #tpu.memory_space<vmem>>, vector<128x64xf32>
    %cst_7 = arith.constant dense<0.000000e+00> : vector<4x64xf32>
    %6 = tpu.matmul %4, %5, %cst_7 {dimension_numbers = #tpu.dot_dimension_numbers<[1], [0], [0], [1], [0, 0, 1, 1], [], []>} : vector<4x128xf32>, vector<128x64xf32>, vector<4x64xf32> -> vector<4x64xf32>
    %c0_8 = arith.constant 0 : index
    %c0_9 = arith.constant 0 : index
    %7 = vector.load %arg4[%c0_8, %c0_9] : memref<1x64xf32, #tpu.memory_space<vmem>>, vector<1x64xf32>
    %8 = vector.broadcast %7 : vector<1x64xf32> to vector<4x64xf32>
    %9 = arith.addf %6, %8 : vector<4x64xf32>
    %cst_10 = arith.constant 0.000000e+00 : f32
    %10 = vector.broadcast %cst_10 : f32 to vector<4x64xf32>
    %11 = arith.maximumf %9, %10 : vector<4x64xf32>
    %c0_11 = arith.constant 0 : index
    %c0_12 = arith.constant 0 : index
    %12 = vector.load %arg5[%c0_11, %c0_12] : memref<64x32xf32, #tpu.memory_space<vmem>>, vector<64x32xf32>
    %cst_13 = arith.constant dense<0.000000e+00> : vector<4x32xf32>
    %13 = tpu.matmul %11, %12, %cst_13 {dimension_numbers = #tpu.dot_dimension_numbers<[1], [0], [0], [1], [0, 0, 1, 1], [], []>} : vector<4x64xf32>, vector<64x32xf32>, vector<4x32xf32> -> vector<4x32xf32>
    %c0_14 = arith.constant 0 : index
    %c0_15 = arith.constant 0 : index
    %14 = vector.load %arg6[%c0_14, %c0_15] : memref<1x32xf32, #tpu.memory_space<vmem>>, vector<1x32xf32>
    %15 = vector.broadcast %14 : vector<1x32xf32> to vector<4x32xf32>
    %16 = arith.addf %13, %15 : vector<4x32xf32>
    %cst_16 = arith.constant 0.000000e+00 : f32
    %17 = vector.broadcast %cst_16 : f32 to vector<4x32xf32>
    %18 = arith.maximumf %16, %17 : vector<4x32xf32>
    %c0_17 = arith.constant 0 : index
    %c0_18 = arith.constant 0 : index
    %19 = vector.load %arg7[%c0_17, %c0_18] : memref<32x128xf32, #tpu.memory_space<vmem>>, vector<32x128xf32>
    %cst_19 = arith.constant dense<0.000000e+00> : vector<4x128xf32>
    %20 = tpu.matmul %18, %19, %cst_19 {dimension_numbers = #tpu.dot_dimension_numbers<[1], [0], [0], [1], [0, 0, 1, 1], [], []>} : vector<4x32xf32>, vector<32x128xf32>, vector<4x128xf32> -> vector<4x128xf32>
    %c0_20 = arith.constant 0 : index
    %c0_21 = arith.constant 0 : index
    %21 = vector.load %arg8[%c0_20, %c0_21] : memref<1x128xf32, #tpu.memory_space<vmem>>, vector<1x128xf32>
    %22 = vector.broadcast %21 : vector<1x128xf32> to vector<4x128xf32>
    %23 = arith.addf %20, %22 : vector<4x128xf32>
    %c0_22 = arith.constant 0 : index
    %c0_23 = arith.constant 0 : index
    %c0_24 = arith.constant 0 : index
    %24 = vector.load %arg9[%c0_22, %c0_23, %c0_24] : memref<1x4x128xf32, #tpu.memory_space<vmem>>, vector<1x4x128xf32>
    %25 = vector.shape_cast %24 : vector<1x4x128xf32> to vector<4x128xf32>
    %26 = vector.shape_cast %23 : vector<4x128xf32> to vector<1x4x128xf32>
    tpu.vector_store %arg9[%c0_22, %c0_23, %c0_24], %26 {strides = array<i32>} : memref<1x4x128xf32, #tpu.memory_space<vmem>>, vector<1x4x128xf32>,
    return
  }
  func.func @transform_0(%arg0: i32) -> (i32, i32, i32) {
    %c0_i32 = arith.constant 0 : i32
    %c0_i32_0 = arith.constant 0 : i32
    %c0_i32_1 = arith.constant 0 : i32
    return %arg0, %c0_i32, %c0_i32_0 : i32, i32, i32
  }
  func.func @transform_1(%arg0: i32) -> (i32, i32, i32) {
    %c0_i32 = arith.constant 0 : i32
    %c0_i32_0 = arith.constant 0 : i32
    %c0_i32_1 = arith.constant 0 : i32
    return %arg0, %c0_i32, %c0_i32_0 : i32, i32, i32
  }
  func.func @transform_2(%arg0: i32) -> (i32, i32) {
    %c0_i32 = arith.constant 0 : i32
    %c0_i32_0 = arith.constant 0 : i32
    %c0_i32_1 = arith.constant 0 : i32
    return %c0_i32, %c0_i32_0 : i32, i32
  }
  func.func @transform_3(%arg0: i32) -> (i32, i32) {
    %c0_i32 = arith.constant 0 : i32
    %c0_i32_0 = arith.constant 0 : i32
    %c0_i32_1 = arith.constant 0 : i32
    return %c0_i32, %c0_i32_0 : i32, i32
  }
  func.func @transform_4(%arg0: i32) -> (i32, i32) {
    %c0_i32 = arith.constant 0 : i32
    %c0_i32_0 = arith.constant 0 : i32
    %c0_i32_1 = arith.constant 0 : i32
    return %c0_i32, %c0_i32_0 : i32, i32
  }
  func.func @transform_5(%arg0: i32) -> (i32, i32) {
    %c0_i32 = arith.constant 0 : i32
    %c0_i32_0 = arith.constant 0 : i32
    %c0_i32_1 = arith.constant 0 : i32
    return %c0_i32, %c0_i32_0 : i32, i32
  }
  func.func @transform_6(%arg0: i32) -> (i32, i32) {
    %c0_i32 = arith.constant 0 : i32
    %c0_i32_0 = arith.constant 0 : i32
    %c0_i32_1 = arith.constant 0 : i32
    return %c0_i32, %c0_i32_0 : i32, i32
  }
  func.func @transform_7(%arg0: i32) -> (i32, i32) {
    %c0_i32 = arith.constant 0 : i32
    %c0_i32_0 = arith.constant 0 : i32
    %c0_i32_1 = arith.constant 0 : i32
    return %c0_i32, %c0_i32_0 : i32, i32
  }
  func.func @transform_8(%arg0: i32) -> (i32, i32, i32) {
    %c0_i32 = arith.constant 0 : i32
    %c0_i32_0 = arith.constant 0 : i32
    %c0_i32_1 = arith.constant 0 : i32
    return %arg0, %c0_i32, %c0_i32_0 : i32, i32, i32
  }
}

</mosaic_0001>

<bundles_post_ra>
// kernel: _lambda_.5
= control target key start
LH: loop header
LB: loop body
LE: loop exit
PB: predicated region body
PF: predicated region fallthrough
CT: control target
= control target key end

     0   :  { %13 = vsyncpa [#allocation3], 0  ;;  %s1710_s0 = inlined_call_operand.vmem [shape: f32[2,4,128], index: 0, kind: input, shape index: {}]   ;;  %s1711_s1 = inlined_call_operand.vmem [shape: f32[2,128,128], index: 1, kind: input, shape index: {}]   ;;  %s1712_s2 = inlined_call_operand.hbm [shape: f32[128,64], index: 2, kind: input, shape index: {}]   ;;  %s1713_s3 = inlined_call_operand.hbm [shape: f32[1,64], index: 3, kind: input, shape index: {}]   ;;  %s1714_s4 = inlined_call_operand.hbm [shape: f32[64,32], index: 4, kind: input, shape index: {}]   ;;  %s1715_s5 = inlined_call_operand.hbm [shape: f32[1,32], index: 5, kind: input, shape index: {}]   ;;  %s1716_s6 = inlined_call_operand.hbm [shape: f32[32,128], index: 6, kind: input, shape index: {}]   ;;  %s1717_s7 = inlined_call_operand.hbm [shape: f32[1,128], index: 7, kind: input, shape index: {}]   ;;  %s1718_s8 = inlined_call_operand.vmem [shape: f32[2,4,128], index: 8, kind: output, shape index: {}]  }
   0x1   :  { %14 = vsyncpa [#allocation5], 0 }
   0x2   :  { %15 = vsyncpa [#allocation8], 0 }
   0x3   :  { %16 = vsyncpa [#allocation11], 0  ;;  %s1450_s27 = smov 0  }
   0x4 LB: > { %s1394_s28 = smov [#allocation4]   ;;  %s1456_s30 = sadd.s32 4294967295, %s1392_s27   ;;  %s1392_s27 = sphi %s1450_s27, %s22_s27  }
   0x5   : > { %s257_s29 = sshll.u32 %s1394_s28, 4  ;;  %p887_p0 = scmp.ge.s32.totalorder %s1392_s27, 1  ;;  %s1461_s29 = int_to_ptr.vmem [resolvable:$true] %s257_s29 }
   0x6   : > { %p231_p1 = scmp.lt.s32.totalorder %s1392_s27, 3  ;;  %p1719_p2 = scmp.eq.s32.totalorder %s1456_s30, 0 }
   0x7   : > { %s1395_s10 = smov [#allocation7]   ;;  %s1396_s12 = smov [#allocation2]  }
   0x8   : > { %p1463_p3 = pnand %p887_p0, %p231_p1  ;;  %s281_s11 = sshll.u32 %s1395_s10, 4  ;;  %s1469_s11 = int_to_ptr.vmem [resolvable:$true] %s281_s11 }
   0x9   : > { %s243_s13 = sshll.u32 %s1396_s12, 4  ;;  %s1397_s15 = smov [#allocation6]   ;;  %s1477_s13 = int_to_ptr.vmem [resolvable:$true] %s243_s13 }
   0xa   : > { %s1721_s9 = scalar_select %p1463_p3, 1, 0 }
   0xb   : > { %p1152_p4 = pneg %p1463_p3  ;;  %s1479_s16 = sshll.u32 %s1397_s15, 4  ;;  %s268_s16 = int_to_ptr.vmem [resolvable:$true] %s1479_s16 }
   0xc   : > { %s1202_s19 = scalar_lea.hbm %s1713_s3, 16 }
   0xd   : > { %p1473_p5 = pnand %p1719_p2, %p1152_p4  ;;  %p1203_p6 = scmp.ne.s32.totalorder %s1713_s3, %s1202_s19 }
   0xe   : > { %p1209_p10 = scmp.lt.u32.totalorder %s1202_s19, %s1713_s3 }
   0xf   : > { %p1489_p7 = pneg %p1473_p5 }
  0x11   : > { %p1205_p8 = pnand %p1489_p7, %p1203_p6 }
  0x13   : > { %p1206_p9 = pneg %p1205_p8 }
  0x15   : > { %p1211_p11 = pnand %p1209_p10, %p1206_p9 }
  0x17   : > { %1214 = shalt.err (!%p1211_p11)
}
  0x18   : > { %s1215_s25 = scalar_lea.vmem %s1461_s29, 16  ;;  %s1222_s26 = scalar_lea.vmem %s1461_s29, 32 }
  0x19   : > { %p1216_p12 = scmp.ne.s32.totalorder %s1461_s29, %s1215_s25  ;;  %p1223_p1 = scmp.lt.s32.totalorder %s1461_s29, %s1461_s29 }
  0x1a   : > { %p1224_p4 = scmp.lt.s32.totalorder %s1222_s26, %s1215_s25 }
  0x1b   : > { %p1218_p13 = pnand %p1216_p12, %p1489_p7 }
  0x1c   : > { %p1225_p6 = por %p1224_p4, %p1223_p1 }
  0x1d   : > { %p1219_p0 = pneg %p1218_p13 }
  0x1f   : > { %p1226_p8 = pnand %p1225_p6, %p1219_p0 }
  0x21   : > { %1229 = shalt.err (!%p1226_p8)
}
  0x22   : > { %1158 = dma.hbm_to_vmem [thread:$0]  (!%p1473_p5), %s1713_s3, 16, %s1461_s29, [#allocation5]  }
  0x23   : > { %s1230_s17 = scalar_lea.hbm %s1715_s5, 16 }
  0x24   : > { %p1231_p9 = scmp.ne.s32.totalorder %s1715_s5, %s1230_s17  ;;  %p1237_p12 = scmp.lt.u32.totalorder %s1230_s17, %s1715_s5 }
  0x26   : > { %p1233_p10 = pnand %p1231_p9, %p1489_p7 }
  0x28   : > { %p1234_p11 = pneg %p1233_p10 }
  0x2a   : > { %p1239_p13 = pnand %p1237_p12, %p1234_p11 }
  0x2c   : > { %1242 = shalt.err (!%p1239_p13)
}
  0x2d   : > { %s1243_s29 = scalar_lea.vmem %s1469_s11, 16  ;;  %s1250_s23 = scalar_lea.vmem %s1469_s11, 32 }
  0x2e   : > { %p1244_p0 = scmp.ne.s32.totalorder %s1469_s11, %s1243_s29  ;;  %p1251_p6 = scmp.lt.s32.totalorder %s1469_s11, %s1469_s11 }
  0x2f   : > { %p1252_p8 = scmp.lt.s32.totalorder %s1250_s23, %s1243_s29 }
  0x30   : > { %p1246_p1 = pnand %p1244_p0, %p1489_p7 }
  0x31   : > { %p1253_p9 = por %p1252_p8, %p1251_p6 }
  0x32   : > { %p1247_p4 = pneg %p1246_p1 }
  0x34   : > { %p1254_p10 = pnand %p1253_p9, %p1247_p4 }
  0x36   : > { %1257 = shalt.err (!%p1254_p10)
}
  0x37   : > { %1164 = dma.hbm_to_vmem [thread:$0]  (!%p1473_p5), %s1715_s5, 16, %s1469_s11, [#allocation8]  }
  0x38   : > { %s1258_s10 = scalar_lea.hbm %s1712_s2, 2048 }
  0x39   : > { %p1259_p11 = scmp.ne.s32.totalorder %s1712_s2, %s1258_s10  ;;  %p1265_p0 = scmp.lt.u32.totalorder %s1258_s10, %s1712_s2 }
  0x3b   : > { %p1261_p12 = pnand %p1259_p11, %p1489_p7 }
  0x3d   : > { %p1262_p13 = pneg %p1261_p12 }
  0x3f   : > { %p1267_p1 = pnand %p1265_p0, %p1262_p13 }
  0x41   : > { %1270 = shalt.err (!%p1267_p1)
}
  0x42   : > { %s1271_s11 = scalar_lea.vmem %s1477_s13, 2048  ;;  %p1279_p9 = scmp.lt.s32.totalorder %s1477_s13, %s1477_s13 }
  0x43   : > { %p1272_p4 = scmp.ne.s32.totalorder %s1477_s13, %s1271_s11  ;;  %p1280_p10 = scmp.lt.s32.totalorder %s1271_s11, %s1271_s11 }
  0x45   : > { %p1274_p6 = pnand %p1272_p4, %p1489_p7  ;;  %p1281_p11 = por %p1280_p10, %p1279_p9 }
  0x47   : > { %p1275_p8 = pneg %p1274_p6 }
  0x49   : > { %p1282_p12 = pnand %p1281_p11, %p1275_p8 }
  0x4b   : > { %1285 = shalt.err (!%p1282_p12)
}
  0x4c   : > { %s1398_s19 = smov 128   ;;  %s1399_s20 = smov 8  }
  0x4d   : > { %1155 = dma.hbm_to_vmem [thread:$0]  (!%p1473_p5), %s1712_s2, 2048, %s1477_s13, [#allocation3], %s1398_s19, %s1398_s19, %s1399_s20  }
  0x4e   : > { %s1286_s25 = scalar_lea.hbm %s1714_s4, 1024 }
  0x4f   : > { %p1287_p13 = scmp.ne.s32.totalorder %s1714_s4, %s1286_s25  ;;  %p1293_p4 = scmp.lt.u32.totalorder %s1286_s25, %s1714_s4 }
  0x51   : > { %p1289_p0 = pnand %p1287_p13, %p1489_p7 }
  0x53   : > { %p1290_p1 = pneg %p1289_p0 }
  0x55   : > { %p1295_p6 = pnand %p1293_p4, %p1290_p1 }
  0x57   : > { %1298 = shalt.err (!%p1295_p6)
}
  0x58   : > { %s1299_s15 = scalar_lea.vmem %s268_s16, 1024  ;;  %p1307_p11 = scmp.lt.s32.totalorder %s268_s16, %s268_s16 }
  0x59   : > { %p1300_p8 = scmp.ne.s32.totalorder %s268_s16, %s1299_s15  ;;  %p1308_p12 = scmp.lt.s32.totalorder %s1299_s15, %s1299_s15 }
  0x5b   : > { %p1302_p9 = pnand %p1300_p8, %p1489_p7  ;;  %p1309_p2 = por %p1308_p12, %p1307_p11 }
  0x5d   : > { %p1303_p10 = pneg %p1302_p9 }
  0x5f   : > { %p1310_p3 = pnand %p1309_p2, %p1303_p10 }
  0x61   : > { %1313 = shalt.err (!%p1310_p3)
}
  0x62   : > { %1161 = dma.hbm_to_vmem [thread:$0]  (!%p1473_p5), %s1714_s4, 1024, %s268_s16, [#allocation5], %s1398_s19, %s1398_s19, %s1399_s20  }
  0x63   : > { %s1400_s18 = smov [#allocation9]   ;;  %s1401_s21 = smov [#allocation10]  }
  0x64   : > { %s291_s11 = sshll.u32 %s1400_s18, 4  ;;  %s305_s29 = sshll.u32 %s1401_s21, 4  ;;  %s292_s11 = int_to_ptr.vmem [resolvable:$true] %s291_s11  ;;  %s306_s29 = int_to_ptr.vmem [resolvable:$true] %s305_s29 }
  0x65   : > { %s1314_s25 = scalar_lea.hbm %s1716_s6, 512 }
  0x66   : > { %p1315_p2 = scmp.ne.s32.totalorder %s1716_s6, %s1314_s25  ;;  %p1321_p0 = scmp.lt.u32.totalorder %s1314_s25, %s1716_s6 }
  0x68   : > { %p1317_p3 = pnand %p1315_p2, %p1489_p7 }
  0x6a   : > { %p1318_p13 = pneg %p1317_p3 }
  0x6c   : > { %p1323_p1 = pnand %p1321_p0, %p1318_p13 }
  0x6e   : > { %1326 = shalt.err (!%p1323_p1)
}
  0x6f   : > { %s1327_s16 = scalar_lea.vmem %s292_s11, 512  ;;  %p1335_p9 = scmp.lt.s32.totalorder %s292_s11, %s292_s11 }
  0x70   : > { %p1328_p4 = scmp.ne.s32.totalorder %s292_s11, %s1327_s16  ;;  %p1336_p10 = scmp.lt.s32.totalorder %s1327_s16, %s1327_s16 }
  0x72   : > { %p1330_p6 = pnand %p1328_p4, %p1489_p7  ;;  %p1337_p11 = por %p1336_p10, %p1335_p9 }
  0x74   : > { %p1331_p8 = pneg %p1330_p6 }
  0x76   : > { %p1338_p12 = pnand %p1337_p11, %p1331_p8 }
  0x78   : > { %1341 = shalt.err (!%p1338_p12)
}
  0x79   : > { %1167 = dma.hbm_to_vmem [thread:$0]  (!%p1473_p5), %s1716_s6, 512, %s292_s11, [#allocation8], %s1398_s19, %s1398_s19, %s1399_s20  }
  0x7a   : > { %s1342_s21 = scalar_lea.hbm %s1717_s7, 16 }
  0x7b   : > { %p1343_p2 = scmp.ne.s32.totalorder %s1717_s7, %s1342_s21  ;;  %p1349_p0 = scmp.lt.u32.totalorder %s1342_s21, %s1717_s7 }
  0x7d   : > { %p1345_p3 = pnand %p1343_p2, %p1489_p7 }
  0x7f   : > { %p1346_p13 = pneg %p1345_p3 }
  0x81   : > { %p1351_p1 = pnand %p1349_p0, %p1346_p13 }
  0x83   : > { %1354 = shalt.err (!%p1351_p1)
}
  0x84   : > { %s1355_s28 = scalar_lea.vmem %s306_s29, 16  ;;  %s1362_s19 = scalar_lea.vmem %s306_s29, 32 }
  0x85   : > { %p1356_p4 = scmp.ne.s32.totalorder %s306_s29, %s1355_s28  ;;  %p1363_p9 = scmp.lt.s32.totalorder %s306_s29, %s306_s29 }
  0x86   : > { %p1364_p10 = scmp.lt.s32.totalorder %s1362_s19, %s1355_s28 }
  0x87   : > { %p1358_p6 = pnand %p1356_p4, %p1489_p7 }
  0x88   : > { %p1365_p11 = por %p1364_p10, %p1363_p9 }
  0x89   : > { %p1359_p8 = pneg %p1358_p6 }
  0x8b   : > { %p1366_p12 = pnand %p1365_p11, %p1359_p8 }
  0x8d   : > { %1369 = shalt.err (!%p1366_p12)
}
  0x8e   : > { %1170 = dma.hbm_to_vmem [thread:$0]  (!%p1473_p5), %s1717_s7, 16, %s306_s29, [#allocation11]  }
  0x8f   : > { %p1724_p2 = scmp.ne.s32.totalorder %s1721_s9, 0 }
  0x90   : > { %p1725_p3 = scmp.eq.s32.totalorder (!%p1724_p2), %s1456_s30, 0 }
  0x91   : > { %333 = sbr.rel (%p1724_p2) target bundleno = 1061 (0x425), region = 52 }
  0x98   : > { %1375 = dma.done.wait (%p1725_p3), [#allocation3], 2048   ;;  %p1726_p7 = pmov %p1725_p3 }
  0x99   : > { %p1727_p13 = pmov %p1725_p3 }
  0x9a   : > { %1377 = vsyncadd (%p1726_p7), [#allocation3], 4294965248 }
  0x9b   : > { %1379 = dma.done.wait (%p1727_p13), [#allocation5], 1040   ;;  %p1728_p0 = pmov %p1725_p3 }
  0x9d   : > { %1381 = vsyncadd (%p1728_p0), [#allocation5], 4294966256  ;;  %p1729_p1 = pmov %p1728_p0 }
  0x9e   : > { %p1730_p5 = pmov %p1728_p0 }
  0x9f   : > { %1383 = dma.done.wait (%p1729_p1), [#allocation8], 528  }
  0xa0   : > { %1385 = vsyncadd (%p1730_p5), [#allocation8], 4294966768  ;;  %p1731_p4 = pmov %p1728_p0 }
  0xa1   : > { %p1732_p6 = pmov %p1728_p0 }
  0xa2   : > { %1387 = dma.done.wait (%p1731_p4), [#allocation11], 16  }
  0xa3   : > { %1389 = vsyncadd (%p1732_p6), [#allocation11], 4294967280  ;;  %p390_p8 = scmp.lt.s32.totalorder %s1456_s30, 1  ;;  %v1402_v0 = vmov 0.0|0.0   ;;  %vm1403_vm0 = vmmov 0   ;;  %v1404_v1 = vmov 0.0  }
  0xa4   : > { %1062 = vmatprep.subr.bf16.mxu0 %v1402_v0  ;;  %994 = vmatprep.mubr.msk.f32.mxu0 %vm1403_vm0, %v1404_v1  ;;  %v490_v10 = vld [vmem:[#allocation2] sm:$0xff]  ;;  %v491_v11 = vld [vmem:[#allocation2 + $0x8] sm:$0xff]  ;;  %v492_v12 = vld [vmem:[#allocation2 + $0x10] sm:$0xff]  ;;  %vm599_vm1 = vcmask 523264   ;;  %vm685_vm2 = vcmask 261120  }
  0xa5   : > { %s1734_s30 = smov (!%p390_p8, %s1456_s30), 1  ;;  %1086 = vmatprep.subr.bf16.mxu1 %v1402_v0  ;;  %1029 = vmatprep.mubr.msk.f32.mxu1 %vm1403_vm0, %v1404_v1  ;;  %v493_v13 = vld [vmem:[#allocation2 + $0x18] sm:$0xff]  ;;  %v1087_v15 = vpack.c.bf16 %v491_v11, %v490_v10  ;;  %v494_v19 = vld [vmem:[#allocation2 + $0x20] sm:$0xff]  ;;  %v495_v20 = vld [vmem:[#allocation2 + $0x28] sm:$0xff] }
  0xa6   : > { %s913_s9 = sshll.u32 %s1734_s30, 7  ;;  %v1090_v18 = vpack.c.bf16 %v493_v13, %v492_v12  ;;  %v1093_v24 = vpack.c.bf16 %v495_v20, %v494_v19  ;;  %v496_v25 = vld [vmem:[#allocation2 + $0x30] sm:$0xff]  ;;  %v497_v26 = vld [vmem:[#allocation2 + $0x38] sm:$0xff]  ;;  %v498_v31 = vld [vmem:[#allocation2 + $0x40] sm:$0xff]  ;;  %s902_s10 = sshll.u32 %s1734_s30, 2 }
  0xa7   : > { %s1654_s29 = scalar_lea.vmem %s1711_s1, %s913_s9  ;;  %1088 = vmatpush3.bf16.msra.mxu1 %v1087_v15  ;;  %v1096_v30 = vpack.c.bf16 %v497_v26, %v496_v25  ;;  %v499_v32 = vld [vmem:[#allocation2 + $0x48] sm:$0xff]  ;;  %v500_v37 = vld [vmem:[#allocation2 + $0x50] sm:$0xff]  ;;  %v501_v38 = vld [vmem:[#allocation2 + $0x58] sm:$0xff]  ;;  %s393_s15 = scalar_lea.vmem %s1710_s0, %s902_s10 }
  0xa8   : > { %v404_v2 = vld [vmem:[%s1654_s29] sm:$0xff]  ;;  %v405_v3 = vld [vmem:[%s1654_s29 + $0x8] sm:$0xff]  ;;  %v406_v4 = vld [vmem:[%s1654_s29 + $0x10] sm:$0xff]  ;;  %1089 = vmatprep.subr.bf16.mxu1 %v1402_v0  ;;  %v1099_v36 = vpack.c.bf16 %v499_v32, %v498_v31  ;;  %v1102_v42 = vpack.c.bf16 %v501_v38, %v500_v37  ;;  %s402_s18 = scalar_lea.vmem %s1718_s8, %s902_s10 }
  0xa9   : > { %v1063_v5 = vpack.c.bf16 %v405_v3, %v404_v2  ;;  %v407_v6 = vld [vmem:[%s1654_s29 + $0x18] sm:$0xff]  ;;  %v408_v8 = vld [vmem:[%s1654_s29 + $0x20] sm:$0xff]  ;;  %v409_v9 = vld [vmem:[%s1654_s29 + $0x28] sm:$0xff] }
  0xaa   : > { %v1066_v7 = vpack.c.bf16 %v407_v6, %v406_v4  ;;  %v1069_v14 = vpack.c.bf16 %v409_v9, %v408_v8  ;;  %v410_v16 = vld [vmem:[%s1654_s29 + $0x30] sm:$0xff]  ;;  %v411_v17 = vld [vmem:[%s1654_s29 + $0x38] sm:$0xff]  ;;  %v412_v22 = vld [vmem:[%s1654_s29 + $0x40] sm:$0xff] }
  0xab   : > { %1064 = vmatpush3.bf16.msra.mxu0 %v1063_v5  ;;  %v1072_v21 = vpack.c.bf16 %v411_v17, %v410_v16  ;;  %v413_v23 = vld [vmem:[%s1654_s29 + $0x48] sm:$0xff]  ;;  %1091 = vmatpush3.bf16.msra.mxu1 %v1090_v18  ;;  %v414_v28 = vld [vmem:[%s1654_s29 + $0x50] sm:$0xff]  ;;  %v415_v29 = vld [vmem:[%s1654_s29 + $0x58] sm:$0xff] }
  0xac   : > { %1065 = vmatprep.subr.bf16.mxu0 %v1402_v0  ;;  %1092 = vmatprep.subr.bf16.mxu1 %v1402_v0  ;;  %v1075_v27 = vpack.c.bf16 %v413_v23, %v412_v22  ;;  %v1078_v33 = vpack.c.bf16 %v415_v29, %v414_v28  ;;  %v416_v34 = vld [vmem:[%s1654_s29 + $0x60] sm:$0xff]  ;;  %v417_v35 = vld [vmem:[%s1654_s29 + $0x68] sm:$0xff]  ;;  %v418_v40 = vld [vmem:[%s1654_s29 + $0x70] sm:$0xff] }
  0xad   : > { %v1081_v39 = vpack.c.bf16 %v417_v35, %v416_v34  ;;  %v419_v41 = vld [vmem:[%s1654_s29 + $0x78] sm:$0xff]  ;;  %v502_v43 = vld [vmem:[#allocation2 + $0x60] sm:$0xff]  ;;  %v503_v44 = vld [vmem:[#allocation2 + $0x68] sm:$0xff] }
  0xae   : > { %v1084_v45 = vpack.c.bf16 %v419_v41, %v418_v40  ;;  %v1105_v46 = vpack.c.bf16 %v503_v44, %v502_v43  ;;  %v504_v47 = vld [vmem:[#allocation2 + $0x70] sm:$0xff]  ;;  %v505_v48 = vld [vmem:[#allocation2 + $0x78] sm:$0xff]  ;;  %v403_v49 = vld [vmem:[%s393_s15] sm:$0xf] }
  0xaf   : > { %1067 = vmatpush3.bf16.msra.mxu0 %v1066_v7  ;;  %1094 = vmatpush3.bf16.msra.mxu1 %v1093_v24  ;;  %v1108_v50 = vpack.c.bf16 %v505_v48, %v504_v47  ;;  %v584_v51 = vld [vmem:[#allocation6] sm:$0xff]  ;;  %v585_v52 = vld [vmem:[#allocation6 + $0x8] sm:$0xff]  ;;  %v586_v53 = vld [vmem:[#allocation6 + $0x10] sm:$0xff] }
  0xb0   : > { %1068 = vmatprep.subr.bf16.mxu0 %v1402_v0  ;;  %1095 = vmatprep.subr.bf16.mxu1 %v1402_v0  ;;  %v1111_v54 = vpack.c.bf16 %v585_v52, %v584_v51  ;;  %v587_v55 = vld [vmem:[#allocation6 + $0x18] sm:$0xff]  ;;  %v588_v57 = vld [vmem:[#allocation6 + $0x20] sm:$0xff]  ;;  %v589_v58 = vld [vmem:[#allocation6 + $0x28] sm:$0xff] }
  0xb1   : > { %v1114_v56 = vpack.c.bf16 %v587_v55, %v586_v53  ;;  %v1117_v59 = vpack.c.bf16 %v589_v58, %v588_v57  ;;  %v590_v62 = vld [vmem:[#allocation6 + $0x30] sm:$0xff]  ;;  %v591_v63 = vld [vmem:[#allocation6 + $0x38] sm:$0xff]  ;;  %v674_v3 = vld [vmem:[#allocation9] sm:$0xff] }
  0xb2   : > { %v1120_v2 = vpack.c.bf16 %v591_v63, %v590_v62  ;;  %v675_v4 = vld [vmem:[#allocation9 + $0x8] sm:$0xff]  ;;  %v906_v6 = vld [vmem:[#allocation4] ss:$0 sm:$0xff]  ;;  %v676_v11 = vld [vmem:[#allocation9 + $0x10] sm:$0xff] }
  0xb3   : > { %1070 = vmatpush3.bf16.msra.mxu0 %v1069_v14  ;;  %1097 = vmatpush3.bf16.msra.mxu1 %v1096_v30  ;;  %v1123_v5 = vpack.c.bf16 %v675_v4, %v674_v3  ;;  %v907_v13 = vld [vmem:[#allocation7] ss:$0 sm:$0xff] }
  0xb4   : > { %1071 = vmatprep.subr.bf16.mxu0 %v1402_v0  ;;  %1098 = vmatprep.subr.bf16.mxu1 %v1402_v0 }
  0xb7   : > { %1073 = vmatpush3.bf16.msra.mxu0 %v1072_v21  ;;  %1100 = vmatpush3.bf16.msra.mxu1 %v1099_v36 }
  0xb8   : > { %1074 = vmatprep.subr.bf16.mxu0 %v1402_v0  ;;  %1101 = vmatprep.subr.bf16.mxu1 %v1402_v0 }
  0xbb   : > { %1076 = vmatpush3.bf16.msra.mxu0 %v1075_v27  ;;  %1103 = vmatpush3.bf16.msra.mxu1 %v1102_v42 }
  0xbc   : > { %1077 = vmatprep.subr.bf16.mxu0 %v1402_v0  ;;  %1104 = vmatprep.subr.bf16.mxu1 %v1402_v0 }
  0xbf   : > { %1079 = vmatpush3.bf16.msra.mxu0 %v1078_v33  ;;  %1106 = vmatpush3.bf16.msra.mxu1 %v1105_v46 }
  0xc0   : > { %1080 = vmatprep.subr.bf16.mxu0 %v1402_v0  ;;  %1107 = vmatprep.subr.bf16.mxu1 %v1402_v0 }
  0xc3   : > { %1082 = vmatpush3.bf16.msra.mxu0 %v1081_v39  ;;  %1109 = vmatpush3.bf16.msra.mxu1 %v1108_v50 }
  0xc4   : > { %1083 = vmatprep.subr.bf16.mxu0 %v1402_v0  ;;  %1122 = vmatprep.subr.bf16.mxu1 %v1402_v0 }
  0xc7   : > { %1085 = vmatpush3.bf16.msra.mxu0 %v1084_v45 }
  0xc8   : > { %1110 = vmatprep.subr.bf16.mxu0 %v1402_v0 }
  0xca   : > { %995 = vmatmul.mubr.f32.vlgmr.msra.gmra.mrb[0].mxu0 %v403_v49 }
  0xcb   : > { %1048 = vmatprep.mubr.msk.f32.mxu0 %vm1403_vm0, %v1404_v1  ;;  %1112 = vmatpush3.bf16.msra.mxu0 %v1111_v54 }
  0xcc   : > { %1113 = vmatprep.subr.bf16.mxu0 %v1402_v0 }
  0xcf   : > { %1115 = vmatpush3.bf16.msra.mxu0 %v1114_v56 }
  0xd0   : > { %1116 = vmatprep.subr.bf16.mxu0 %v1402_v0 }
  0xd3   : > { %1118 = vmatpush3.bf16.msra.mxu0 %v1117_v59 }
  0xd4   : > { %1119 = vmatprep.subr.bf16.mxu0 %v1402_v0 }
  0xd7   : > { %1121 = vmatpush3.bf16.msra.mxu0 %v1120_v2 }
 0x19d   : > { %v486_v60 = vpop.f32.mrb[0].mxu0 }
 0x19e   : > { %v996_v61 = vpop.f32.mrb[1].mxu0  ;;  %1030 = vmatmul.mubr.f32.vlgmr.msra.gmra.mrb[0].mxu1 %v486_v60 }
 0x19f   : > { %1059 = vmatprep.mubr.msk.f32.mxu1 %vm1403_vm0, %v1404_v1  ;;  %1124 = vmatpush3.bf16.msra.mxu1 %v1123_v5  ;;  %v677_v1 = vld [vmem:[#allocation9 + $0x18] sm:$0xff] }
 0x1a0   : > { %1125 = vmatprep.subr.bf16.mxu1 %v1402_v0  ;;  %v1126_v12 = vpack.c.bf16 %v677_v1, %v676_v11  ;;  %v909_v0 = vld [vmem:[#allocation10] ss:$0 sm:$0xff] }
 0x1a3   : > { %1127 = vmatpush3.bf16.msra.mxu1 %v1126_v12 }
 0x271   : > { %v579_v7 = vpop.f32.mrb[0].mxu1 }
 0x272   : > { %v580_v8 = vadd.f32 %v906_v6, %v579_v7  ;;  %v1031_v9 = vpop.f32.mrb[1].mxu1 }
 0x274   : > { %v583_v10 = vmax.f32 %v580_v8, 0.0 }
 0x276   : > { %1049 = vmatmul.mubr.msk.f32.vlgmr.msra.gmra.mrb[2].mxu0 %vm599_vm1, %v583_v10 }
 0x349   : > { %v669_v14 = vpop.f32.mrb[2].mxu0 }
 0x34a   : > { %v670_v15 = vadd.f32 %v907_v13, %v669_v14  ;;  %v1050_v16 = vpop.f32.mrb[3].mxu0 }
 0x34c   : > { %v673_v17 = vmax.f32 %v670_v15, 0.0 }
 0x34e   : > { %1060 = vmatmul.mubr.msk.f32.vlgmr.msra.gmra.mrb[2].mxu1 %vm685_vm2, %v673_v17 }
 0x421   : > { %v755_v18 = vpop.f32.mrb[2].mxu1 }
 0x422   : > { %v756_v19 = vadd.f32 %v909_v0, %v755_v18  ;;  %v1061_v20 = vpop.f32.mrb[3].mxu1 }
 0x424   : > { %759 = vst [vmem:[%s402_s18] sm:$0xf] %v756_v19 }
 0x425 PF: > { %s22_s27 = sadd.s32 1, %s1392_s27  }
 0x426   : > { %p19_p9 = scmp.ge.s32.totalorder %s22_s27, 4  }
 0x428   :  { %21 = sbr.rel (!%p19_p9) target bundleno = 4 (0x4), region = 110 }
 0x42f   :  { %779 = vsyncpa [#allocation3], 1 }
 0x430   :  { %781 = vsyncpa [#allocation3 + $0x1], 1 }
 0x431   :  { %782 = vsyncpa [#allocation5], 1 }
 0x432   :  { %783 = vsyncpa [#allocation8], 1 }
 0x433   :  { %784 = vsyncpa [#allocation11], 1 }

// kernel: _lambda_.3
= control target key start
LH: loop header
LB: loop body
LE: loop exit
PB: predicated region body
PF: predicated region fallthrough
CT: control target
= control target key end

     0   :  { %s4217_s0 = inlined_call_operand.vmem [shape: f32[256,8], index: 0, kind: input, shape index: {}]   ;;  %s4218_s1 = inlined_call_operand.hbm [shape: f32[8,32], index: 1, kind: input, shape index: {}]   ;;  %s4219_s2 = inlined_call_operand.hbm [shape: f32[1,32], index: 2, kind: input, shape index: {}]   ;;  %s4220_s3 = inlined_call_operand.hbm [shape: f32[32,32], index: 3, kind: input, shape index: {}]   ;;  %s4221_s4 = inlined_call_operand.hbm [shape: f32[1,128], index: 4, kind: input, shape index: {}]   ;;  %s4222_s5 = inlined_call_operand.hbm [shape: f32[128,64], index: 5, kind: input, shape index: {}]   ;;  %s4223_s6 = inlined_call_operand.hbm [shape: f32[1,64], index: 6, kind: input, shape index: {}]   ;;  %s4224_s7 = inlined_call_operand.hbm [shape: f32[64,32], index: 7, kind: input, shape index: {}]   ;;  %s4225_s8 = inlined_call_operand.hbm [shape: f32[1,32], index: 8, kind: input, shape index: {}]   ;;  %s4226_s9 = inlined_call_operand.hbm [shape: f32[32,128], index: 9, kind: input, shape index: {}]   ;;  %s4227_s10 = inlined_call_operand.hbm [shape: f32[1,128], index: 10, kind: input, shape index: {}]   ;;  %s4228_s11 = inlined_call_operand.hbm [shape: f32[32,128], index: 11, kind: input, shape index: {}]   ;;  %s4229_s12 = inlined_call_operand.hbm [shape: f32[1,128], index: 12, kind: input, shape index: {}]   ;;  %s4230_s13 = inlined_call_operand.vmem [shape: f32[256,128], index: 13, kind: output, shape index: {0}]   ;;  %s4231_s14 = inlined_call_operand.vmem [shape: f32[256,128], index: 14, kind: output, shape index: {1}]  }
   0x1   :  { %4236 = sst [smem:[#allocation28_spill]] %s4218_s1 }
   0x2   :  { %4237 = sst [smem:[#allocation29_spill]] %s4230_s13 }
   0x3   :  { %4238 = sst [smem:[#allocation30_spill]] %s4231_s14 }
   0x4   :  { %20 = vsyncpa [#allocation3], 0 }
   0x5   :  { %21 = vsyncpa [#allocation5], 0 }
   0x6   :  { %22 = vsyncpa [#allocation8], 0 }
   0x7   :  { %23 = vsyncpa [#allocation11], 0 }
   0x8   :  { %24 = vsyncpa [#allocation14], 0 }
   0x9   :  { %25 = vsyncpa [#allocation17], 0 }
   0xa   :  { %26 = vsyncpa [#allocation20], 0  ;;  %s3457_s29 = smov 0  }
   0xb LB: > { %s3365_s30 = smov [#allocation4]   ;;  %s4232_s16 = sadd.s32 4294967295, %s3363_s29   ;;  %s3363_s29 = sphi %s3457_s29, %s32_s29  }
   0xc   : > { %s391_s15 = sshll.u32 %s3365_s30, 4  ;;  %p2331_p0 = scmp.ge.s32.totalorder %s3363_s29, 1  ;;  %s3471_s15 = int_to_ptr.vmem [resolvable:$true] %s391_s15 }
   0xd   : > { %p367_p1 = scmp.lt.s32.totalorder %s3363_s29, 5  ;;  %p3467_p2 = scmp.eq.s32.totalorder %s4232_s16, 0 }
   0xe   : > { %s3366_s19 = smov [#allocation7]   ;;  %s3367_s21 = smov [#allocation10]  }
   0xf   : > { %s4239_s17 = scalar_select %p3467_p2, 1, 0 }
  0x10   : > { %p3473_p3 = pnand %p2331_p0, %p367_p1  ;;  %s415_s20 = sshll.u32 %s3366_s19, 4  ;;  %s3479_s20 = int_to_ptr.vmem [resolvable:$true] %s415_s20 }
  0x11   : > { %s439_s22 = sshll.u32 %s3367_s21, 4  ;;  %s3368_s24 = smov [#allocation13]   ;;  %s3487_s22 = int_to_ptr.vmem [resolvable:$true] %s439_s22 }
  0x12   : > { %s4240_s18 = scalar_select %p3473_p3, 1, 0 }
  0x13   : > { %p2907_p4 = pneg %p3473_p3  ;;  %s463_s25 = sshll.u32 %s3368_s24, 4  ;;  %s3489_s25 = int_to_ptr.vmem [resolvable:$true] %s463_s25 }
  0x14   : > { %s2993_s28 = scalar_lea.hbm %s4219_s2, 16 }
  0x15   : > { %p3483_p5 = pnand %p3467_p2, %p2907_p4  ;;  %p2994_p6 = scmp.ne.s32.totalorder %s4219_s2, %s2993_s28 }
  0x16   : > { %p3000_p10 = scmp.lt.u32.totalorder %s2993_s28, %s4219_s2 }
  0x17   : > { %p3499_p7 = pneg %p3483_p5 }
  0x19   : > { %p2996_p8 = pnand %p3499_p7, %p2994_p6 }
  0x1b   : > { %p2997_p9 = pneg %p2996_p8 }
  0x1d   : > { %p3002_p11 = pnand %p3000_p10, %p2997_p9 }
  0x1f   : > { %3005 = shalt.err (!%p3002_p11)
}
  0x20   : > { %s3006_s26 = scalar_lea.vmem %s3471_s15, 16  ;;  %s3013_s27 = scalar_lea.vmem %s3471_s15, 32 }
  0x21   : > { %p3007_p12 = scmp.ne.s32.totalorder %s3471_s15, %s3006_s26  ;;  %p3014_p1 = scmp.lt.s32.totalorder %s3471_s15, %s3471_s15 }
  0x22   : > { %p3015_p4 = scmp.lt.s32.totalorder %s3013_s27, %s3006_s26 }
  0x23   : > { %p3009_p13 = pnand %p3007_p12, %p3499_p7 }
  0x24   : > { %p3016_p6 = por %p3015_p4, %p3014_p1 }
  0x25   : > { %p3010_p0 = pneg %p3009_p13 }
  0x27   : > { %p3017_p8 = pnand %p3016_p6, %p3010_p0 }
  0x29   : > { %3020 = shalt.err (!%p3017_p8)
}
  0x2a   : > { %2913 = dma.hbm_to_vmem [thread:$0]  (!%p3483_p5), %s4219_s2, 16, %s3471_s15, [#allocation5]  }
  0x2b   : > { %s3021_s24 = scalar_lea.hbm %s4221_s4, 16 }
  0x2c   : > { %p3022_p9 = scmp.ne.s32.totalorder %s4221_s4, %s3021_s24  ;;  %p3028_p12 = scmp.lt.u32.totalorder %s3021_s24, %s4221_s4 }
  0x2e   : > { %p3024_p10 = pnand %p3022_p9, %p3499_p7 }
  0x30   : > { %p3025_p11 = pneg %p3024_p10 }
  0x32   : > { %p3030_p13 = pnand %p3028_p12, %p3025_p11 }
  0x34   : > { %3033 = shalt.err (!%p3030_p13)
}
  0x35   : > { %s3034_s15 = scalar_lea.vmem %s3479_s20, 16  ;;  %s3041_s13 = scalar_lea.vmem %s3479_s20, 32 }
  0x36   : > { %p3035_p0 = scmp.ne.s32.totalorder %s3479_s20, %s3034_s15  ;;  %p3042_p6 = scmp.lt.s32.totalorder %s3479_s20, %s3479_s20 }
  0x37   : > { %p3043_p8 = scmp.lt.s32.totalorder %s3041_s13, %s3034_s15 }
  0x38   : > { %p3037_p1 = pnand %p3035_p0, %p3499_p7 }
  0x39   : > { %p3044_p9 = por %p3043_p8, %p3042_p6 }
  0x3a   : > { %p3038_p4 = pneg %p3037_p1 }
  0x3c   : > { %p3045_p10 = pnand %p3044_p9, %p3038_p4 }
  0x3e   : > { %3048 = shalt.err (!%p3045_p10)
}
  0x3f   : > { %2919 = dma.hbm_to_vmem [thread:$0]  (!%p3483_p5), %s4221_s4, 16, %s3479_s20, [#allocation8]  }
  0x40   : > { %s3049_s19 = scalar_lea.hbm %s4223_s6, 16 }
  0x41   : > { %p3050_p11 = scmp.ne.s32.totalorder %s4223_s6, %s3049_s19  ;;  %p3056_p0 = scmp.lt.u32.totalorder %s3049_s19, %s4223_s6 }
  0x43   : > { %p3052_p12 = pnand %p3050_p11, %p3499_p7 }
  0x45   : > { %p3053_p13 = pneg %p3052_p12 }
  0x47   : > { %p3058_p1 = pnand %p3056_p0, %p3053_p13 }
  0x49   : > { %3061 = shalt.err (!%p3058_p1)
}
  0x4a   : > { %s3062_s20 = scalar_lea.vmem %s3487_s22, 16  ;;  %s3069_s13 = scalar_lea.vmem %s3487_s22, 32 }
  0x4b   : > { %p3063_p4 = scmp.ne.s32.totalorder %s3487_s22, %s3062_s20  ;;  %p3070_p9 = scmp.lt.s32.totalorder %s3487_s22, %s3487_s22 }
  0x4c   : > { %p3071_p10 = scmp.lt.s32.totalorder %s3069_s13, %s3062_s20 }
  0x4d   : > { %p3065_p6 = pnand %p3063_p4, %p3499_p7 }
  0x4e   : > { %p3072_p11 = por %p3071_p10, %p3070_p9 }
  0x4f   : > { %p3066_p8 = pneg %p3065_p6 }
  0x51   : > { %p3073_p12 = pnand %p3072_p11, %p3066_p8 }
  0x53   : > { %3076 = shalt.err (!%p3073_p12)
}
  0x54   : > { %2925 = dma.hbm_to_vmem [thread:$0]  (!%p3483_p5), %s4223_s6, 16, %s3487_s22, [#allocation11]  }
  0x55   : > { %s3077_s19 = scalar_lea.hbm %s4225_s8, 16 }
  0x56   : > { %p3078_p13 = scmp.ne.s32.totalorder %s4225_s8, %s3077_s19  ;;  %p3084_p4 = scmp.lt.u32.totalorder %s3077_s19, %s4225_s8 }
  0x58   : > { %p3080_p0 = pnand %p3078_p13, %p3499_p7 }
  0x5a   : > { %p3081_p1 = pneg %p3080_p0 }
  0x5c   : > { %p3086_p6 = pnand %p3084_p4, %p3081_p1 }
  0x5e   : > { %3089 = shalt.err (!%p3086_p6)
}
  0x5f   : > { %s3090_s22 = scalar_lea.vmem %s3489_s25, 16  ;;  %s3097_s20 = scalar_lea.vmem %s3489_s25, 32 }
  0x60   : > { %p3091_p8 = scmp.ne.s32.totalorder %s3489_s25, %s3090_s22  ;;  %p3098_p11 = scmp.lt.s32.totalorder %s3489_s25, %s3489_s25 }
  0x61   : > { %p3099_p12 = scmp.lt.s32.totalorder %s3097_s20, %s3090_s22 }
  0x62   : > { %p3093_p9 = pnand %p3091_p8, %p3499_p7 }
  0x63   : > { %p3100_p13 = por %p3099_p12, %p3098_p11 }
  0x64   : > { %p3094_p10 = pneg %p3093_p9 }
  0x66   : > { %p3101_p0 = pnand %p3100_p13, %p3094_p10 }
  0x68   : > { %3104 = shalt.err (!%p3101_p0)
}
  0x69   : > { %2931 = dma.hbm_to_vmem [thread:$0]  (!%p3483_p5), %s4225_s8, 16, %s3489_s25, [#allocation14]  }
  0x6a   : > { %s3369_s16 = smov [#allocation16]   ;;  %s3370_s30 = smov [#allocation2]  }
  0x6b   : > { %s487_s28 = sshll.u32 %s3369_s16, 4  ;;  %s380_s19 = sshll.u32 %s3370_s30, 4  ;;  %s488_s28 = int_to_ptr.vmem [resolvable:$true] %s487_s28  ;;  %s381_s19 = int_to_ptr.vmem [resolvable:$true] %s380_s19 }
  0x6c   : > { %s3105_s27 = scalar_lea.hbm %s4227_s10, 16 }
  0x6d   : > { %p3106_p1 = scmp.ne.s32.totalorder %s4227_s10, %s3105_s27  ;;  %p3112_p8 = scmp.lt.u32.totalorder %s3105_s27, %s4227_s10 }
  0x6f   : > { %p3108_p4 = pnand %p3106_p1, %p3499_p7 }
  0x71   : > { %p3109_p6 = pneg %p3108_p4 }
  0x73   : > { %p3114_p9 = pnand %p3112_p8, %p3109_p6 }
  0x75   : > { %3117 = shalt.err (!%p3114_p9)
}
  0x76   : > { %s3118_s25 = scalar_lea.vmem %s488_s28, 16  ;;  %s3125_s14 = scalar_lea.vmem %s488_s28, 32 }
  0x77   : > { %p3119_p10 = scmp.ne.s32.totalorder %s488_s28, %s3118_s25  ;;  %p3126_p13 = scmp.lt.s32.totalorder %s488_s28, %s488_s28 }
  0x78   : > { %p3127_p0 = scmp.lt.s32.totalorder %s3125_s14, %s3118_s25 }
  0x79   : > { %p3121_p11 = pnand %p3119_p10, %p3499_p7 }
  0x7a   : > { %p3128_p2 = por %p3127_p0, %p3126_p13 }
  0x7b   : > { %p3122_p12 = pneg %p3121_p11 }
  0x7d   : > { %p3129_p3 = pnand %p3128_p2, %p3122_p12 }
  0x7f   : > { %3132 = shalt.err (!%p3129_p3)
}
  0x80   : > { %2937 = dma.hbm_to_vmem [thread:$0]  (!%p3483_p5), %s4227_s10, 16, %s488_s28, [#allocation17]  }
  0x81   : > { %s4243_s1 = sld [smem:[#allocation28_spill]] }
  0x87   : > { %s3133_s27 = scalar_lea.hbm %s4243_s1, 128 }
  0x88   : > { %p3134_p1 = scmp.ne.s32.totalorder %s4243_s1, %s3133_s27  ;;  %p3140_p3 = scmp.lt.u32.totalorder %s3133_s27, %s4243_s1 }
  0x8a   : > { %p3136_p4 = pnand %p3134_p1, %p3499_p7 }
  0x8c   : > { %p3137_p2 = pneg %p3136_p4 }
  0x8e   : > { %p3142_p6 = pnand %p3140_p3, %p3137_p2 }
  0x90   : > { %3145 = shalt.err (!%p3142_p6)
}
  0x91   : > { %s3146_s25 = scalar_lea.vmem %s381_s19, 128  ;;  %p3154_p11 = scmp.lt.s32.totalorder %s381_s19, %s381_s19 }
  0x92   : > { %p3147_p8 = scmp.ne.s32.totalorder %s381_s19, %s3146_s25  ;;  %p3155_p12 = scmp.lt.s32.totalorder %s3146_s25, %s3146_s25 }
  0x94   : > { %p3149_p9 = pnand %p3147_p8, %p3499_p7  ;;  %p3156_p13 = por %p3155_p12, %p3154_p11 }
  0x96   : > { %p3150_p10 = pneg %p3149_p9 }
  0x98   : > { %p3157_p0 = pnand %p3156_p13, %p3150_p10 }
  0x9a   : > { %3160 = shalt.err (!%p3157_p0)
}
  0x9b   : > { %2910 = dma.hbm_to_vmem [thread:$0]  (!%p3483_p5), %s4243_s1, 128, %s381_s19, [#allocation3]  }
  0x9c   : > { %s3371_s16 = smov [#allocation6]   ;;  %s3161_s27 = scalar_lea.hbm %s4220_s3, 512 }
  0x9d   : > { %s401_s30 = sshll.u32 %s3371_s16, 4  ;;  %p3162_p1 = scmp.ne.s32.totalorder %s4220_s3, %s3161_s27  ;;  %s402_s30 = int_to_ptr.vmem [resolvable:$true] %s401_s30 }
  0x9e   : > { %p3168_p3 = scmp.lt.u32.totalorder %s3161_s27, %s4220_s3 }
  0x9f   : > { %p3164_p4 = pnand %p3162_p1, %p3499_p7 }
  0xa1   : > { %p3165_p2 = pneg %p3164_p4 }
  0xa3   : > { %p3170_p6 = pnand %p3168_p3, %p3165_p2 }
  0xa5   : > { %3173 = shalt.err (!%p3170_p6)
}
  0xa6   : > { %s3174_s19 = scalar_lea.vmem %s402_s30, 512  ;;  %p3182_p11 = scmp.lt.s32.totalorder %s402_s30, %s402_s30 }
  0xa7   : > { %p3175_p8 = scmp.ne.s32.totalorder %s402_s30, %s3174_s19  ;;  %p3183_p12 = scmp.lt.s32.totalorder %s3174_s19, %s3174_s19 }
  0xa9   : > { %p3177_p9 = pnand %p3175_p8, %p3499_p7  ;;  %p3184_p13 = por %p3183_p12, %p3182_p11 }
  0xab   : > { %p3178_p10 = pneg %p3177_p9 }
  0xad   : > { %p3185_p0 = pnand %p3184_p13, %p3178_p10 }
  0xaf   : > { %3188 = shalt.err (!%p3185_p0)
}
  0xb0   : > { %s3372_s25 = smov 128   ;;  %s3373_s28 = smov 8  }
  0xb1   : > { %2916 = dma.hbm_to_vmem [thread:$0]  (!%p3483_p5), %s4220_s3, 512, %s402_s30, [#allocation5], %s3372_s25, %s3372_s25, %s3373_s28  }
  0xb2   : > { %s3374_s24 = smov [#allocation9]   ;;  %s3375_s27 = smov [#allocation12]  }
  0xb3   : > { %s425_s26 = sshll.u32 %s3374_s24, 4  ;;  %s449_s15 = sshll.u32 %s3375_s27, 4  ;;  %s426_s26 = int_to_ptr.vmem [resolvable:$true] %s425_s26  ;;  %s3650_s15 = int_to_ptr.vmem [resolvable:$true] %s449_s15 }
  0xb4   : > { %s3189_s13 = scalar_lea.hbm %s4222_s5, 2048 }
  0xb5   : > { %p3190_p1 = scmp.ne.s32.totalorder %s4222_s5, %s3189_s13  ;;  %p3196_p3 = scmp.lt.u32.totalorder %s3189_s13, %s4222_s5 }
  0xb7   : > { %p3192_p4 = pnand %p3190_p1, %p3499_p7 }
  0xb9   : > { %p3193_p2 = pneg %p3192_p4 }
  0xbb   : > { %p3198_p6 = pnand %p3196_p3, %p3193_p2 }
  0xbd   : > { %3201 = shalt.err (!%p3198_p6)
}
  0xbe   : > { %s3202_s16 = scalar_lea.vmem %s426_s26, 2048  ;;  %p3210_p11 = scmp.lt.s32.totalorder %s426_s26, %s426_s26 }
  0xbf   : > { %p3203_p8 = scmp.ne.s32.totalorder %s426_s26, %s3202_s16  ;;  %p3211_p12 = scmp.lt.s32.totalorder %s3202_s16, %s3202_s16 }
  0xc1   : > { %p3205_p9 = pnand %p3203_p8, %p3499_p7  ;;  %p3212_p13 = por %p3211_p12, %p3210_p11 }
  0xc3   : > { %p3206_p10 = pneg %p3205_p9 }
  0xc5   : > { %p3213_p0 = pnand %p3212_p13, %p3206_p10 }
  0xc7   : > { %3216 = shalt.err (!%p3213_p0)
}
  0xc8   : > { %2922 = dma.hbm_to_vmem [thread:$0]  (!%p3483_p5), %s4222_s5, 2048, %s426_s26, [#allocation8], %s3372_s25, %s3372_s25, %s3373_s28  }
  0xc9   : > { %s3217_s20 = scalar_lea.hbm %s4224_s7, 1024 }
  0xca   : > { %p3218_p1 = scmp.ne.s32.totalorder %s4224_s7, %s3217_s20  ;;  %p3224_p3 = scmp.lt.u32.totalorder %s3217_s20, %s4224_s7 }
  0xcc   : > { %p3220_p4 = pnand %p3218_p1, %p3499_p7 }
  0xce   : > { %p3221_p2 = pneg %p3220_p4 }
  0xd0   : > { %p3226_p6 = pnand %p3224_p3, %p3221_p2 }
  0xd2   : > { %3229 = shalt.err (!%p3226_p6)
}
  0xd3   : > { %s3230_s26 = scalar_lea.vmem %s3650_s15, 1024  ;;  %p3238_p11 = scmp.lt.s32.totalorder %s3650_s15, %s3650_s15 }
  0xd4   : > { %p3231_p8 = scmp.ne.s32.totalorder %s3650_s15, %s3230_s26  ;;  %p3239_p12 = scmp.lt.s32.totalorder %s3230_s26, %s3230_s26 }
  0xd6   : > { %p3233_p9 = pnand %p3231_p8, %p3499_p7  ;;  %p3240_p13 = por %p3239_p12, %p3238_p11 }
  0xd8   : > { %p3234_p10 = pneg %p3233_p9 }
  0xda   : > { %p3241_p0 = pnand %p3240_p13, %p3234_p10 }
  0xdc   : > { %3244 = shalt.err (!%p3241_p0)
}
  0xdd   : > { %2928 = dma.hbm_to_vmem [thread:$0]  (!%p3483_p5), %s4224_s7, 1024, %s3650_s15, [#allocation11], %s3372_s25, %s3372_s25, %s3373_s28  }
  0xde   : > { %s3376_s24 = smov [#allocation15]   ;;  %s3377_s22 = smov [#allocation18]  }
  0xdf   : > { %s473_s27 = sshll.u32 %s3376_s24, 4  ;;  %s497_s20 = sshll.u32 %s3377_s22, 4  ;;  %s474_s27 = int_to_ptr.vmem [resolvable:$true] %s473_s27  ;;  %s3699_s20 = int_to_ptr.vmem [resolvable:$true] %s497_s20 }
  0xe0   : > { %s3245_s14 = scalar_lea.hbm %s4226_s9, 512 }
  0xe1   : > { %p3246_p1 = scmp.ne.s32.totalorder %s4226_s9, %s3245_s14  ;;  %p3252_p3 = scmp.lt.u32.totalorder %s3245_s14, %s4226_s9 }
  0xe3   : > { %p3248_p4 = pnand %p3246_p1, %p3499_p7 }
  0xe5   : > { %p3249_p2 = pneg %p3248_p4 }
  0xe7   : > { %p3254_p6 = pnand %p3252_p3, %p3249_p2 }
  0xe9   : > { %3257 = shalt.err (!%p3254_p6)
}
  0xea   : > { %s3258_s1 = scalar_lea.vmem %s474_s27, 512  ;;  %p3266_p11 = scmp.lt.s32.totalorder %s474_s27, %s474_s27 }
  0xeb   : > { %p3259_p8 = scmp.ne.s32.totalorder %s474_s27, %s3258_s1  ;;  %p3267_p12 = scmp.lt.s32.totalorder %s3258_s1, %s3258_s1 }
  0xed   : > { %p3261_p9 = pnand %p3259_p8, %p3499_p7  ;;  %p3268_p13 = por %p3267_p12, %p3266_p11 }
  0xef   : > { %p3262_p10 = pneg %p3261_p9 }
  0xf1   : > { %p3269_p0 = pnand %p3268_p13, %p3262_p10 }
  0xf3   : > { %3272 = shalt.err (!%p3269_p0)
}
  0xf4   : > { %2934 = dma.hbm_to_vmem [thread:$0]  (!%p3483_p5), %s4226_s9, 512, %s474_s27, [#allocation14], %s3372_s25, %s3372_s25, %s3373_s28  }
  0xf5   : > { %s3273_s14 = scalar_lea.hbm %s4228_s11, 512 }
  0xf6   : > { %p3274_p1 = scmp.ne.s32.totalorder %s4228_s11, %s3273_s14  ;;  %p3280_p3 = scmp.lt.u32.totalorder %s3273_s14, %s4228_s11 }
  0xf8   : > { %p3276_p4 = pnand %p3274_p1, %p3499_p7 }
  0xfa   : > { %p3277_p2 = pneg %p3276_p4 }
  0xfc   : > { %p3282_p6 = pnand %p3280_p3, %p3277_p2 }
  0xfe   : > { %3285 = shalt.err (!%p3282_p6)
}
  0xff   : > { %s3286_s27 = scalar_lea.vmem %s3699_s20, 512  ;;  %p3294_p11 = scmp.lt.s32.totalorder %s3699_s20, %s3699_s20 }
 0x100   : > { %p3287_p8 = scmp.ne.s32.totalorder %s3699_s20, %s3286_s27  ;;  %p3295_p12 = scmp.lt.s32.totalorder %s3286_s27, %s3286_s27 }
 0x102   : > { %p3289_p9 = pnand %p3287_p8, %p3499_p7  ;;  %p3296_p13 = por %p3295_p12, %p3294_p11 }
 0x104   : > { %p3290_p10 = pneg %p3289_p9 }
 0x106   : > { %p3297_p0 = pnand %p3296_p13, %p3290_p10 }
 0x108   : > { %3300 = shalt.err (!%p3297_p0)
}
 0x109   : > { %2940 = dma.hbm_to_vmem [thread:$0]  (!%p3483_p5), %s4228_s11, 512, %s3699_s20, [#allocation17], %s3372_s25, %s3372_s25, %s3373_s28  }
 0x10a   : > { %s3378_s22 = smov [#allocation19]   ;;  %s3301_s30 = scalar_lea.hbm %s4229_s12, 16 }
 0x10b   : > { %s511_s13 = sshll.u32 %s3378_s22, 4  ;;  %p3302_p1 = scmp.ne.s32.totalorder %s4229_s12, %s3301_s30  ;;  %s512_s13 = int_to_ptr.vmem [resolvable:$true] %s511_s13 }
 0x10c   : > { %p3308_p3 = scmp.lt.u32.totalorder %s3301_s30, %s4229_s12 }
 0x10d   : > { %p3304_p4 = pnand %p3302_p1, %p3499_p7 }
 0x10f   : > { %p3305_p2 = pneg %p3304_p4 }
 0x111   : > { %p3310_p6 = pnand %p3308_p3, %p3305_p2 }
 0x113   : > { %3313 = shalt.err (!%p3310_p6)
}
 0x114   : > { %s3314_s25 = scalar_lea.vmem %s512_s13, 16  ;;  %s3321_s28 = scalar_lea.vmem %s512_s13, 32 }
 0x115   : > { %p3315_p8 = scmp.ne.s32.totalorder %s512_s13, %s3314_s25  ;;  %p3322_p11 = scmp.lt.s32.totalorder %s512_s13, %s512_s13 }
 0x116   : > { %p3323_p12 = scmp.lt.s32.totalorder %s3321_s28, %s3314_s25 }
 0x117   : > { %p3317_p9 = pnand %p3315_p8, %p3499_p7 }
 0x118   : > { %p3324_p13 = por %p3323_p12, %p3322_p11 }
 0x119   : > { %p3318_p10 = pneg %p3317_p9 }
 0x11b   : > { %p3325_p0 = pnand %p3324_p13, %p3318_p10 }
 0x11d   : > { %3328 = shalt.err (!%p3325_p0)
}
 0x11e   : > { %2943 = dma.hbm_to_vmem [thread:$0]  (!%p3483_p5), %s4229_s12, 16, %s512_s13, [#allocation20]  }
 0x11f   : > { %p4244_p1 = scmp.ne.s32.totalorder %s4240_s18, 0 }
 0x120   : > { %p4245_p4 = scmp.ne.s32.totalorder (!%p4244_p1), %s4239_s17, 0 }
 0x121   : > { %533 = sbr.rel (%p4244_p1) target bundleno = 1604 (0x644), region = 72 }
 0x128   : > { %3334 = dma.done.wait (%p4245_p4), [#allocation3], 128  }
 0x129   : > { %3336 = vsyncadd (%p4245_p4), [#allocation3], 4294967168 }
 0x12a   : > { %3338 = dma.done.wait (%p4245_p4), [#allocation5], 528  }
 0x12b   : > { %3340 = vsyncadd (%p4245_p4), [#allocation5], 4294966768 }
 0x12c   : > { %3342 = dma.done.wait (%p4245_p4), [#allocation8], 2064  }
 0x12d   : > { %3344 = vsyncadd (%p4245_p4), [#allocation8], 4294965232 }
 0x12e   : > { %3346 = dma.done.wait (%p4245_p4), [#allocation11], 1040  }
 0x12f   : > { %3348 = vsyncadd (%p4245_p4), [#allocation11], 4294966256 }
 0x130   : > { %3350 = dma.done.wait (%p4245_p4), [#allocation14], 528  }
 0x131   : > { %3352 = vsyncadd (%p4245_p4), [#allocation14], 4294966768 }
 0x132   : > { %3354 = dma.done.wait (%p4245_p4), [#allocation17], 528  }
 0x133   : > { %3356 = vsyncadd (%p4245_p4), [#allocation17], 4294966768 }
 0x134   : > { %3358 = dma.done.wait (%p4245_p4), [#allocation20], 16  }
 0x135   : > { %3360 = vsyncadd (%p4245_p4), [#allocation20], 4294967280  ;;  %s4246_s18 = sadd.s32 4294967295, %s3363_s29   ;;  %vm662_vm0 = vcmask 64512   ;;  %v654_v0 = vld [vmem:[#allocation2] sm:$0xff]  ;;  %v800_v4 = vld [vmem:[#allocation6] sm:$0xff] }
 0x136   : > { %s2358_s23 = sshll.u32 %s4246_s18, 3  ;;  %2557 = vmatprep.subr.mxu0 %v654_v0  ;;  %v801_v5 = vld [vmem:[#allocation6 + $0x8] sm:$0xff]  ;;  %v802_v12 = vld [vmem:[#allocation6 + $0x10] sm:$0xff]  ;;  %v803_v13 = vld [vmem:[#allocation6 + $0x18] sm:$0xff]  ;;  %vm804_vm1 = vcmask 261120   ;;  %s3379_s17 = smov 64  }
 0x137   : > { %p629_p5 = scmp.lt.s32.totalorder %s2358_s23, 31  ;;  %2558 = vmatpush3.msra.mxu0 %v654_v0  ;;  %v2763_v7 = vpack.c.bf16 %v801_v5, %v800_v4  ;;  %v2767_v14 = vpack.c.bf16 %v803_v13, %v802_v12  ;;  %v2364_v15 = vld [vmem:[#allocation4] ss:$0 sm:$0xff]  ;;  %v1071_v40 = vld [vmem:[#allocation9] sm:$0xff]  ;;  %v1072_v41 = vld [vmem:[#allocation9 + $0x8] sm:$0xff]  ;;  %s3380_s19 = smov 32  }
 0x138   : > { %v1073_v42 = vld [vmem:[#allocation9 + $0x10] sm:$0xff]  ;;  %v2771_v43 = vpack.c.bf16 %v1072_v41, %v1071_v40  ;;  %v1074_v44 = vld [vmem:[#allocation9 + $0x18] sm:$0xff]  ;;  %v1075_v46 = vld [vmem:[#allocation9 + $0x20] sm:$0xff]  ;;  %s3381_s14 = smov 96   ;;  %vm1022_vm2 = vcmask 523264   ;;  %vm1031_vm3 = vcmask 785408  }
 0x139   : > { %s4250_s23 = smov (!%p629_p5, %s2358_s23), 31  ;;  %2764 = vmatprep.subr.bf16.mxu1 %v2763_v7  ;;  %v2775_v45 = vpack.c.bf16 %v1074_v44, %v1073_v42  ;;  %v1076_v47 = vld [vmem:[#allocation9 + $0x28] sm:$0xff]  ;;  %v1077_v49 = vld [vmem:[#allocation9 + $0x30] sm:$0xff]  ;;  %v1078_v50 = vld [vmem:[#allocation9 + $0x38] sm:$0xff]  ;;  %s4247_s16 = sld [smem:[#allocation29_spill]] }
 0x13a   : > { %s3798_s21 = sshll.u32 %s4250_s23, 3  ;;  %2766 = vmatpush3.bf16.msra.mxu1 %v2763_v7  ;;  %2772 = vmatprep.subr.bf16.mxu0 %v2771_v43  ;;  %v2779_v48 = vpack.c.bf16 %v1076_v47, %v1075_v46  ;;  %v2783_v51 = vpack.c.bf16 %v1078_v50, %v1077_v49  ;;  %v1079_v52 = vld [vmem:[#allocation9 + $0x40] sm:$0xff]  ;;  %v1080_v53 = vld [vmem:[#allocation9 + $0x48] sm:$0xff]  ;;  %v1081_v55 = vld [vmem:[#allocation9 + $0x50] sm:$0xff]  ;;  %s4248_s28 = sld [smem:[#allocation30_spill]] }
 0x13b   : > { %s632_s13 = scalar_lea.vmem %s4217_s0, %s3798_s21  ;;  %2768 = vmatprep.subr.bf16.mxu1 %v2767_v14  ;;  %v2787_v54 = vpack.c.bf16 %v1080_v53, %v1079_v52  ;;  %v1082_v56 = vld [vmem:[#allocation9 + $0x58] sm:$0xff]  ;;  %v1083_v58 = vld [vmem:[#allocation9 + $0x60] sm:$0xff]  ;;  %v1084_v59 = vld [vmem:[#allocation9 + $0x68] sm:$0xff] }
 0x13c   : > { %v646_v1 = vld [vmem:[%s632_s13] sm:$0xff]  ;;  %v647_v2 = vld [vmem:[%s632_s13 + $0x8] sm:$0xff]  ;;  %v648_v3 = vld [vmem:[%s632_s13 + $0x10] sm:$0xff]  ;;  %v2791_v57 = vpack.c.bf16 %v1082_v56, %v1081_v55  ;;  %v2795_v60 = vpack.c.bf16 %v1084_v59, %v1083_v58 }
 0x13d   : > { %2559 = vmatprep.mubr.msk.f32.mxu0 %vm662_vm0, %v646_v1  ;;  %v649_v6 = vld [vmem:[%s632_s13 + $0x18] sm:$0xff]  ;;  %v650_v8 = vld [vmem:[%s632_s13 + $0x20] sm:$0xff]  ;;  %v651_v9 = vld [vmem:[%s632_s13 + $0x28] sm:$0xff] }
 0x13e   : > { %2560 = vmatmul.mubr.msk.f32.vlgmr.msra.gmra.mrb[0].mxu0 %vm662_vm0, %v647_v2  ;;  %v652_v10 = vld [vmem:[%s632_s13 + $0x30] sm:$0xff]  ;;  %v653_v11 = vld [vmem:[%s632_s13 + $0x38] sm:$0xff]  ;;  %2770 = vmatpush3.bf16.msra.mxu1 %v2767_v14  ;;  %v1086_v62 = vld [vmem:[#allocation9 + $0x78] sm:$0xff] }
 0x13f   : > { %2562 = vmatprep.mubr.msk.f32.mxu0 %vm662_vm0, %v648_v3  ;;  %2774 = vmatpush3.bf16.msra.mxu0 %v2771_v43  ;;  %v1085_v61 = vld [vmem:[#allocation9 + $0x70] sm:$0xff]  ;;  %v3878_v14 = vld [vmem:[#allocation7] ss:$0 sm:$0xff]  ;;  %s3887_s15 = scalar_lea.vmem %s4247_s16, %s3798_s21 }
 0x140   : > { %2776 = vmatprep.subr.bf16.mxu0 %v2775_v45  ;;  %v2799_v63 = vpack.c.bf16 %v1086_v62, %v1085_v61  ;;  %s4192_s20 = scalar_lea.vmem %s4248_s28, %s3798_s21 }
 0x142   : > { %2563 = vmatmul.mubr.msk.f32.gmra.mrb[2].mxu0 %vm662_vm0, %v649_v6 }
 0x143   : > { %2565 = vmatprep.mubr.msk.f32.mxu0 %vm662_vm0, %v650_v8  ;;  %2778 = vmatpush3.bf16.msra.mxu0 %v2775_v45  ;;  %v1499_v8 = vld [vmem:[#allocation18] sm:$0xff] }
 0x144   : > { %2780 = vmatprep.subr.bf16.mxu0 %v2779_v48 }
 0x146   : > { %2566 = vmatmul.mubr.msk.f32.gmra.mrb[4].mxu0 %vm662_vm0, %v651_v9  ;;  %v1500_v9 = vld [vmem:[#allocation18 + $0x8] sm:$0xff] }
 0x147   : > { %2568 = vmatprep.mubr.msk.f32.mxu0 %vm662_vm0, %v652_v10  ;;  %2782 = vmatpush3.bf16.msra.mxu0 %v2779_v48  ;;  %v3858_v10 = vpack.c.bf16 %v1500_v9, %v1499_v8 }
 0x148   : > { %2784 = vmatprep.subr.bf16.mxu0 %v2783_v51 }
 0x14a   : > { %2569 = vmatmul.mubr.msk.f32.gmra.mrb[6].mxu0 %vm662_vm0, %v653_v11 }
 0x14b   : > { %2786 = vmatpush3.bf16.msra.mxu0 %v2783_v51 }
 0x14c   : > { %2788 = vmatprep.subr.bf16.mxu0 %v2787_v54 }
 0x14f   : > { %2790 = vmatpush3.bf16.msra.mxu0 %v2787_v54 }
 0x150   : > { %2792 = vmatprep.subr.bf16.mxu0 %v2791_v57 }
 0x153   : > { %2794 = vmatpush3.bf16.msra.mxu0 %v2791_v57 }
 0x154   : > { %2796 = vmatprep.subr.bf16.mxu0 %v2795_v60 }
 0x157   : > { %2798 = vmatpush3.bf16.msra.mxu0 %v2795_v60 }
 0x158   : > { %2800 = vmatprep.subr.bf16.mxu0 %v2799_v63 }
 0x15b   : > { %2802 = vmatpush3.bf16.msra.mxu0 %v2799_v63 }
 0x15c   : > { %2828 = vmatprep.subr.bf16.mxu0 %v3858_v10 }
 0x211   : > { %v2561_v16 = vpop.f32.mrb[0].mxu0 }
 0x212   : > { %v759_v17 = vadd.f32 %v2561_v16, %v2364_v15  ;;  %v753_v18 = vpop.f32.mrb[1].mxu0 }
 0x213   : > { %v754_v19 = vadd.f32 %v2364_v15, %v753_v18 }
 0x214   : > { %v793_v22 = vmax.f32 %v759_v17, 0.0 }
 0x215   : > { %v792_v20 = vmax.f32 %v754_v19, 0.0  ;;  %v2564_v21 = vpop.f32.mrb[2].mxu0 }
 0x216   : > { %v769_v23 = vadd.f32 %v2564_v21, %v2364_v15  ;;  %v763_v24 = vpop.f32.mrb[3].mxu0 }
 0x217   : > { %2579 = vmatprep.mubr.msk.f32.mxu1 %vm804_vm1, %v792_v20  ;;  %v764_v25 = vadd.f32 %v2364_v15, %v763_v24 }
 0x218   : > { %2580 = vmatmul.mubr.msk.f32.vlgmr.msra.gmra.mrb[0].mxu1 %vm804_vm1, %v793_v22  ;;  %v795_v26 = vmax.f32 %v769_v23, 0.0 }
 0x219   : > { %v794_v27 = vmax.f32 %v764_v25, 0.0  ;;  %v2567_v28 = vpop.f32.mrb[4].mxu0 }
 0x21a   : > { %v779_v29 = vadd.f32 %v2567_v28, %v2364_v15  ;;  %v773_v30 = vpop.f32.mrb[5].mxu0  ;;  %v1502_v28 = vld [vmem:[#allocation18 + $0x18] sm:$0xff] }
 0x21b   : > { %2582 = vmatprep.mubr.msk.f32.mxu1 %vm804_vm1, %v794_v27  ;;  %v774_v31 = vadd.f32 %v2364_v15, %v773_v30  ;;  %v1501_v27 = vld [vmem:[#allocation18 + $0x10] sm:$0xff] }
 0x21c   : > { %2583 = vmatmul.mubr.msk.f32.gmra.mrb[2].mxu1 %vm804_vm1, %v795_v26  ;;  %v797_v32 = vmax.f32 %v779_v29, 0.0 }
 0x21d   : > { %v796_v33 = vmax.f32 %v774_v31, 0.0  ;;  %v2570_v34 = vpop.f32.mrb[6].mxu0 }
 0x21e   : > { %v789_v35 = vadd.f32 %v2570_v34, %v2364_v15  ;;  %v783_v36 = vpop.f32.mrb[7].mxu0 }
 0x21f   : > { %2585 = vmatprep.mubr.msk.f32.mxu1 %vm804_vm1, %v796_v33  ;;  %v784_v37 = vadd.f32 %v2364_v15, %v783_v36 }
 0x220   : > { %2586 = vmatmul.mubr.msk.f32.gmra.mrb[4].mxu1 %vm804_vm1, %v797_v32  ;;  %v799_v38 = vmax.f32 %v789_v35, 0.0  ;;  %v3903_v32 = vpack.c.bf16 %v1502_v28, %v1501_v27 }
 0x221   : > { %v798_v39 = vmax.f32 %v784_v37, 0.0 }
 0x223   : > { %2588 = vmatprep.mubr.msk.f32.mxu1 %vm804_vm1, %v798_v39 }
 0x224   : > { %2589 = vmatmul.mubr.msk.f32.gmra.mrb[6].mxu1 %vm804_vm1, %v799_v38 }
 0x2eb   : > { %v2581_v0 = vpop.f32.mrb[0].mxu1 }
 0x2ec   : > { %968 = vrot.lane.b32.xlu1 %v2581_v0, %s3379_s17  ;;  %944 = vrot.lane.b32.xlu0 %v2581_v0, %s3380_s19  ;;  %v895_v1 = vpop.f32.mrb[1].mxu1 }
 0x2ef   : > { %v3822_v2 = vpop.f32.mrb[2].mxu1 }
 0x2f0   : > { %992 = vrot.lane.b32.xlu1 %v2581_v0, %s3381_s14  ;;  %942 = vrot.lane.b32.xlu0 %v895_v1, %s3380_s19  ;;  %v3826_v3 = vpop.f32.mrb[3].mxu1 }
 0x2f3   : > { %v3828_v4 = vpop.f32.mrb[4].mxu1 }
 0x2f4   : > { %966 = vrot.lane.b32.xlu1 %v895_v1, %s3379_s17  ;;  %990 = vrot.lane.b32.xlu0 %v895_v1, %s3381_s14  ;;  %v3832_v5 = vpop.f32.mrb[5].mxu1 }
 0x2f7   : > { %v3834_v6 = vpop.f32.mrb[6].mxu1 }
 0x2f8   : > { %948 = vrot.lane.b32.xlu1 %v3822_v2, %s3380_s19  ;;  %946 = vrot.lane.b32.xlu0 %v3826_v3, %s3380_s19  ;;  %v3840_v7 = vpop.f32.mrb[7].mxu1 }
 0x2fc   : > { %972 = vrot.lane.b32.xlu1 %v3822_v2, %s3379_s17  ;;  %970 = vrot.lane.b32.xlu0 %v3826_v3, %s3379_s17 }
 0x300   : > { %996 = vrot.lane.b32.xlu1 %v3822_v2, %s3381_s14  ;;  %994 = vrot.lane.b32.xlu0 %v3826_v3, %s3381_s14 }
 0x304   : > { %952 = vrot.lane.b32.xlu1 %v3828_v4, %s3380_s19  ;;  %950 = vrot.lane.b32.xlu0 %v3832_v5, %s3380_s19 }
 0x308   : > { %976 = vrot.lane.b32.xlu1 %v3828_v4, %s3379_s17  ;;  %974 = vrot.lane.b32.xlu0 %v3832_v5, %s3379_s17 }
 0x30c   : > { %1000 = vrot.lane.b32.xlu1 %v3828_v4, %s3381_s14  ;;  %998 = vrot.lane.b32.xlu0 %v3832_v5, %s3381_s14 }
 0x310   : > { %956 = vrot.lane.b32.xlu1 %v3834_v6, %s3380_s19  ;;  %954 = vrot.lane.b32.xlu0 %v3840_v7, %s3380_s19 }
 0x314   : > { %980 = vrot.lane.b32.xlu1 %v3834_v6, %s3379_s17  ;;  %978 = vrot.lane.b32.xlu0 %v3840_v7, %s3379_s17 }
 0x318   : > { %1004 = vrot.lane.b32.xlu1 %v3834_v6, %s3381_s14  ;;  %1002 = vrot.lane.b32.xlu0 %v3840_v7, %s3381_s14 }
 0x35e   : > { %v969_v11 = vpop.permute.xlu1 %968  ;;  %v945_v12 = vpop.permute.xlu0 %944 }
 0x35f   : > { %v1015_v13 = vsel %vm804_vm1, %v2581_v0, %v945_v12 }
 0x360   : > { %v1024_v16 = vsel %vm1022_vm2, %v1015_v13, %v969_v11 }
 0x362   : > { %v993_v15 = vpop.permute.xlu1 %992  ;;  %v943_v17 = vpop.permute.xlu0 %942 }
 0x363   : > { %v1033_v18 = vsel %vm1031_vm3, %v1024_v16, %v993_v15  ;;  %v1014_v21 = vsel %vm804_vm1, %v895_v1, %v943_v17 }
 0x364   : > { %v1048_v19 = vadd.f32 %v3878_v14, %v1033_v18 }
 0x366   : > { %v3889_v20 = vmax.f32 %v1048_v19, 0.0  ;;  %v967_v22 = vpop.permute.xlu1 %966  ;;  %v991_v23 = vpop.permute.xlu0 %990  ;;  %v1209_v19 = vld [vmem:[#allocation12 + $0x10] sm:$0xff] }
 0x367   : > { %v1023_v24 = vsel %vm1022_vm2, %v1014_v21, %v967_v22  ;;  %v1210_v22 = vld [vmem:[#allocation12 + $0x18] sm:$0xff] }
 0x368   : > { %1064 = vst [vmem:[%s3887_s15 + $0x8] sm:$0xff] %v3889_v20  ;;  %v1032_v25 = vsel %vm1031_vm3, %v1023_v24, %v991_v23  ;;  %1649 = vrot.lane.b32.xlu1 %v3889_v20, %s3381_s14  ;;  %v1211_v23 = vld [vmem:[#allocation12 + $0x20] sm:$0xff]  ;;  %v1212_v24 = vld [vmem:[#allocation12 + $0x28] sm:$0xff] }
 0x369   : > { %v1047_v26 = vadd.f32 %v3878_v14, %v1032_v25  ;;  %v2811_v25 = vpack.c.bf16 %v1212_v24, %v1211_v23 }
 0x36a   : > { %v949_v29 = vpop.permute.xlu1 %948  ;;  %v947_v30 = vpop.permute.xlu0 %946 }
 0x36b   : > { %v3899_v31 = vmax.f32 %v1047_v26, 0.0  ;;  %v1017_v35 = vsel %vm804_vm1, %v3822_v2, %v949_v29  ;;  %v1016_v36 = vsel %vm804_vm1, %v3826_v3, %v947_v30  ;;  %v1214_v26 = vld [vmem:[#allocation12 + $0x38] sm:$0xff] }
 0x36c   : > { %1802 = vrot.lane.b32.xlu1 %v3889_v20, %s3379_s17 }
 0x36d   : > { %1063 = vst [vmem:[%s3887_s15] sm:$0xff] %v3899_v31  ;;  %2623 = vmatprep.mubr.f32.mxu0 %v3899_v31  ;;  %1647 = vrot.lane.b32.xlu0 %v3899_v31, %s3381_s14 }
 0x36e   : > { %2624 = vmatmul.mubr.f32.vlgmr.msra.gmra.mrb[8].mxu0 %v3889_v20  ;;  %v973_v33 = vpop.permute.xlu1 %972  ;;  %v971_v34 = vpop.permute.xlu0 %970 }
 0x36f   : > { %2830 = vmatpush3.bf16.msra.mxu0 %v3858_v10  ;;  %v1026_v37 = vsel %vm1022_vm2, %v1017_v35, %v973_v33  ;;  %v1025_v38 = vsel %vm1022_vm2, %v1016_v36, %v971_v34 }
 0x370   : > { %1955 = vrot.lane.b32.xlu1 %v3889_v20, %s3380_s19  ;;  %2832 = vmatprep.subr.bf16.mxu0 %v3903_v32 }
 0x371   : > { %1800 = vrot.lane.b32.xlu0 %v3899_v31, %s3379_s17 }
 0x372   : > { %v997_v39 = vpop.permute.xlu1 %996  ;;  %v995_v40 = vpop.permute.xlu0 %994 }
 0x373   : > { %v1035_v41 = vsel %vm1031_vm3, %v1026_v37, %v997_v39  ;;  %v1034_v42 = vsel %vm1031_vm3, %v1025_v38, %v995_v40  ;;  %2834 = vmatpush3.bf16.msra.mxu0 %v3903_v32 }
 0x374   : > { %v1050_v43 = vadd.f32 %v3878_v14, %v1035_v41  ;;  %v1049_v44 = vadd.f32 %v3878_v14, %v1034_v42  ;;  %2844 = vmatprep.subr.bf16.mxu0 %v3858_v10 }
 0x375   : > { %1953 = vrot.lane.b32.xlu0 %v3899_v31, %s3380_s19 }
 0x376   : > { %v3931_v45 = vmax.f32 %v1050_v43, 0.0  ;;  %v3933_v46 = vmax.f32 %v1049_v44, 0.0  ;;  %v953_v47 = vpop.permute.xlu1 %952  ;;  %v951_v48 = vpop.permute.xlu0 %950 }
 0x377   : > { %v1019_v51 = vsel %vm804_vm1, %v3828_v4, %v953_v47  ;;  %v1018_v52 = vsel %vm804_vm1, %v3832_v5, %v951_v48 }
 0x378   : > { %1066 = vst [vmem:[%s3887_s15 + $0x18] sm:$0xff] %v3931_v45  ;;  %1065 = vst [vmem:[%s3887_s15 + $0x10] sm:$0xff] %v3933_v46  ;;  %2626 = vmatprep.mubr.f32.mxu0 %v3933_v46  ;;  %1653 = vrot.lane.b32.xlu1 %v3931_v45, %s3381_s14 }
 0x379   : > { %2627 = vmatmul.mubr.f32.gmra.mrb[10].mxu0 %v3931_v45  ;;  %1651 = vrot.lane.b32.xlu0 %v3933_v46, %s3381_s14 }
 0x37a   : > { %v977_v49 = vpop.permute.xlu1 %976  ;;  %v975_v50 = vpop.permute.xlu0 %974 }
 0x37b   : > { %v1028_v53 = vsel %vm1022_vm2, %v1019_v51, %v977_v49  ;;  %v1027_v54 = vsel %vm1022_vm2, %v1018_v52, %v975_v50  ;;  %v2382_v51 = vld [vmem:[#allocation10] ss:$0 sm:$0xff] }
 0x37c   : > { %1806 = vrot.lane.b32.xlu1 %v3931_v45, %s3379_s17 }
 0x37d   : > { %1804 = vrot.lane.b32.xlu0 %v3933_v46, %s3379_s17 }
 0x37e   : > { %v1001_v55 = vpop.permute.xlu1 %1000  ;;  %v999_v56 = vpop.permute.xlu0 %998 }
 0x37f   : > { %v1037_v57 = vsel %vm1031_vm3, %v1028_v53, %v1001_v55  ;;  %v1036_v58 = vsel %vm1031_vm3, %v1027_v54, %v999_v56 }
 0x380   : > { %v1052_v59 = vadd.f32 %v3878_v14, %v1037_v57  ;;  %v1051_v60 = vadd.f32 %v3878_v14, %v1036_v58  ;;  %1959 = vrot.lane.b32.xlu1 %v3931_v45, %s3380_s19 }
 0x381   : > { %1957 = vrot.lane.b32.xlu0 %v3933_v46, %s3380_s19 }
 0x382   : > { %v1060_v61 = vmax.f32 %v1052_v59, 0.0  ;;  %v1059_v62 = vmax.f32 %v1051_v60, 0.0  ;;  %v957_v63 = vpop.permute.xlu1 %956  ;;  %v955_v0 = vpop.permute.xlu0 %954 }
 0x383   : > { %v1021_v3 = vsel %vm804_vm1, %v3834_v6, %v957_v63  ;;  %v1020_v4 = vsel %vm804_vm1, %v3840_v7, %v955_v0  ;;  %v1207_v6 = vld [vmem:[#allocation12] sm:$0xff]  ;;  %v1208_v7 = vld [vmem:[#allocation12 + $0x8] sm:$0xff] }
 0x384   : > { %1068 = vst [vmem:[%s3887_s15 + $0x28] sm:$0xff] %v1060_v61  ;;  %1067 = vst [vmem:[%s3887_s15 + $0x20] sm:$0xff] %v1059_v62  ;;  %2629 = vmatprep.mubr.f32.mxu0 %v1059_v62  ;;  %1657 = vrot.lane.b32.xlu1 %v1060_v61, %s3381_s14  ;;  %v2803_v21 = vpack.c.bf16 %v1208_v7, %v1207_v6 }
 0x385   : > { %2630 = vmatmul.mubr.f32.gmra.mrb[12].mxu0 %v1060_v61  ;;  %1655 = vrot.lane.b32.xlu0 %v1059_v62, %s3381_s14 }
 0x386   : > { %v981_v1 = vpop.permute.xlu1 %980  ;;  %v979_v2 = vpop.permute.xlu0 %978  ;;  %2804 = vmatprep.subr.bf16.mxu1 %v2803_v21 }
 0x387   : > { %v1030_v5 = vsel %vm1022_vm2, %v1021_v3, %v981_v1  ;;  %v1029_v8 = vsel %vm1022_vm2, %v1020_v4, %v979_v2  ;;  %2806 = vmatpush3.bf16.msra.mxu1 %v2803_v21 }
 0x38a   : > { %v1005_v9 = vpop.permute.xlu1 %1004  ;;  %v1003_v11 = vpop.permute.xlu0 %1002 }
 0x38b   : > { %v1039_v12 = vsel %vm1031_vm3, %v1030_v5, %v1005_v9  ;;  %v1038_v13 = vsel %vm1031_vm3, %v1029_v8, %v1003_v11 }
 0x38c   : > { %v1054_v15 = vadd.f32 %v3878_v14, %v1039_v12  ;;  %v1053_v16 = vadd.f32 %v3878_v14, %v1038_v13  ;;  %v2807_v14 = vpack.c.bf16 %v1210_v22, %v1209_v19  ;;  %v1359_v13 = vld [vmem:[#allocation15] sm:$0xff] }
 0x38e   : > { %v1062_v17 = vmax.f32 %v1054_v15, 0.0  ;;  %v1061_v18 = vmax.f32 %v1053_v16, 0.0  ;;  %2808 = vmatprep.subr.bf16.mxu1 %v2807_v14  ;;  %v1360_v15 = vld [vmem:[#allocation15 + $0x8] sm:$0xff] }
 0x38f   : > { %2810 = vmatpush3.bf16.msra.mxu1 %v2807_v14  ;;  %v2819_v16 = vpack.c.bf16 %v1360_v15, %v1359_v13 }
 0x390   : > { %1070 = vst [vmem:[%s3887_s15 + $0x38] sm:$0xff] %v1062_v17  ;;  %1069 = vst [vmem:[%s3887_s15 + $0x30] sm:$0xff] %v1061_v18  ;;  %1661 = vrot.lane.b32.xlu1 %v1062_v17, %s3381_s14  ;;  %1659 = vrot.lane.b32.xlu0 %v1061_v18, %s3381_s14 }
 0x391   : > { %2632 = vmatprep.mubr.f32.mxu0 %v1061_v18  ;;  %2812 = vmatprep.subr.bf16.mxu1 %v2811_v25 }
 0x392   : > { %2633 = vmatmul.mubr.f32.gmra.mrb[14].mxu0 %v1062_v17 }
 0x393   : > { %2691 = vmatprep.mubr.msk.f32.mxu0 %vm804_vm1, %v3899_v31  ;;  %2814 = vmatpush3.bf16.msra.mxu1 %v2811_v25  ;;  %v1361_v25 = vld [vmem:[#allocation15 + $0x10] sm:$0xff] }
 0x394   : > { %1810 = vrot.lane.b32.xlu1 %v1060_v61, %s3379_s17  ;;  %1808 = vrot.lane.b32.xlu0 %v1059_v62, %s3379_s17 }
 0x396   : > { %2692 = vmatmul.mubr.msk.f32.vlgmr.msra.gmra.mrb[16].mxu0 %vm804_vm1, %v3889_v20  ;;  %v1213_v20 = vld [vmem:[#allocation12 + $0x30] sm:$0xff] }
 0x397   : > { %2694 = vmatprep.mubr.msk.f32.mxu0 %vm804_vm1, %v3933_v46  ;;  %2846 = vmatpush3.bf16.msra.mxu0 %v3858_v10  ;;  %v2815_v27 = vpack.c.bf16 %v1214_v26, %v1213_v20  ;;  %v1362_v20 = vld [vmem:[#allocation15 + $0x18] sm:$0xff] }
 0x398   : > { %1963 = vrot.lane.b32.xlu1 %v1060_v61, %s3380_s19  ;;  %1961 = vrot.lane.b32.xlu0 %v1059_v62, %s3380_s19  ;;  %v2823_v26 = vpack.c.bf16 %v1362_v20, %v1361_v25 }
 0x399   : > { %2848 = vmatprep.subr.bf16.mxu0 %v3903_v32  ;;  %2816 = vmatprep.subr.bf16.mxu1 %v2815_v27 }
 0x39a   : > { %2695 = vmatmul.mubr.msk.f32.gmra.mrb[18].mxu0 %vm804_vm1, %v3931_v45  ;;  %2818 = vmatpush3.bf16.msra.mxu1 %v2815_v27 }
 0x39b   : > { %2697 = vmatprep.mubr.msk.f32.mxu0 %vm804_vm1, %v1059_v62  ;;  %2850 = vmatpush3.bf16.msra.mxu0 %v3903_v32 }
 0x39c   : > { %1814 = vrot.lane.b32.xlu1 %v1062_v17, %s3379_s17  ;;  %1812 = vrot.lane.b32.xlu0 %v1061_v18, %s3379_s17 }
 0x39d   : > { %2820 = vmatprep.subr.bf16.mxu1 %v2819_v16 }
 0x39e   : > { %2698 = vmatmul.mubr.msk.f32.gmra.mrb[20].mxu0 %vm804_vm1, %v1060_v61 }
 0x39f   : > { %2700 = vmatprep.mubr.msk.f32.mxu0 %vm804_vm1, %v1061_v18 }
 0x3a0   : > { %1967 = vrot.lane.b32.xlu1 %v1062_v17, %s3380_s19  ;;  %1965 = vrot.lane.b32.xlu0 %v1061_v18, %s3380_s19 }
 0x3a2   : > { %2701 = vmatmul.mubr.msk.f32.gmra.mrb[22].mxu0 %vm804_vm1, %v1062_v17 }
 0x3da   : > { %v4004_v28 = vpop.permute.xlu1 %1649 }
 0x3de   : > { %v1803_v30 = vpop.permute.xlu1 %1802 }
 0x3df   : > { %v4006_v29 = vpop.permute.xlu0 %1647 }
 0x3e2   : > { %v4010_v33 = vpop.permute.xlu1 %1955 }
 0x3e3   : > { %v1801_v31 = vpop.permute.xlu0 %1800 }
 0x3e4   : > { %2731 = vmatprep.mubr.msk.f32.mxu0 %vm804_vm1, %v1801_v31 }
 0x3e5   : > { %2732 = vmatmul.mubr.msk.f32.vlgmr.msra.gmra.mrb[24].mxu0 %vm804_vm1, %v1803_v30 }
 0x3e7   : > { %v4012_v34 = vpop.permute.xlu0 %1953 }
 0x3ea   : > { %v4014_v35 = vpop.permute.xlu1 %1653 }
 0x3eb   : > { %v4016_v36 = vpop.permute.xlu0 %1651 }
 0x3ee   : > { %v1807_v38 = vpop.permute.xlu1 %1806 }
 0x3ef   : > { %v1805_v37 = vpop.permute.xlu0 %1804 }
 0x3f0   : > { %2734 = vmatprep.mubr.msk.f32.mxu0 %vm804_vm1, %v1805_v37 }
 0x3f1   : > { %2735 = vmatmul.mubr.msk.f32.gmra.mrb[26].mxu0 %vm804_vm1, %v1807_v38 }
 0x3f2   : > { %v4020_v39 = vpop.permute.xlu1 %1959 }
 0x3f3   : > { %v4022_v40 = vpop.permute.xlu0 %1957 }
 0x3f6   : > { %v4024_v41 = vpop.permute.xlu1 %1657 }
 0x3f7   : > { %v4026_v42 = vpop.permute.xlu0 %1655 }
 0x402   : > { %v4028_v43 = vpop.permute.xlu1 %1661  ;;  %v4030_v44 = vpop.permute.xlu0 %1659 }
 0x406   : > { %v1811_v45 = vpop.permute.xlu1 %1810  ;;  %v1809_v46 = vpop.permute.xlu0 %1808 }
 0x407   : > { %2737 = vmatprep.mubr.msk.f32.mxu0 %vm804_vm1, %v1809_v46 }
 0x408   : > { %2738 = vmatmul.mubr.msk.f32.gmra.mrb[28].mxu0 %vm804_vm1, %v1811_v45 }
 0x40a   : > { %v4034_v47 = vpop.permute.xlu1 %1963  ;;  %v4036_v48 = vpop.permute.xlu0 %1961 }
 0x40e   : > { %v1815_v49 = vpop.permute.xlu1 %1814  ;;  %v1813_v50 = vpop.permute.xlu0 %1812 }
 0x40f   : > { %2740 = vmatprep.mubr.msk.f32.mxu0 %vm804_vm1, %v1813_v50  ;;  %v2383_v50 = vld [vmem:[#allocation13] ss:$0 sm:$0xff] }
 0x410   : > { %2741 = vmatmul.mubr.msk.f32.gmra.mrb[30].mxu0 %vm804_vm1, %v1815_v49 }
 0x441   : > { %v2625_v52 = vpop.f32.mrb[8].mxu0 }
 0x442   : > { %v1166_v53 = vadd.f32 %v2625_v52, %v2382_v51  ;;  %v1160_v54 = vpop.f32.mrb[9].mxu0 }
 0x443   : > { %v1161_v55 = vadd.f32 %v2382_v51, %v1160_v54 }
 0x444   : > { %v1200_v57 = vmax.f32 %v1166_v53, 0.0 }
 0x445   : > { %v1199_v56 = vmax.f32 %v1161_v55, 0.0 }
 0x447   : > { %2651 = vmatprep.mubr.msk.f32.mxu1 %vm1022_vm2, %v1199_v56 }
 0x448   : > { %2652 = vmatmul.mubr.msk.f32.vlgmr.msra.gmra.mrb[8].mxu1 %vm1022_vm2, %v1200_v57 }
 0x449   : > { %2822 = vmatpush3.bf16.msra.mxu1 %v2819_v16 }
 0x44a   : > { %2824 = vmatprep.subr.bf16.mxu1 %v2823_v26 }
 0x44c   : > { %v2628_v58 = vpop.f32.mrb[10].mxu0 }
 0x44d   : > { %v1176_v59 = vadd.f32 %v2628_v58, %v2382_v51  ;;  %v1170_v60 = vpop.f32.mrb[11].mxu0  ;;  %2826 = vmatpush3.bf16.msra.mxu1 %v2823_v26 }
 0x44e   : > { %v1171_v61 = vadd.f32 %v2382_v51, %v1170_v60  ;;  %2836 = vmatprep.subr.bf16.mxu1 %v3858_v10 }
 0x44f   : > { %v1202_v63 = vmax.f32 %v1176_v59, 0.0 }
 0x450   : > { %v1201_v62 = vmax.f32 %v1171_v61, 0.0 }
 0x452   : > { %2654 = vmatprep.mubr.msk.f32.mxu1 %vm1022_vm2, %v1201_v62 }
 0x453   : > { %2655 = vmatmul.mubr.msk.f32.gmra.mrb[10].mxu1 %vm1022_vm2, %v1202_v63 }
 0x458   : > { %v2631_v0 = vpop.f32.mrb[12].mxu0 }
 0x459   : > { %v1186_v1 = vadd.f32 %v2631_v0, %v2382_v51  ;;  %v1180_v2 = vpop.f32.mrb[13].mxu0 }
 0x45a   : > { %v1181_v3 = vadd.f32 %v2382_v51, %v1180_v2 }
 0x45b   : > { %v1204_v5 = vmax.f32 %v1186_v1, 0.0 }
 0x45c   : > { %v1203_v4 = vmax.f32 %v1181_v3, 0.0 }
 0x45e   : > { %2657 = vmatprep.mubr.msk.f32.mxu1 %vm1022_vm2, %v1203_v4 }
 0x45f   : > { %2658 = vmatmul.mubr.msk.f32.gmra.mrb[12].mxu1 %vm1022_vm2, %v1204_v5 }
 0x465   : > { %v2634_v8 = vpop.f32.mrb[14].mxu0 }
 0x466   : > { %v1196_v9 = vadd.f32 %v2634_v8, %v2382_v51  ;;  %v1190_v11 = vpop.f32.mrb[15].mxu0 }
 0x467   : > { %v1191_v12 = vadd.f32 %v2382_v51, %v1190_v11 }
 0x468   : > { %v1206_v6 = vmax.f32 %v1196_v9, 0.0 }
 0x469   : > { %v1205_v17 = vmax.f32 %v1191_v12, 0.0  ;;  %v4046_v18 = vpop.f32.mrb[16].mxu0 }
 0x46a   : > { %v4048_v7 = vpop.f32.mrb[17].mxu0 }
 0x46b   : > { %2660 = vmatprep.mubr.msk.f32.mxu1 %vm1022_vm2, %v1205_v17 }
 0x46c   : > { %2661 = vmatmul.mubr.msk.f32.gmra.mrb[14].mxu1 %vm1022_vm2, %v1206_v6 }
 0x46d   : > { %v4052_v19 = vpop.f32.mrb[18].mxu0 }
 0x46e   : > { %v4054_v21 = vpop.f32.mrb[19].mxu0 }
 0x471   : > { %v4056_v22 = vpop.f32.mrb[20].mxu0 }
 0x472   : > { %v4058_v14 = vpop.f32.mrb[21].mxu0 }
 0x475   : > { %v4060_v23 = vpop.f32.mrb[22].mxu0 }
 0x476   : > { %v4062_v24 = vpop.f32.mrb[23].mxu0 }
 0x4b8   : > { %v4065_v27 = vpop.f32.mrb[24].mxu0 }
 0x4b9   : > { %v4067_v30 = vpop.f32.mrb[25].mxu0 }
 0x4c4   : > { %v4069_v31 = vpop.f32.mrb[26].mxu0 }
 0x4c5   : > { %v4071_v37 = vpop.f32.mrb[27].mxu0 }
 0x4db   : > { %v4073_v38 = vpop.f32.mrb[28].mxu0 }
 0x4dc   : > { %v4075_v45 = vpop.f32.mrb[29].mxu0 }
 0x4e3   : > { %v4077_v46 = vpop.f32.mrb[30].mxu0 }
 0x4e4   : > { %v4079_v49 = vpop.f32.mrb[31].mxu0 }
 0x51b   : > { %v2653_v51 = vpop.f32.mrb[8].mxu1 }
 0x51c   : > { %v1318_v52 = vadd.f32 %v2653_v51, %v2383_v50  ;;  %v1312_v53 = vpop.f32.mrb[9].mxu1 }
 0x51d   : > { %v1313_v54 = vadd.f32 %v2383_v50, %v1312_v53 }
 0x51e   : > { %v1352_v56 = vmax.f32 %v1318_v52, 0.0 }
 0x51f   : > { %v1351_v55 = vmax.f32 %v1313_v54, 0.0 }
 0x521   : > { %2671 = vmatprep.mubr.msk.f32.mxu1 %vm804_vm1, %v1351_v55 }
 0x522   : > { %2672 = vmatmul.mubr.msk.f32.vlgmr.msra.gmra.mrb[16].mxu1 %vm804_vm1, %v1352_v56 }
 0x523   : > { %2838 = vmatpush3.bf16.msra.mxu1 %v3858_v10 }
 0x524   : > { %2840 = vmatprep.subr.bf16.mxu1 %v3903_v32 }
 0x526   : > { %v2656_v57 = vpop.f32.mrb[10].mxu1 }
 0x527   : > { %v1328_v58 = vadd.f32 %v2656_v57, %v2383_v50  ;;  %v1322_v59 = vpop.f32.mrb[11].mxu1  ;;  %2842 = vmatpush3.bf16.msra.mxu1 %v3903_v32 }
 0x528   : > { %v1323_v60 = vadd.f32 %v2383_v50, %v1322_v59  ;;  %2852 = vmatprep.subr.bf16.mxu1 %v3858_v10 }
 0x529   : > { %v1354_v62 = vmax.f32 %v1328_v58, 0.0 }
 0x52a   : > { %v1353_v61 = vmax.f32 %v1323_v60, 0.0 }
 0x52c   : > { %2674 = vmatprep.mubr.msk.f32.mxu1 %vm804_vm1, %v1353_v61 }
 0x52d   : > { %2675 = vmatmul.mubr.msk.f32.gmra.mrb[18].mxu1 %vm804_vm1, %v1354_v62 }
 0x532   : > { %v2659_v63 = vpop.f32.mrb[12].mxu1 }
 0x533   : > { %v1338_v0 = vadd.f32 %v2659_v63, %v2383_v50  ;;  %v1332_v1 = vpop.f32.mrb[13].mxu1 }
 0x534   : > { %v1333_v2 = vadd.f32 %v2383_v50, %v1332_v1 }
 0x535   : > { %v1356_v4 = vmax.f32 %v1338_v0, 0.0 }
 0x536   : > { %v1355_v3 = vmax.f32 %v1333_v2, 0.0 }
 0x538   : > { %2677 = vmatprep.mubr.msk.f32.mxu1 %vm804_vm1, %v1355_v3 }
 0x539   : > { %2678 = vmatmul.mubr.msk.f32.gmra.mrb[20].mxu1 %vm804_vm1, %v1356_v4 }
 0x53f   : > { %v2662_v5 = vpop.f32.mrb[14].mxu1 }
 0x540   : > { %v1348_v8 = vadd.f32 %v2662_v5, %v2383_v50  ;;  %v1342_v9 = vpop.f32.mrb[15].mxu1 }
 0x541   : > { %v1343_v11 = vadd.f32 %v2383_v50, %v1342_v9 }
 0x542   : > { %v1358_v13 = vmax.f32 %v1348_v8, 0.0 }
 0x543   : > { %v1357_v12 = vmax.f32 %v1343_v11, 0.0 }
 0x545   : > { %2680 = vmatprep.mubr.msk.f32.mxu1 %vm804_vm1, %v1357_v12 }
 0x546   : > { %2681 = vmatmul.mubr.msk.f32.gmra.mrb[22].mxu1 %vm804_vm1, %v1358_v13 }
 0x547   : > { %2711 = vmatprep.mubr.msk.f32.mxu1 %vm804_vm1, %v4006_v29 }
 0x54a   : > { %2712 = vmatmul.mubr.msk.f32.vlgmr.msra.gmra.mrb[24].mxu1 %vm804_vm1, %v4004_v28 }
 0x54b   : > { %2854 = vmatpush3.bf16.msra.mxu1 %v3858_v10  ;;  %2714 = vmatprep.mubr.msk.f32.mxu1 %vm804_vm1, %v4016_v36  ;;  %v1966_v10 = vpop.permute.xlu0 %1965 }
 0x54c   : > { %2856 = vmatprep.subr.bf16.mxu1 %v3903_v32 }
 0x54e   : > { %2715 = vmatmul.mubr.msk.f32.gmra.mrb[26].mxu1 %vm804_vm1, %v4014_v35 }
 0x54f   : > { %2717 = vmatprep.mubr.msk.f32.mxu1 %vm804_vm1, %v4026_v42  ;;  %2858 = vmatpush3.bf16.msra.mxu1 %v3903_v32  ;;  %v1968_v32 = vpop.permute.xlu1 %1967 }
 0x552   : > { %2718 = vmatmul.mubr.msk.f32.gmra.mrb[28].mxu1 %vm804_vm1, %v4024_v41 }
 0x553   : > { %2720 = vmatprep.mubr.msk.f32.mxu1 %vm804_vm1, %v4030_v44 }
 0x556   : > { %2721 = vmatmul.mubr.msk.f32.gmra.mrb[30].mxu1 %vm804_vm1, %v4028_v43 }
 0x557   : > { %2751 = vmatprep.mubr.msk.f32.mxu1 %vm804_vm1, %v4012_v34 }
 0x55a   : > { %2752 = vmatmul.mubr.msk.f32.vlgmr.msra.gmra.mrb[32].mxu1 %vm804_vm1, %v4010_v33 }
 0x55b   : > { %2754 = vmatprep.mubr.msk.f32.mxu1 %vm804_vm1, %v4022_v40 }
 0x55e   : > { %2755 = vmatmul.mubr.msk.f32.gmra.mrb[34].mxu1 %vm804_vm1, %v4020_v39  ;;  %v4138_v39 = vld [vmem:[#allocation19] ss:$0 sm:$0xff] }
 0x55f   : > { %2757 = vmatprep.mubr.msk.f32.mxu1 %vm804_vm1, %v4036_v48  ;;  %v1606_v42 = vadd.f32 %v4046_v18, %v4138_v39  ;;  %v1601_v43 = vadd.f32 %v4138_v39, %v4048_v7  ;;  %v1899_v16 = vadd.f32 %v4138_v39, %v4067_v30  ;;  %v1616_v25 = vadd.f32 %v4052_v19, %v4138_v39 }
 0x560   : > { %v1611_v7 = vadd.f32 %v4138_v39, %v4054_v21  ;;  %v1914_v51 = vadd.f32 %v4069_v31, %v4138_v39  ;;  %v1909_v55 = vadd.f32 %v4138_v39, %v4071_v37  ;;  %v1626_v21 = vadd.f32 %v4056_v22, %v4138_v39 }
 0x561   : > { %v1640_v6 = vmax.f32 %v1606_v42, 0.0  ;;  %v1639_v20 = vmax.f32 %v1601_v43, 0.0  ;;  %v1937_v54 = vmax.f32 %v1899_v16, 0.0  ;;  %v1642_v57 = vmax.f32 %v1616_v25, 0.0 }
 0x562   : > { %2758 = vmatmul.mubr.msk.f32.gmra.mrb[36].mxu1 %vm804_vm1, %v4034_v47  ;;  %v1904_v47 = vadd.f32 %v4065_v27, %v4138_v39  ;;  %v1641_v60 = vmax.f32 %v1611_v7, 0.0  ;;  %v1621_v31 = vadd.f32 %v4138_v39, %v4058_v14  ;;  %v1940_v0 = vmax.f32 %v1914_v51, 0.0 }
 0x563   : > { %2760 = vmatprep.mubr.msk.f32.mxu1 %vm804_vm1, %v1966_v10  ;;  %v1924_v37 = vadd.f32 %v4073_v38, %v4138_v39  ;;  %v1939_v4 = vmax.f32 %v1909_v55, 0.0  ;;  %v1919_v22 = vadd.f32 %v4138_v39, %v4075_v45  ;;  %v1644_v9 = vmax.f32 %v1626_v21, 0.0 }
 0x564   : > { %v1938_v27 = vmax.f32 %v1904_v47, 0.0  ;;  %v1636_v14 = vadd.f32 %v4060_v23, %v4138_v39  ;;  %v1643_v13 = vmax.f32 %v1621_v31, 0.0  ;;  %v1631_v38 = vadd.f32 %v4138_v39, %v4062_v24 }
 0x565   : > { %v1942_v43 = vmax.f32 %v1924_v37, 0.0  ;;  %v1934_v45 = vadd.f32 %v4077_v46, %v4138_v39  ;;  %v1929_v23 = vadd.f32 %v4138_v39, %v4079_v49 }
 0x566   : > { %2761 = vmatmul.mubr.msk.f32.gmra.mrb[38].mxu1 %vm804_vm1, %v1968_v32 }
 0x5f5   : > { %v4126_v28 = vpop.f32.mrb[16].mxu1 }
 0x5f6   : > { %v4128_v29 = vpop.f32.mrb[17].mxu1 }
 0x600   : > { %v4130_v33 = vpop.f32.mrb[18].mxu1 }
 0x601   : > { %v4132_v34 = vpop.f32.mrb[19].mxu1 }
 0x60c   : > { %v4134_v35 = vpop.f32.mrb[20].mxu1 }
 0x60d   : > { %v4136_v36 = vpop.f32.mrb[21].mxu1 }
 0x619   : > { %v4140_v40 = vpop.f32.mrb[22].mxu1 }
 0x61a   : > { %v4142_v41 = vpop.f32.mrb[23].mxu1 }
 0x61d   : > { %v2713_v44 = vpop.f32.mrb[24].mxu1 }
 0x61e   : > { %v1751_v48 = vadd.f32 %v2713_v44, %v4138_v39  ;;  %v1745_v15 = vpop.f32.mrb[25].mxu1 }
 0x61f   : > { %v1746_v17 = vadd.f32 %v4138_v39, %v1745_v15  ;;  %v1941_v15 = vmax.f32 %v1919_v22, 0.0 }
 0x620   : > { %v1785_v18 = vmax.f32 %v1751_v48, 0.0 }
 0x621   : > { %v1784_v26 = vmax.f32 %v1746_v17, 0.0  ;;  %v2716_v50 = vpop.f32.mrb[26].mxu1 }
 0x622   : > { %v1793_v52 = vmax.f32 %v1640_v6, %v1785_v18  ;;  %v1761_v30 = vadd.f32 %v2716_v50, %v4138_v39  ;;  %v1755_v53 = vpop.f32.mrb[27].mxu1  ;;  %v1646_v6 = vmax.f32 %v1636_v14, 0.0  ;;  %v1645_v18 = vmax.f32 %v1631_v38, 0.0 }
 0x623   : > { %v1792_v19 = vmax.f32 %v1639_v20, %v1784_v26  ;;  %v1756_v56 = vadd.f32 %v4138_v39, %v1755_v53  ;;  %v1944_v50 = vmax.f32 %v1934_v45, 0.0 }
 0x624   : > { %v1787_v58 = vmax.f32 %v1761_v30, 0.0  ;;  %v1946_v59 = vmax.f32 %v1793_v52, %v1938_v27  ;;  %v1943_v52 = vmax.f32 %v1929_v23, 0.0  ;;  %v2392_v30 = vld [vmem:[#allocation16] ss:$0 sm:$0xff] }
 0x625   : > { %v1786_v61 = vmax.f32 %v1756_v56, 0.0  ;;  %v2719_v62 = vpop.f32.mrb[28].mxu1  ;;  %v1945_v63 = vmax.f32 %v1792_v19, %v1937_v54  ;;  %v1466_v21 = vadd.f32 %v4126_v28, %v2392_v30  ;;  %v1491_v23 = vadd.f32 %v2392_v30, %v4142_v41 }
 0x626   : > { %v1795_v1 = vmax.f32 %v1642_v57, %v1787_v58  ;;  %v1771_v2 = vadd.f32 %v2719_v62, %v4138_v39  ;;  %v1765_v3 = vpop.f32.mrb[29].mxu1 }
 0x627   : > { %v1794_v5 = vmax.f32 %v1641_v60, %v1786_v61  ;;  %v1766_v8 = vadd.f32 %v4138_v39, %v1765_v3  ;;  %v1461_v61 = vadd.f32 %v2392_v30, %v4128_v29  ;;  %v1476_v3 = vadd.f32 %v4130_v33, %v2392_v30 }
 0x628   : > { %v1789_v11 = vmax.f32 %v1771_v2, 0.0  ;;  %v1948_v12 = vmax.f32 %v1795_v1, %v1940_v0  ;;  %v1486_v33 = vadd.f32 %v4134_v35, %v2392_v30  ;;  %v1496_v35 = vadd.f32 %v4140_v40, %v2392_v30 }
 0x629   : > { %v1788_v10 = vmax.f32 %v1766_v8, 0.0  ;;  %v2722_v32 = vpop.f32.mrb[30].mxu1  ;;  %v1947_v42 = vmax.f32 %v1794_v5, %v1939_v4  ;;  %v1471_v8 = vadd.f32 %v2392_v30, %v4132_v34  ;;  %v1481_v34 = vadd.f32 %v2392_v30, %v4136_v36 }
 0x62a   : > { %v1797_v44 = vmax.f32 %v1644_v9, %v1789_v11  ;;  %v1781_v47 = vadd.f32 %v2722_v32, %v4138_v39  ;;  %v1775_v48 = vpop.f32.mrb[31].mxu1 }
 0x62b   : > { %v1796_v16 = vmax.f32 %v1643_v13, %v1788_v10  ;;  %v1776_v17 = vadd.f32 %v4138_v39, %v1775_v48 }
 0x62c   : > { %v1791_v24 = vmax.f32 %v1781_v47, 0.0  ;;  %v1950_v25 = vmax.f32 %v1797_v44, %v1942_v43 }
 0x62d   : > { %v1790_v20 = vmax.f32 %v1776_v17, 0.0  ;;  %v2753_v7 = vpop.f32.mrb[32].mxu1  ;;  %v1949_v26 = vmax.f32 %v1796_v16, %v1941_v15 }
 0x62e   : > { %v1799_v46 = vmax.f32 %v1646_v6, %v1791_v24  ;;  %v2057_v27 = vadd.f32 %v2753_v7, %v4138_v39  ;;  %v2051_v51 = vpop.f32.mrb[33].mxu1 }
 0x62f   : > { %v1798_v53 = vmax.f32 %v1645_v18, %v1790_v20  ;;  %v2052_v49 = vadd.f32 %v4138_v39, %v2051_v51 }
 0x630   : > { %v2091_v54 = vmax.f32 %v2057_v27, 0.0  ;;  %v1952_v55 = vmax.f32 %v1799_v46, %v1944_v50 }
 0x631   : > { %v2090_v19 = vmax.f32 %v2052_v49, 0.0  ;;  %v2756_v56 = vpop.f32.mrb[34].mxu1  ;;  %v1951_v57 = vmax.f32 %v1798_v53, %v1943_v52 }
 0x632   : > { %v2099_v58 = vmax.f32 %v1946_v59, %v2091_v54  ;;  %v2067_v60 = vadd.f32 %v2756_v56, %v4138_v39  ;;  %v2061_v31 = vpop.f32.mrb[35].mxu1 }
 0x633   : > { %v2098_v62 = vmax.f32 %v1945_v63, %v2090_v19  ;;  %v2062_v0 = vadd.f32 %v4138_v39, %v2061_v31 }
 0x634   : > { %v2107_v37 = vadd.f32 %v2099_v58, %v1466_v21  ;;  %v2093_v1 = vmax.f32 %v2067_v60, 0.0 }
 0x635   : > { %v2106_v2 = vadd.f32 %v2098_v62, %v1461_v61  ;;  %v2092_v28 = vmax.f32 %v2062_v0, 0.0  ;;  %v2759_v59 = vpop.f32.mrb[36].mxu1 }
 0x636   : > { %2115 = vst [vmem:[%s4192_s20 + $0x8] sm:$0xff] %v2107_v37  ;;  %v2101_v4 = vmax.f32 %v1948_v12, %v2093_v1  ;;  %v2077_v22 = vadd.f32 %v2759_v59, %v4138_v39  ;;  %v2071_v5 = vpop.f32.mrb[37].mxu1 }
 0x637   : > { %2114 = vst [vmem:[%s4192_s20] sm:$0xff] %v2106_v2  ;;  %v2100_v29 = vmax.f32 %v1947_v42, %v2092_v28  ;;  %v2072_v63 = vadd.f32 %v4138_v39, %v2071_v5 }
 0x638   : > { %v2109_v9 = vadd.f32 %v2101_v4, %v1476_v3  ;;  %v2095_v14 = vmax.f32 %v2077_v22, 0.0 }
 0x639   : > { %v2108_v11 = vadd.f32 %v2100_v29, %v1471_v8  ;;  %v2094_v13 = vmax.f32 %v2072_v63, 0.0  ;;  %v2762_v38 = vpop.f32.mrb[38].mxu1 }
 0x63a   : > { %2117 = vst [vmem:[%s4192_s20 + $0x18] sm:$0xff] %v2109_v9  ;;  %v2103_v12 = vmax.f32 %v1950_v25, %v2095_v14  ;;  %v2087_v10 = vadd.f32 %v2762_v38, %v4138_v39  ;;  %v2081_v32 = vpop.f32.mrb[39].mxu1 }
 0x63b   : > { %2116 = vst [vmem:[%s4192_s20 + $0x10] sm:$0xff] %v2108_v11  ;;  %v2102_v42 = vmax.f32 %v1949_v26, %v2094_v13  ;;  %v2082_v43 = vadd.f32 %v4138_v39, %v2081_v32 }
 0x63c   : > { %v2111_v45 = vadd.f32 %v2103_v12, %v1486_v33  ;;  %v2097_v44 = vmax.f32 %v2087_v10, 0.0 }
 0x63d   : > { %v2110_v47 = vadd.f32 %v2102_v42, %v1481_v34  ;;  %v2096_v48 = vmax.f32 %v2082_v43, 0.0 }
 0x63e   : > { %2119 = vst [vmem:[%s4192_s20 + $0x28] sm:$0xff] %v2111_v45  ;;  %v2105_v15 = vmax.f32 %v1952_v55, %v2097_v44 }
 0x63f   : > { %2118 = vst [vmem:[%s4192_s20 + $0x20] sm:$0xff] %v2110_v47  ;;  %v2104_v16 = vmax.f32 %v1951_v57, %v2096_v48 }
 0x640   : > { %v2113_v17 = vadd.f32 %v2105_v15, %v1496_v35 }
 0x641   : > { %v2112_v36 = vadd.f32 %v2104_v16, %v1491_v23 }
 0x642   : > { %2121 = vst [vmem:[%s4192_s20 + $0x38] sm:$0xff] %v2113_v17 }
 0x643   : > { %2120 = vst [vmem:[%s4192_s20 + $0x30] sm:$0xff] %v2112_v36 }
 0x644 PF: > { %s32_s29 = sadd.s32 1, %s3363_s29  }
 0x645   : > { %p29_p7 = scmp.ge.s32.totalorder %s32_s29, 6  }
 0x647   :  { %31 = sbr.rel (!%p29_p7) target bundleno = 11 (0xb), region = 163 }
 0x64e   :  { %2161 = vsyncpa [#allocation3], 1 }
 0x64f   :  { %2163 = vsyncpa [#allocation3 + $0x1], 1 }
 0x650   :  { %2164 = vsyncpa [#allocation5], 1 }
 0x651   :  { %2165 = vsyncpa [#allocation8], 1 }
 0x652   :  { %2166 = vsyncpa [#allocation11], 1 }
 0x653   :  { %2167 = vsyncpa [#allocation14], 1 }
 0x654   :  { %2168 = vsyncpa [#allocation17], 1 }
 0x655   :  { %2169 = vsyncpa [#allocation20], 1 }

// kernel: _lambda_.4
= control target key start
LH: loop header
LB: loop body
LE: loop exit
PB: predicated region body
PF: predicated region fallthrough
CT: control target
= control target key end

     0   :  { %s6117_s0 = inlined_call_operand.vmem [shape: f32[2,128,128], index: 0, kind: input, shape index: {}]   ;;  %s6118_s1 = inlined_call_operand.hbm [shape: f32[4,32], index: 1, kind: input, shape index: {}]   ;;  %s6119_s2 = inlined_call_operand.hbm [shape: f32[8,32], index: 2, kind: input, shape index: {}]   ;;  %s6120_s3 = inlined_call_operand.hbm [shape: f32[32,32], index: 3, kind: input, shape index: {}]   ;;  %s6121_s4 = inlined_call_operand.hbm [shape: f32[1,32], index: 4, kind: input, shape index: {}]   ;;  %s6122_s5 = inlined_call_operand.hbm [shape: f32[32,32], index: 5, kind: input, shape index: {}]   ;;  %s6123_s6 = inlined_call_operand.hbm [shape: f32[1,32], index: 6, kind: input, shape index: {}]   ;;  %s6124_s7 = inlined_call_operand.hbm [shape: f32[32,32], index: 7, kind: input, shape index: {}]   ;;  %s6125_s8 = inlined_call_operand.hbm [shape: f32[1,32], index: 8, kind: input, shape index: {}]   ;;  %s6126_s9 = inlined_call_operand.hbm [shape: f32[32,96], index: 9, kind: input, shape index: {}]   ;;  %s6127_s10 = inlined_call_operand.hbm [shape: f32[32,96], index: 10, kind: input, shape index: {}]   ;;  %s6128_s11 = inlined_call_operand.hbm [shape: f32[1,96], index: 11, kind: input, shape index: {}]   ;;  %s6129_s12 = inlined_call_operand.hbm [shape: f32[1,96], index: 12, kind: input, shape index: {}]   ;;  %s6130_s13 = inlined_call_operand.hbm [shape: f32[32,32], index: 13, kind: input, shape index: {}]   ;;  %s6131_s14 = inlined_call_operand.hbm [shape: f32[1,32], index: 14, kind: input, shape index: {}]   ;;  %s6132_s15 = inlined_call_operand.hbm [shape: f32[32,32], index: 15, kind: input, shape index: {}]   ;;  %s6133_s16 = inlined_call_operand.hbm [shape: f32[1,32], index: 16, kind: input, shape index: {}]   ;;  %s6134_s17 = inlined_call_operand.vmem [shape: f32[2,4,128], index: 17, kind: output, shape index: {0}]   ;;  %s6135_s18 = inlined_call_operand.vmem [shape: f32[2,4,128], index: 18, kind: output, shape index: {1}]  }
   0x1   :  { %6147 = sst [smem:[#allocation38_spill]] %s6117_s0 }
   0x2   :  { %6148 = sst [smem:[#allocation39_spill]] %s6118_s1 }
   0x3   :  { %6149 = sst [smem:[#allocation40_spill]] %s6119_s2 }
   0x4   :  { %6150 = sst [smem:[#allocation41_spill]] %s6120_s3 }
   0x5   :  { %6151 = sst [smem:[#allocation42_spill]] %s6121_s4 }
   0x6   :  { %6152 = sst [smem:[#allocation43_spill]] %s6123_s6 }
   0x7   :  { %6153 = sst [smem:[#allocation44_spill]] %s6134_s17 }
   0x8   :  { %6154 = sst [smem:[#allocation45_spill]] %s6135_s18 }
   0x9   :  { %24 = vsyncpa [#allocation3], 0 }
   0xa   :  { %25 = vsyncpa [#allocation5], 0 }
   0xb   :  { %26 = vsyncpa [#allocation8], 0 }
   0xc   :  { %27 = vsyncpa [#allocation11], 0 }
   0xd   :  { %28 = vsyncpa [#allocation14], 0 }
   0xe   :  { %29 = vsyncpa [#allocation17], 0 }
   0xf   :  { %30 = vsyncpa [#allocation20], 0 }
  0x10   :  { %31 = vsyncpa [#allocation23], 0 }
  0x11   :  { %32 = vsyncpa [#allocation26], 0  ;;  %s5005_s27 = smov 0  }
  0x12 LB: > { %6155 = sst [smem:[#allocation36_spill]] %s4884_s27  ;;  %s4886_s28 = smov [#allocation4]   ;;  %s4884_s27 = sphi %s5005_s27, %s38_s27  }
  0x13   : > { %s481_s29 = sshll.u32 %s4886_s28, 4  ;;  %s5011_s30 = sadd.s32 4294967295, %s4884_s27   ;;  %s5016_s29 = int_to_ptr.vmem [resolvable:$true] %s481_s29 }
  0x14   : > { %6156 = sst [smem:[#allocation37_spill]] %s5011_s30  ;;  %p3233_p0 = scmp.ge.s32.totalorder %s4884_s27, 1 }
  0x15   : > { %p457_p1 = scmp.lt.s32.totalorder %s4884_s27, 3  ;;  %p6141_p2 = scmp.eq.s32.totalorder %s5011_s30, 0 }
  0x16   : > { %s4887_s19 = smov [#allocation7]   ;;  %s4888_s20 = smov [#allocation10]  }
  0x17   : > { %p5018_p3 = pnand %p3233_p0, %p457_p1  ;;  %s505_s1 = sshll.u32 %s4887_s19, 4  ;;  %s5024_s1 = int_to_ptr.vmem [resolvable:$true] %s505_s1 }
  0x18   : > { %s529_s21 = sshll.u32 %s4888_s20, 4  ;;  %s4889_s2 = smov [#allocation13]   ;;  %s5032_s21 = int_to_ptr.vmem [resolvable:$true] %s529_s21 }
  0x19   : > { %s6157_s0 = scalar_select %p5018_p3, 1, 0 }
  0x1a   : > { %p4208_p4 = pneg %p5018_p3  ;;  %s553_s23 = sshll.u32 %s4889_s2, 4  ;;  %s5034_s23 = int_to_ptr.vmem [resolvable:$true] %s553_s23 }
  0x1b   : > { %s6159_s26 = sld [smem:[#allocation40_spill]] }
  0x1c   : > { %p5028_p5 = pnand %p6141_p2, %p4208_p4 }
  0x1e   : > { %p5044_p7 = pneg %p5028_p5 }
  0x21   : > { %s4394_s28 = scalar_lea.hbm %s6159_s26, 128 }
  0x22   : > { %p4395_p6 = scmp.ne.s32.totalorder %s6159_s26, %s4394_s28  ;;  %p4401_p10 = scmp.lt.u32.totalorder %s4394_s28, %s6159_s26 }
  0x24   : > { %p4397_p8 = pnand %p5044_p7, %p4395_p6 }
  0x26   : > { %p4398_p9 = pneg %p4397_p8 }
  0x28   : > { %p4403_p11 = pnand %p4401_p10, %p4398_p9 }
  0x2a   : > { %4406 = shalt.err (!%p4403_p11)
}
  0x2b   : > { %s4407_s27 = scalar_lea.vmem %s5016_s29, 128  ;;  %p4415_p1 = scmp.lt.s32.totalorder %s5016_s29, %s5016_s29 }
  0x2c   : > { %p4408_p12 = scmp.ne.s32.totalorder %s5016_s29, %s4407_s27  ;;  %p4416_p4 = scmp.lt.s32.totalorder %s4407_s27, %s4407_s27 }
  0x2e   : > { %p4410_p13 = pnand %p4408_p12, %p5044_p7  ;;  %p4417_p6 = por %p4416_p4, %p4415_p1 }
  0x30   : > { %p4411_p0 = pneg %p4410_p13 }
  0x32   : > { %p4418_p8 = pnand %p4417_p6, %p4411_p0 }
  0x34   : > { %4421 = shalt.err (!%p4418_p8)
}
  0x35   : > { %4214 = dma.hbm_to_vmem [thread:$0]  (!%p5028_p5), %s6159_s26, 128, %s5016_s29, [#allocation5]  }
  0x36   : > { %s6161_s4 = sld [smem:[#allocation42_spill]] }
  0x3c   : > { %s4422_s19 = scalar_lea.hbm %s6161_s4, 16 }
  0x3d   : > { %p4423_p9 = scmp.ne.s32.totalorder %s6161_s4, %s4422_s19  ;;  %p4429_p12 = scmp.lt.u32.totalorder %s4422_s19, %s6161_s4 }
  0x3f   : > { %p4425_p10 = pnand %p4423_p9, %p5044_p7 }
  0x41   : > { %p4426_p11 = pneg %p4425_p10 }
  0x43   : > { %p4431_p13 = pnand %p4429_p12, %p4426_p11 }
  0x45   : > { %4434 = shalt.err (!%p4431_p13)
}
  0x46   : > { %s4435_s29 = scalar_lea.vmem %s5024_s1, 16  ;;  %s4442_s17 = scalar_lea.vmem %s5024_s1, 32 }
  0x47   : > { %p4436_p0 = scmp.ne.s32.totalorder %s5024_s1, %s4435_s29  ;;  %p4443_p6 = scmp.lt.s32.totalorder %s5024_s1, %s5024_s1 }
  0x48   : > { %p4444_p8 = scmp.lt.s32.totalorder %s4442_s17, %s4435_s29 }
  0x49   : > { %p4438_p1 = pnand %p4436_p0, %p5044_p7 }
  0x4a   : > { %p4445_p9 = por %p4444_p8, %p4443_p6 }
  0x4b   : > { %p4439_p4 = pneg %p4438_p1 }
  0x4d   : > { %p4446_p10 = pnand %p4445_p9, %p4439_p4 }
  0x4f   : > { %4449 = shalt.err (!%p4446_p10)
}
  0x50   : > { %4220 = dma.hbm_to_vmem [thread:$0]  (!%p5028_p5), %s6161_s4, 16, %s5024_s1, [#allocation8]  }
  0x51   : > { %s6162_s6 = sld [smem:[#allocation43_spill]] }
  0x57   : > { %s4450_s28 = scalar_lea.hbm %s6162_s6, 16 }
  0x58   : > { %p4451_p11 = scmp.ne.s32.totalorder %s6162_s6, %s4450_s28  ;;  %p4457_p0 = scmp.lt.u32.totalorder %s4450_s28, %s6162_s6 }
  0x5a   : > { %p4453_p12 = pnand %p4451_p11, %p5044_p7 }
  0x5c   : > { %p4454_p13 = pneg %p4453_p12 }
  0x5e   : > { %p4459_p1 = pnand %p4457_p0, %p4454_p13 }
  0x60   : > { %4462 = shalt.err (!%p4459_p1)
}
  0x61   : > { %s4463_s1 = scalar_lea.vmem %s5032_s21, 16  ;;  %s4470_s17 = scalar_lea.vmem %s5032_s21, 32 }
  0x62   : > { %p4464_p4 = scmp.ne.s32.totalorder %s5032_s21, %s4463_s1  ;;  %p4471_p9 = scmp.lt.s32.totalorder %s5032_s21, %s5032_s21 }
  0x63   : > { %p4472_p10 = scmp.lt.s32.totalorder %s4470_s17, %s4463_s1 }
  0x64   : > { %p4466_p6 = pnand %p4464_p4, %p5044_p7 }
  0x65   : > { %p4473_p11 = por %p4472_p10, %p4471_p9 }
  0x66   : > { %p4467_p8 = pneg %p4466_p6 }
  0x68   : > { %p4474_p12 = pnand %p4473_p11, %p4467_p8 }
  0x6a   : > { %4477 = shalt.err (!%p4474_p12)
}
  0x6b   : > { %4226 = dma.hbm_to_vmem [thread:$0]  (!%p5028_p5), %s6162_s6, 16, %s5032_s21, [#allocation11]  }
  0x6c   : > { %s4478_s28 = scalar_lea.hbm %s6125_s8, 16 }
  0x6d   : > { %p4479_p13 = scmp.ne.s32.totalorder %s6125_s8, %s4478_s28  ;;  %p4485_p4 = scmp.lt.u32.totalorder %s4478_s28, %s6125_s8 }
  0x6f   : > { %p4481_p0 = pnand %p4479_p13, %p5044_p7 }
  0x71   : > { %p4482_p1 = pneg %p4481_p0 }
  0x73   : > { %p4487_p6 = pnand %p4485_p4, %p4482_p1 }
  0x75   : > { %4490 = shalt.err (!%p4487_p6)
}
  0x76   : > { %s4491_s21 = scalar_lea.vmem %s5034_s23, 16  ;;  %s4498_s1 = scalar_lea.vmem %s5034_s23, 32 }
  0x77   : > { %p4492_p8 = scmp.ne.s32.totalorder %s5034_s23, %s4491_s21  ;;  %p4499_p11 = scmp.lt.s32.totalorder %s5034_s23, %s5034_s23 }
  0x78   : > { %p4500_p12 = scmp.lt.s32.totalorder %s4498_s1, %s4491_s21 }
  0x79   : > { %p4494_p9 = pnand %p4492_p8, %p5044_p7 }
  0x7a   : > { %p4501_p13 = por %p4500_p12, %p4499_p11 }
  0x7b   : > { %p4495_p10 = pneg %p4494_p9 }
  0x7d   : > { %p4502_p0 = pnand %p4501_p13, %p4495_p10 }
  0x7f   : > { %4505 = shalt.err (!%p4502_p0)
}
  0x80   : > { %4232 = dma.hbm_to_vmem [thread:$0]  (!%p5028_p5), %s6125_s8, 16, %s5034_s23, [#allocation14]  }
  0x81   : > { %s4890_s18 = smov [#allocation16]   ;;  %s4891_s25 = smov [#allocation19]  }
  0x82   : > { %s576_s24 = sshll.u32 %s4890_s18, 4  ;;  %s601_s28 = sshll.u32 %s4891_s25, 4  ;;  %s577_s24 = int_to_ptr.vmem [resolvable:$true] %s576_s24  ;;  %s602_s28 = int_to_ptr.vmem [resolvable:$true] %s601_s28 }
  0x83   : > { %s4506_s27 = scalar_lea.hbm %s6127_s10, 512 }
  0x84   : > { %p4507_p1 = scmp.ne.s32.totalorder %s6127_s10, %s4506_s27  ;;  %p4513_p8 = scmp.lt.u32.totalorder %s4506_s27, %s6127_s10 }
  0x86   : > { %p4509_p4 = pnand %p4507_p1, %p5044_p7 }
  0x88   : > { %p4510_p6 = pneg %p4509_p4 }
  0x8a   : > { %p4515_p9 = pnand %p4513_p8, %p4510_p6 }
  0x8c   : > { %4518 = shalt.err (!%p4515_p9)
}
  0x8d   : > { %s4519_s23 = scalar_lea.vmem %s577_s24, 512  ;;  %p4527_p13 = scmp.lt.s32.totalorder %s577_s24, %s577_s24 }
  0x8e   : > { %p4520_p10 = scmp.ne.s32.totalorder %s577_s24, %s4519_s23  ;;  %p4528_p0 = scmp.lt.s32.totalorder %s4519_s23, %s4519_s23 }
  0x90   : > { %p4522_p11 = pnand %p4520_p10, %p5044_p7  ;;  %p4529_p2 = por %p4528_p0, %p4527_p13 }
  0x92   : > { %p4523_p12 = pneg %p4522_p11 }
  0x94   : > { %p4530_p3 = pnand %p4529_p2, %p4523_p12 }
  0x96   : > { %4533 = shalt.err (!%p4530_p3)
}
  0x97   : > { %s6143_s30 = smov 128   ;;  %s6145_s18 = smov 8  }
  0x98   : > { %4238 = dma.hbm_to_vmem [thread:$0]  (!%p5028_p5), %s6127_s10, 512, %s577_s24, [#allocation17], %s6143_s30, %s6143_s30, %s6145_s18  }
  0x99   : > { %s4534_s29 = scalar_lea.hbm %s6129_s12, 16 }
  0x9a   : > { %p4535_p2 = scmp.ne.s32.totalorder %s6129_s12, %s4534_s29  ;;  %p4541_p4 = scmp.lt.u32.totalorder %s4534_s29, %s6129_s12 }
  0x9c   : > { %p4537_p3 = pnand %p4535_p2, %p5044_p7 }
  0x9e   : > { %p4538_p1 = pneg %p4537_p3 }
  0xa0   : > { %p4543_p6 = pnand %p4541_p4, %p4538_p1 }
  0xa2   : > { %4546 = shalt.err (!%p4543_p6)
}
  0xa3   : > { %s4547_s25 = scalar_lea.vmem %s602_s28, 16  ;;  %s4554_s24 = scalar_lea.vmem %s602_s28, 32 }
  0xa4   : > { %p4548_p8 = scmp.ne.s32.totalorder %s602_s28, %s4547_s25  ;;  %p4555_p11 = scmp.lt.s32.totalorder %s602_s28, %s602_s28 }
  0xa5   : > { %p4556_p12 = scmp.lt.s32.totalorder %s4554_s24, %s4547_s25 }
  0xa6   : > { %p4550_p9 = pnand %p4548_p8, %p5044_p7 }
  0xa7   : > { %p4557_p13 = por %p4556_p12, %p4555_p11 }
  0xa8   : > { %p4551_p10 = pneg %p4550_p9 }
  0xaa   : > { %p4558_p0 = pnand %p4557_p13, %p4551_p10 }
  0xac   : > { %4561 = shalt.err (!%p4558_p0)
}
  0xad   : > { %4244 = dma.hbm_to_vmem [thread:$0]  (!%p5028_p5), %s6129_s12, 16, %s602_s28, [#allocation20]  }
  0xae   : > { %s4894_s27 = smov [#allocation22]   ;;  %s4895_s21 = smov [#allocation2]  }
  0xaf   : > { %s625_s29 = sshll.u32 %s4894_s27, 4  ;;  %s470_s1 = sshll.u32 %s4895_s21, 4  ;;  %s626_s29 = int_to_ptr.vmem [resolvable:$true] %s625_s29  ;;  %s471_s1 = int_to_ptr.vmem [resolvable:$true] %s470_s1 }
  0xb0   : > { %s4562_s30 = scalar_lea.hbm %s6131_s14, 16 }
  0xb1   : > { %p4563_p2 = scmp.ne.s32.totalorder %s6131_s14, %s4562_s30  ;;  %p4569_p4 = scmp.lt.u32.totalorder %s4562_s30, %s6131_s14 }
  0xb3   : > { %p4565_p3 = pnand %p4563_p2, %p5044_p7 }
  0xb5   : > { %p4566_p1 = pneg %p4565_p3 }
  0xb7   : > { %p4571_p6 = pnand %p4569_p4, %p4566_p1 }
  0xb9   : > { %4574 = shalt.err (!%p4571_p6)
}
  0xba   : > { %s4575_s28 = scalar_lea.vmem %s626_s29, 16  ;;  %s4582_s2 = scalar_lea.vmem %s626_s29, 32 }
  0xbb   : > { %p4576_p8 = scmp.ne.s32.totalorder %s626_s29, %s4575_s28  ;;  %p4583_p11 = scmp.lt.s32.totalorder %s626_s29, %s626_s29 }
  0xbc   : > { %p4584_p12 = scmp.lt.s32.totalorder %s4582_s2, %s4575_s28 }
  0xbd   : > { %p4578_p9 = pnand %p4576_p8, %p5044_p7 }
  0xbe   : > { %p4585_p13 = por %p4584_p12, %p4583_p11 }
  0xbf   : > { %p4579_p10 = pneg %p4578_p9 }
  0xc1   : > { %p4586_p0 = pnand %p4585_p13, %p4579_p10 }
  0xc3   : > { %4589 = shalt.err (!%p4586_p0)
}
  0xc4   : > { %4250 = dma.hbm_to_vmem [thread:$0]  (!%p5028_p5), %s6131_s14, 16, %s626_s29, [#allocation23]  }
  0xc5   : > { %s6163_s17 = sld [smem:[#allocation39_spill]] }
  0xcb   : > { %s4590_s23 = scalar_lea.hbm %s6163_s17, 64 }
  0xcc   : > { %p4591_p2 = scmp.ne.s32.totalorder %s6163_s17, %s4590_s23  ;;  %p4597_p4 = scmp.lt.u32.totalorder %s4590_s23, %s6163_s17 }
  0xce   : > { %p4593_p3 = pnand %p4591_p2, %p5044_p7 }
  0xd0   : > { %p4594_p1 = pneg %p4593_p3 }
  0xd2   : > { %p4599_p6 = pnand %p4597_p4, %p4594_p1 }
  0xd4   : > { %4602 = shalt.err (!%p4599_p6)
}
  0xd5   : > { %s4603_s2 = scalar_lea.vmem %s471_s1, 64  ;;  %p4611_p11 = scmp.lt.s32.totalorder %s471_s1, %s471_s1 }
  0xd6   : > { %p4604_p8 = scmp.ne.s32.totalorder %s471_s1, %s4603_s2  ;;  %p4612_p12 = scmp.lt.s32.totalorder %s4603_s2, %s4603_s2 }
  0xd8   : > { %p4606_p9 = pnand %p4604_p8, %p5044_p7  ;;  %p4613_p13 = por %p4612_p12, %p4611_p11 }
  0xda   : > { %p4607_p10 = pneg %p4606_p9 }
  0xdc   : > { %p4614_p0 = pnand %p4613_p13, %p4607_p10 }
  0xde   : > { %4617 = shalt.err (!%p4614_p0)
}
  0xdf   : > { %4211 = dma.hbm_to_vmem [thread:$0]  (!%p5028_p5), %s6163_s17, 64, %s471_s1, [#allocation3]  }
  0xe0   : > { %s4896_s21 = smov [#allocation6]   ;;  %s4897_s18 = smov [#allocation9]  }
  0xe1   : > { %s491_s30 = sshll.u32 %s4896_s21, 4  ;;  %s515_s23 = sshll.u32 %s4897_s18, 4  ;;  %s492_s30 = int_to_ptr.vmem [resolvable:$true] %s491_s30  ;;  %s516_s23 = int_to_ptr.vmem [resolvable:$true] %s515_s23 }
  0xe2   : > { %s6164_s3 = sld [smem:[#allocation41_spill]] }
  0xe8   : > { %s4618_s19 = scalar_lea.hbm %s6164_s3, 512 }
  0xe9   : > { %p4619_p2 = scmp.ne.s32.totalorder %s6164_s3, %s4618_s19  ;;  %p4625_p4 = scmp.lt.u32.totalorder %s4618_s19, %s6164_s3 }
  0xeb   : > { %p4621_p3 = pnand %p4619_p2, %p5044_p7 }
  0xed   : > { %p4622_p1 = pneg %p4621_p3 }
  0xef   : > { %p4627_p6 = pnand %p4625_p4, %p4622_p1 }
  0xf1   : > { %4630 = shalt.err (!%p4627_p6)
}
  0xf2   : > { %s4631_s1 = scalar_lea.vmem %s492_s30, 512  ;;  %p4639_p11 = scmp.lt.s32.totalorder %s492_s30, %s492_s30 }
  0xf3   : > { %p4632_p8 = scmp.ne.s32.totalorder %s492_s30, %s4631_s1  ;;  %p4640_p12 = scmp.lt.s32.totalorder %s4631_s1, %s4631_s1 }
  0xf5   : > { %p4634_p9 = pnand %p4632_p8, %p5044_p7  ;;  %p4641_p13 = por %p4640_p12, %p4639_p11 }
  0xf7   : > { %p4635_p10 = pneg %p4634_p9 }
  0xf9   : > { %p4642_p0 = pnand %p4641_p13, %p4635_p10 }
  0xfb   : > { %4645 = shalt.err (!%p4642_p0)
}
  0xfc   : > { %s6165_s27 = smov 8   ;;  %s6166_s21 = smov 128  }
  0xfd   : > { %4217 = dma.hbm_to_vmem [thread:$0]  (!%p5028_p5), %s6164_s3, 512, %s492_s30, [#allocation5], %s6166_s21, %s6166_s21, %s6165_s27  }
  0xfe   : > { %s4646_s19 = scalar_lea.hbm %s6122_s5, 512 }
  0xff   : > { %p4647_p2 = scmp.ne.s32.totalorder %s6122_s5, %s4646_s19  ;;  %p4653_p4 = scmp.lt.u32.totalorder %s4646_s19, %s6122_s5 }
 0x101   : > { %p4649_p3 = pnand %p4647_p2, %p5044_p7 }
 0x103   : > { %p4650_p1 = pneg %p4649_p3 }
 0x105   : > { %p4655_p6 = pnand %p4653_p4, %p4650_p1 }
 0x107   : > { %4658 = shalt.err (!%p4655_p6)
}
 0x108   : > { %s4659_s4 = scalar_lea.vmem %s516_s23, 512  ;;  %p4667_p11 = scmp.lt.s32.totalorder %s516_s23, %s516_s23 }
 0x109   : > { %p4660_p8 = scmp.ne.s32.totalorder %s516_s23, %s4659_s4  ;;  %p4668_p12 = scmp.lt.s32.totalorder %s4659_s4, %s4659_s4 }
 0x10b   : > { %p4662_p9 = pnand %p4660_p8, %p5044_p7  ;;  %p4669_p13 = por %p4668_p12, %p4667_p11 }
 0x10d   : > { %p4663_p10 = pneg %p4662_p9 }
 0x10f   : > { %p4670_p0 = pnand %p4669_p13, %p4663_p10 }
 0x111   : > { %4673 = shalt.err (!%p4670_p0)
}
 0x112   : > { %4223 = dma.hbm_to_vmem [thread:$0]  (!%p5028_p5), %s6122_s5, 512, %s516_s23, [#allocation8], %s6166_s21, %s6166_s21, %s6165_s27  }
 0x113   : > { %s4898_s25 = smov [#allocation12]   ;;  %s4899_s19 = smov [#allocation15]  }
 0x114   : > { %s539_s24 = sshll.u32 %s4898_s25, 4  ;;  %s563_s28 = sshll.u32 %s4899_s19, 4  ;;  %s540_s24 = int_to_ptr.vmem [resolvable:$true] %s539_s24  ;;  %s564_s28 = int_to_ptr.vmem [resolvable:$true] %s563_s28 }
 0x115   : > { %s4674_s1 = scalar_lea.hbm %s6124_s7, 512 }
 0x116   : > { %p4675_p2 = scmp.ne.s32.totalorder %s6124_s7, %s4674_s1  ;;  %p4681_p4 = scmp.lt.u32.totalorder %s4674_s1, %s6124_s7 }
 0x118   : > { %p4677_p3 = pnand %p4675_p2, %p5044_p7 }
 0x11a   : > { %p4678_p1 = pneg %p4677_p3 }
 0x11c   : > { %p4683_p6 = pnand %p4681_p4, %p4678_p1 }
 0x11e   : > { %4686 = shalt.err (!%p4683_p6)
}
 0x11f   : > { %s4687_s23 = scalar_lea.vmem %s540_s24, 512  ;;  %p4695_p11 = scmp.lt.s32.totalorder %s540_s24, %s540_s24 }
 0x120   : > { %p4688_p8 = scmp.ne.s32.totalorder %s540_s24, %s4687_s23  ;;  %p4696_p12 = scmp.lt.s32.totalorder %s4687_s23, %s4687_s23 }
 0x122   : > { %p4690_p9 = pnand %p4688_p8, %p5044_p7  ;;  %p4697_p13 = por %p4696_p12, %p4695_p11 }
 0x124   : > { %p4691_p10 = pneg %p4690_p9 }
 0x126   : > { %p4698_p0 = pnand %p4697_p13, %p4691_p10 }
 0x128   : > { %4701 = shalt.err (!%p4698_p0)
}
 0x129   : > { %4229 = dma.hbm_to_vmem [thread:$0]  (!%p5028_p5), %s6124_s7, 512, %s540_s24, [#allocation11], %s6166_s21, %s6166_s21, %s6165_s27  }
 0x12a   : > { %s4702_s19 = scalar_lea.hbm %s6126_s9, 512 }
 0x12b   : > { %p4703_p2 = scmp.ne.s32.totalorder %s6126_s9, %s4702_s19  ;;  %p4709_p4 = scmp.lt.u32.totalorder %s4702_s19, %s6126_s9 }
 0x12d   : > { %p4705_p3 = pnand %p4703_p2, %p5044_p7 }
 0x12f   : > { %p4706_p1 = pneg %p4705_p3 }
 0x131   : > { %p4711_p6 = pnand %p4709_p4, %p4706_p1 }
 0x133   : > { %4714 = shalt.err (!%p4711_p6)
}
 0x134   : > { %s4715_s30 = scalar_lea.vmem %s564_s28, 512  ;;  %p4723_p11 = scmp.lt.s32.totalorder %s564_s28, %s564_s28 }
 0x135   : > { %p4716_p8 = scmp.ne.s32.totalorder %s564_s28, %s4715_s30  ;;  %p4724_p12 = scmp.lt.s32.totalorder %s4715_s30, %s4715_s30 }
 0x137   : > { %p4718_p9 = pnand %p4716_p8, %p5044_p7  ;;  %p4725_p13 = por %p4724_p12, %p4723_p11 }
 0x139   : > { %p4719_p10 = pneg %p4718_p9 }
 0x13b   : > { %p4726_p0 = pnand %p4725_p13, %p4719_p10 }
 0x13d   : > { %4729 = shalt.err (!%p4726_p0)
}
 0x13e   : > { %4235 = dma.hbm_to_vmem [thread:$0]  (!%p5028_p5), %s6126_s9, 512, %s564_s28, [#allocation14], %s6166_s21, %s6166_s21, %s6165_s27  }
 0x13f   : > { %s4900_s3 = smov [#allocation18]   ;;  %s4901_s18 = smov [#allocation21]  }
 0x140   : > { %s590_s6 = sshll.u32 %s4900_s3, 4  ;;  %s611_s25 = sshll.u32 %s4901_s18, 4  ;;  %s591_s6 = int_to_ptr.vmem [resolvable:$true] %s590_s6  ;;  %s612_s25 = int_to_ptr.vmem [resolvable:$true] %s611_s25 }
 0x141   : > { %s4730_s29 = scalar_lea.hbm %s6128_s11, 16 }
 0x142   : > { %p4731_p2 = scmp.ne.s32.totalorder %s6128_s11, %s4730_s29  ;;  %p4737_p4 = scmp.lt.u32.totalorder %s4730_s29, %s6128_s11 }
 0x144   : > { %p4733_p3 = pnand %p4731_p2, %p5044_p7 }
 0x146   : > { %p4734_p1 = pneg %p4733_p3 }
 0x148   : > { %p4739_p6 = pnand %p4737_p4, %p4734_p1 }
 0x14a   : > { %4742 = shalt.err (!%p4739_p6)
}
 0x14b   : > { %s4743_s28 = scalar_lea.vmem %s591_s6, 16  ;;  %s4750_s23 = scalar_lea.vmem %s591_s6, 32 }
 0x14c   : > { %p4744_p8 = scmp.ne.s32.totalorder %s591_s6, %s4743_s28  ;;  %p4751_p11 = scmp.lt.s32.totalorder %s591_s6, %s591_s6 }
 0x14d   : > { %p4752_p12 = scmp.lt.s32.totalorder %s4750_s23, %s4743_s28 }
 0x14e   : > { %p4746_p9 = pnand %p4744_p8, %p5044_p7 }
 0x14f   : > { %p4753_p13 = por %p4752_p12, %p4751_p11 }
 0x150   : > { %p4747_p10 = pneg %p4746_p9 }
 0x152   : > { %p4754_p0 = pnand %p4753_p13, %p4747_p10 }
 0x154   : > { %4757 = shalt.err (!%p4754_p0)
}
 0x155   : > { %4241 = dma.hbm_to_vmem [thread:$0]  (!%p5028_p5), %s6128_s11, 16, %s591_s6, [#allocation17]  }
 0x156   : > { %s4758_s29 = scalar_lea.hbm %s6130_s13, 512 }
 0x157   : > { %p4759_p2 = scmp.ne.s32.totalorder %s6130_s13, %s4758_s29  ;;  %p4765_p4 = scmp.lt.u32.totalorder %s4758_s29, %s6130_s13 }
 0x159   : > { %p4761_p3 = pnand %p4759_p2, %p5044_p7 }
 0x15b   : > { %p4762_p1 = pneg %p4761_p3 }
 0x15d   : > { %p4767_p6 = pnand %p4765_p4, %p4762_p1 }
 0x15f   : > { %4770 = shalt.err (!%p4767_p6)
}
 0x160   : > { %s4771_s28 = scalar_lea.vmem %s612_s25, 512  ;;  %p4779_p11 = scmp.lt.s32.totalorder %s612_s25, %s612_s25 }
 0x161   : > { %p4772_p8 = scmp.ne.s32.totalorder %s612_s25, %s4771_s28  ;;  %p4780_p12 = scmp.lt.s32.totalorder %s4771_s28, %s4771_s28 }
 0x163   : > { %p4774_p9 = pnand %p4772_p8, %p5044_p7  ;;  %p4781_p13 = por %p4780_p12, %p4779_p11 }
 0x165   : > { %p4775_p10 = pneg %p4774_p9 }
 0x167   : > { %p4782_p0 = pnand %p4781_p13, %p4775_p10 }
 0x169   : > { %4785 = shalt.err (!%p4782_p0)
}
 0x16a   : > { %4247 = dma.hbm_to_vmem [thread:$0]  (!%p5028_p5), %s6130_s13, 512, %s612_s25, [#allocation20], %s6166_s21, %s6166_s21, %s6165_s27  }
 0x16b   : > { %s4902_s3 = smov [#allocation24]   ;;  %s4903_s19 = smov [#allocation25]  }
 0x16c   : > { %s635_s18 = sshll.u32 %s4902_s3, 4  ;;  %s649_s2 = sshll.u32 %s4903_s19, 4  ;;  %s636_s18 = int_to_ptr.vmem [resolvable:$true] %s635_s18  ;;  %s650_s2 = int_to_ptr.vmem [resolvable:$true] %s649_s2 }
 0x16d   : > { %s4786_s4 = scalar_lea.hbm %s6132_s15, 512 }
 0x16e   : > { %p4787_p2 = scmp.ne.s32.totalorder %s6132_s15, %s4786_s4  ;;  %p4793_p4 = scmp.lt.u32.totalorder %s4786_s4, %s6132_s15 }
 0x170   : > { %p4789_p3 = pnand %p4787_p2, %p5044_p7 }
 0x172   : > { %p4790_p1 = pneg %p4789_p3 }
 0x174   : > { %p4795_p6 = pnand %p4793_p4, %p4790_p1 }
 0x176   : > { %4798 = shalt.err (!%p4795_p6)
}
 0x177   : > { %s4799_s25 = scalar_lea.vmem %s636_s18, 512  ;;  %p4807_p11 = scmp.lt.s32.totalorder %s636_s18, %s636_s18 }
 0x178   : > { %p4800_p8 = scmp.ne.s32.totalorder %s636_s18, %s4799_s25  ;;  %p4808_p12 = scmp.lt.s32.totalorder %s4799_s25, %s4799_s25 }
 0x17a   : > { %p4802_p9 = pnand %p4800_p8, %p5044_p7  ;;  %p4809_p13 = por %p4808_p12, %p4807_p11 }
 0x17c   : > { %p4803_p10 = pneg %p4802_p9 }
 0x17e   : > { %p4810_p0 = pnand %p4809_p13, %p4803_p10 }
 0x180   : > { %4813 = shalt.err (!%p4810_p0)
}
 0x181   : > { %4253 = dma.hbm_to_vmem [thread:$0]  (!%p5028_p5), %s6132_s15, 512, %s636_s18, [#allocation23], %s6166_s21, %s6166_s21, %s6165_s27  }
 0x182   : > { %s4814_s1 = scalar_lea.hbm %s6133_s16, 16 }
 0x183   : > { %p4815_p2 = scmp.ne.s32.totalorder %s6133_s16, %s4814_s1  ;;  %p4821_p4 = scmp.lt.u32.totalorder %s4814_s1, %s6133_s16 }
 0x185   : > { %p4817_p3 = pnand %p4815_p2, %p5044_p7 }
 0x187   : > { %p4818_p1 = pneg %p4817_p3 }
 0x189   : > { %p4823_p6 = pnand %p4821_p4, %p4818_p1 }
 0x18b   : > { %4826 = shalt.err (!%p4823_p6)
}
 0x18c   : > { %s4827_s6 = scalar_lea.vmem %s650_s2, 16  ;;  %s4834_s27 = scalar_lea.vmem %s650_s2, 32 }
 0x18d   : > { %p4828_p8 = scmp.ne.s32.totalorder %s650_s2, %s4827_s6  ;;  %p4835_p11 = scmp.lt.s32.totalorder %s650_s2, %s650_s2 }
 0x18e   : > { %p4836_p12 = scmp.lt.s32.totalorder %s4834_s27, %s4827_s6 }
 0x18f   : > { %p4830_p9 = pnand %p4828_p8, %p5044_p7 }
 0x190   : > { %p4837_p13 = por %p4836_p12, %p4835_p11 }
 0x191   : > { %p4831_p10 = pneg %p4830_p9 }
 0x193   : > { %p4838_p0 = pnand %p4837_p13, %p4831_p10 }
 0x195   : > { %4841 = shalt.err (!%p4838_p0)
}
 0x196   : > { %4256 = dma.hbm_to_vmem [thread:$0]  (!%p5028_p5), %s6133_s16, 16, %s650_s2, [#allocation26]  }
 0x197   : > { %p6167_p2 = scmp.ne.s32.totalorder %s6157_s0, 0 }
 0x198   : > { %s6168_s25 = sld [smem:[#allocation37_spill]] (!%p6167_p2) }
 0x199   : > { %670 = sbr.rel (%p6167_p2) target bundleno = 7985 (0x1f31), region = 88 }
 0x19e   : > { %p6169_p3 = scmp.eq.s32.totalorder (!%p6167_p2), %s6168_s25, 0 }
 0x1a0   : > { %4847 = dma.done.wait (%p6169_p3), [#allocation3], 64   ;;  %p6170_p7 = pmov %p6169_p3 }
 0x1a1   : > { %p6171_p1 = pmov %p6169_p3 }
 0x1a2   : > { %4849 = vsyncadd (%p6170_p7), [#allocation3], 4294967232 }
 0x1a3   : > { %4851 = dma.done.wait (%p6171_p1), [#allocation5], 640   ;;  %p6172_p4 = pmov %p6171_p1 }
 0x1a4   : > { %p6173_p6 = pmov %p6171_p1 }
 0x1a5   : > { %4853 = vsyncadd (%p6172_p4), [#allocation5], 4294966656 }
 0x1a6   : > { %4855 = dma.done.wait (%p6173_p6), [#allocation8], 528   ;;  %p6174_p5 = pmov %p6171_p1 }
 0x1a7   : > { %p6175_p8 = pmov %p6171_p1 }
 0x1a8   : > { %4857 = vsyncadd (%p6174_p5), [#allocation8], 4294966768 }
 0x1a9   : > { %4859 = dma.done.wait (%p6175_p8), [#allocation11], 528   ;;  %p6176_p9 = pmov %p6171_p1 }
 0x1aa   : > { %p6177_p10 = pmov %p6171_p1 }
 0x1ab   : > { %4861 = vsyncadd (%p6176_p9), [#allocation11], 4294966768 }
 0x1ac   : > { %4863 = dma.done.wait (%p6177_p10), [#allocation14], 528   ;;  %p6178_p11 = pmov %p6171_p1 }
 0x1ad   : > { %p6179_p12 = pmov %p6171_p1 }
 0x1ae   : > { %4865 = vsyncadd (%p6178_p11), [#allocation14], 4294966768 }
 0x1af   : > { %4867 = dma.done.wait (%p6179_p12), [#allocation17], 528   ;;  %p6180_p13 = pmov %p6171_p1 }
 0x1b0   : > { %p6181_p0 = pmov %p6171_p1 }
 0x1b1   : > { %4869 = vsyncadd (%p6180_p13), [#allocation17], 4294966768 }
 0x1b2   : > { %4871 = dma.done.wait (%p6181_p0), [#allocation20], 528   ;;  %p6182_p2 = pmov %p6181_p0 }
 0x1b3   : > { %p6183_p3 = pmov %p6181_p0 }
 0x1b4   : > { %4873 = vsyncadd (%p6182_p2), [#allocation20], 4294966768 }
 0x1b5   : > { %4875 = dma.done.wait (%p6183_p3), [#allocation23], 528   ;;  %p6184_p7 = pmov %p6181_p0 }
 0x1b6   : > { %p6185_p1 = pmov %p6181_p0 }
 0x1b7   : > { %4877 = vsyncadd (%p6184_p7), [#allocation23], 4294966768 }
 0x1b8   : > { %4879 = dma.done.wait (%p6185_p1), [#allocation26], 16   ;;  %p6186_p4 = pmov %p6181_p0 }
 0x1b9   : > { %p787_p6 = scmp.lt.s32.totalorder %s6168_s25, 1  ;;  %s6187_s2 = sld [smem:[#allocation38_spill]]  ;;  %vm817_vm0 = vcmask 261120   ;;  %v5490_v32 = vld [vmem:[#allocation2] sm:$0xf]  ;;  %vm1428_vm1 = vcmask 257024  }
 0x1ba   : > { %4881 = vsyncadd (%p6186_p4), [#allocation26], 4294967280  ;;  %v1429_v33 = vsel %vm1428_vm1, %v5490_v32, 0.0  ;;  %vm4905_vm2 = vmmov 0   ;;  %vm1658_vm4 = vcmask 1043456   ;;  %s4907_s3 = smov 64  }
 0x1bb   : > { %s6194_s25 = smov (!%p787_p6, %s6168_s25), 1  ;;  %vm5746_vm3 = vmpackc.low %vm817_vm0, %vm817_vm0  ;;  %s4908_s19 = smov 96  }
 0x1bc   : > { %s3377_s0 = sshll.u32 %s6194_s25, 7  ;;  %s4909_s29 = smov 32  }
 0x1bd   : > { %s3270_s1 = sshll.u32 %s6194_s25, 2  ;;  %s6190_s24 = sld [smem:[#allocation44_spill]] }
 0x1be   : > { %s6191_s21 = sld [smem:[#allocation45_spill]] }
 0x1bf   : > { %s5420_s23 = scalar_lea.vmem %s6187_s2, %s3377_s0 }
 0x1c0   : > { %v801_v0 = vld [vmem:[%s5420_s23] sm:$0xff]  ;;  %v803_v1 = vld [vmem:[%s5420_s23 + $0x10] sm:$0xff]  ;;  %v802_v2 = vld [vmem:[%s5420_s23 + $0x8] sm:$0xff] }
 0x1c1   : > { %v818_v3 = vsel %vm817_vm0, %v801_v0, 0.0  ;;  %v824_v4 = vsel %vm817_vm0, %v803_v1, 0.0  ;;  %v804_v5 = vld [vmem:[%s5420_s23 + $0x18] sm:$0xff]  ;;  %v821_v6 = vsel %vm817_vm0, %v802_v2, 0.0  ;;  %v5431_v8 = vld [vmem:[%s5420_s23 + $0x20] sm:$0xff]  ;;  %v5434_v9 = vld [vmem:[%s5420_s23 + $0x28] sm:$0xff] }
 0x1c2   : > { %819 = vadd.xlane.f32.xlu0 %v818_v3  ;;  %825 = vadd.xlane.f32.xlu1 %v824_v4  ;;  %v827_v7 = vsel %vm817_vm0, %v804_v5, 0.0  ;;  %v830_v10 = vsel %vm817_vm0, %v5431_v8, 0.0  ;;  %v833_v11 = vsel %vm817_vm0, %v5434_v9, 0.0  ;;  %v5441_v12 = vld [vmem:[%s5420_s23 + $0x30] sm:$0xff]  ;;  %v5444_v13 = vld [vmem:[%s5420_s23 + $0x38] sm:$0xff]  ;;  %v5451_v16 = vld [vmem:[%s5420_s23 + $0x40] sm:$0xff] }
 0x1c3   : > { %v836_v14 = vsel %vm817_vm0, %v5441_v12, 0.0  ;;  %v839_v15 = vsel %vm817_vm0, %v5444_v13, 0.0  ;;  %v5454_v17 = vld [vmem:[%s5420_s23 + $0x48] sm:$0xff]  ;;  %v842_v18 = vsel %vm817_vm0, %v5451_v16, 0.0  ;;  %v5461_v20 = vld [vmem:[%s5420_s23 + $0x50] sm:$0xff]  ;;  %v5464_v21 = vld [vmem:[%s5420_s23 + $0x58] sm:$0xff]  ;;  %s795_s28 = scalar_lea.vmem %s6190_s24, %s3270_s1 }
 0x1c4   : > { %v845_v19 = vsel %vm817_vm0, %v5454_v17, 0.0  ;;  %v848_v22 = vsel %vm817_vm0, %v5461_v20, 0.0  ;;  %v851_v23 = vsel %vm817_vm0, %v5464_v21, 0.0  ;;  %v5471_v24 = vld [vmem:[%s5420_s23 + $0x60] sm:$0xff]  ;;  %v5474_v25 = vld [vmem:[%s5420_s23 + $0x68] sm:$0xff]  ;;  %v5481_v28 = vld [vmem:[%s5420_s23 + $0x70] sm:$0xff]  ;;  %s799_s18 = scalar_lea.vmem %s6191_s21, %s3270_s1 }
 0x1c5   : > { %v854_v26 = vsel %vm817_vm0, %v5471_v24, 0.0  ;;  %v857_v27 = vsel %vm817_vm0, %v5474_v25, 0.0  ;;  %v5484_v29 = vld [vmem:[%s5420_s23 + $0x78] sm:$0xff]  ;;  %v860_v30 = vsel %vm817_vm0, %v5481_v28, 0.0 }
 0x1c6   : > { %822 = vadd.xlane.f32.xlu0 %v821_v6  ;;  %828 = vadd.xlane.f32.xlu1 %v827_v7  ;;  %v863_v31 = vsel %vm817_vm0, %v5484_v29, 0.0 }
 0x1ca   : > { %831 = vadd.xlane.f32.xlu0 %v830_v10  ;;  %834 = vadd.xlane.f32.xlu1 %v833_v11 }
 0x1ce   : > { %837 = vadd.xlane.f32.xlu0 %v836_v14  ;;  %840 = vadd.xlane.f32.xlu1 %v839_v15 }
 0x1d2   : > { %843 = vadd.xlane.f32.xlu0 %v842_v18  ;;  %846 = vadd.xlane.f32.xlu1 %v845_v19 }
 0x1d6   : > { %849 = vadd.xlane.f32.xlu0 %v848_v22  ;;  %852 = vadd.xlane.f32.xlu1 %v851_v23 }
 0x1da   : > { %855 = vadd.xlane.f32.xlu0 %v854_v26  ;;  %858 = vadd.xlane.f32.xlu1 %v857_v27 }
 0x1de   : > { %861 = vadd.xlane.f32.xlu0 %v860_v30  ;;  %864 = vadd.xlane.f32.xlu1 %v863_v31 }
 0x1e2   : > { %1430 = vadd.xlane.f32.xlu0 %v1429_v33 }
 0x24f   : > { %v820_v34 = vpop.xlane.xlu0 %819  ;;  %v826_v35 = vpop.xlane.xlu1 %825 }
 0x250   : > { %v867_v36 = vmul.f32 0.03125, %v820_v34  ;;  %v869_v37 = vmul.f32 0.03125, %v826_v35 }
 0x252   : > { %v5494_v38 = vsub.f32 %v801_v0, %v867_v36  ;;  %v5496_v39 = vsub.f32 %v803_v1, %v869_v37 }
 0x253   : > { %v823_v40 = vpop.xlane.xlu0 %822  ;;  %v829_v41 = vpop.xlane.xlu1 %828 }
 0x254   : > { %v868_v42 = vmul.f32 0.03125, %v823_v40  ;;  %v870_v43 = vmul.f32 0.03125, %v829_v41  ;;  %v899_v44 = vmul.f32 %v5494_v38, %v5494_v38  ;;  %v901_v45 = vmul.f32 %v5496_v39, %v5496_v39 }
 0x256   : > { %v5502_v46 = vsub.f32 %v802_v2, %v868_v42  ;;  %v5504_v47 = vsub.f32 %v804_v5, %v870_v43  ;;  %v915_v48 = vsel %vm817_vm0, %v899_v44, 0.0  ;;  %v921_v51 = vsel %vm817_vm0, %v901_v45, 0.0 }
 0x257   : > { %916 = vadd.xlane.f32.xlu1 %v915_v48  ;;  %v832_v49 = vpop.xlane.xlu0 %831  ;;  %v835_v50 = vpop.xlane.xlu1 %834 }
 0x258   : > { %v871_v52 = vmul.f32 0.03125, %v832_v49  ;;  %v872_v53 = vmul.f32 0.03125, %v835_v50  ;;  %v900_v54 = vmul.f32 %v5502_v46, %v5502_v46  ;;  %v902_v55 = vmul.f32 %v5504_v47, %v5504_v47 }
 0x25a   : > { %v5513_v56 = vsub.f32 %v5431_v8, %v871_v52  ;;  %v5516_v57 = vsub.f32 %v5434_v9, %v872_v53  ;;  %v918_v58 = vsel %vm817_vm0, %v900_v54, 0.0  ;;  %v924_v61 = vsel %vm817_vm0, %v902_v55, 0.0 }
 0x25b   : > { %922 = vadd.xlane.f32.xlu1 %v921_v51  ;;  %919 = vadd.xlane.f32.xlu0 %v918_v58  ;;  %v838_v59 = vpop.xlane.xlu0 %837  ;;  %v841_v60 = vpop.xlane.xlu1 %840 }
 0x25c   : > { %v873_v62 = vmul.f32 0.03125, %v838_v59  ;;  %v874_v63 = vmul.f32 0.03125, %v841_v60  ;;  %v903_v0 = vmul.f32 %v5513_v56, %v5513_v56  ;;  %v904_v1 = vmul.f32 %v5516_v57, %v5516_v57 }
 0x25e   : > { %v5525_v2 = vsub.f32 %v5441_v12, %v873_v62  ;;  %v5528_v3 = vsub.f32 %v5444_v13, %v874_v63  ;;  %v927_v4 = vsel %vm817_vm0, %v903_v0, 0.0  ;;  %v930_v7 = vsel %vm817_vm0, %v904_v1, 0.0  ;;  %v1068_v62 = vld [vmem:[#allocation9 + $0x8] sm:$0xff]  ;;  %v1069_v1 = vld [vmem:[#allocation9 + $0x10] sm:$0xff] }
 0x25f   : > { %925 = vadd.xlane.f32.xlu0 %v924_v61  ;;  %928 = vadd.xlane.f32.xlu1 %v927_v4  ;;  %v844_v5 = vpop.xlane.xlu0 %843  ;;  %v847_v6 = vpop.xlane.xlu1 %846  ;;  %v1067_v61 = vld [vmem:[#allocation9] sm:$0xff]  ;;  %v1070_v4 = vld [vmem:[#allocation9 + $0x18] sm:$0xff] }
 0x260   : > { %v875_v8 = vmul.f32 0.03125, %v844_v5  ;;  %v876_v9 = vmul.f32 0.03125, %v847_v6  ;;  %v905_v10 = vmul.f32 %v5525_v2, %v5525_v2  ;;  %v906_v11 = vmul.f32 %v5528_v3, %v5528_v3  ;;  %v1452_v6 = vld [vmem:[#allocation6] sm:$0xff] }
 0x261   : > { %v3918_v63 = vpack.c.bf16 %v1068_v62, %v1067_v61  ;;  %v3922_v5 = vpack.c.bf16 %v1070_v4, %v1069_v1 }
 0x262   : > { %v5537_v12 = vsub.f32 %v5451_v16, %v875_v8  ;;  %v5540_v13 = vsub.f32 %v5454_v17, %v876_v9  ;;  %v933_v14 = vsel %vm817_vm0, %v905_v10, 0.0  ;;  %v936_v19 = vsel %vm817_vm0, %v906_v11, 0.0  ;;  %v1271_v10 = vld [vmem:[#allocation12] sm:$0xff]  ;;  %v1272_v11 = vld [vmem:[#allocation12 + $0x8] sm:$0xff] }
 0x263   : > { %931 = vadd.xlane.f32.xlu0 %v930_v7  ;;  %934 = vadd.xlane.f32.xlu1 %v933_v14  ;;  %v850_v15 = vpop.xlane.xlu0 %849  ;;  %v853_v18 = vpop.xlane.xlu1 %852  ;;  %v1453_v7 = vld [vmem:[#allocation6 + $0x8] sm:$0xff]  ;;  %v4904_v9 = vmov 0.0|0.0   ;;  %v5596_v14 = vpack.c.bf16 %v1272_v11, %v1271_v10 }
 0x264   : > { %v877_v22 = vmul.f32 0.03125, %v850_v15  ;;  %v878_v23 = vmul.f32 0.03125, %v853_v18  ;;  %v907_v26 = vmul.f32 %v5537_v12, %v5537_v12  ;;  %v908_v16 = vmul.f32 %v5540_v13, %v5540_v13  ;;  %3919 = vmatprep.subr.bf16.mxu1 %v3918_v63  ;;  %3934 = vmatprep.subr.bf16.mxu0 %v4904_v9  ;;  %v1454_v15 = vld [vmem:[#allocation6 + $0x10] sm:$0xff]  ;;  %v1455_v18 = vld [vmem:[#allocation6 + $0x18] sm:$0xff] }
 0x265   : > { %3921 = vmatpush3.bf16.msra.mxu1 %v3918_v63  ;;  %v5592_v8 = vpack.c.bf16 %v1453_v7, %v1452_v6 }
 0x266   : > { %v5549_v27 = vsub.f32 %v5461_v20, %v877_v22  ;;  %v5552_v17 = vsub.f32 %v5464_v21, %v878_v23  ;;  %v939_v30 = vsel %vm817_vm0, %v907_v26, 0.0  ;;  %v942_v34 = vsel %vm817_vm0, %v908_v16, 0.0  ;;  %3923 = vmatprep.subr.bf16.mxu1 %v3922_v5 }
 0x267   : > { %937 = vadd.xlane.f32.xlu0 %v936_v19  ;;  %940 = vadd.xlane.f32.xlu1 %v939_v30  ;;  %v856_v31 = vpop.xlane.xlu0 %855  ;;  %v859_v33 = vpop.xlane.xlu1 %858  ;;  %v5599_v19 = vpack.c.bf16 %v1455_v18, %v1454_v15  ;;  %v4906_v22 = vmov 0.0   ;;  %v1027_v16 = vlaneseq }
 0x268   : > { %v879_v35 = vmul.f32 0.03125, %v856_v31  ;;  %v880_v36 = vmul.f32 0.03125, %v859_v33  ;;  %v909_v37 = vmul.f32 %v5549_v27, %v5549_v27  ;;  %v910_v20 = vmul.f32 %v5552_v17, %v5552_v17  ;;  %3936 = vmatpush3.bf16.msra.mxu0 %v5592_v8  ;;  %3630 = vmatprep.mubr.msk.f32.mxu0 %vm4905_vm2, %v4906_v22 }
 0x269   : > { %3925 = vmatpush3.bf16.msra.mxu1 %v3922_v5  ;;  %3937 = vmatprep.subr.bf16.mxu0 %v4904_v9 }
 0x26a   : > { %v5561_v40 = vsub.f32 %v5471_v24, %v879_v35  ;;  %v5564_v21 = vsub.f32 %v5474_v25, %v880_v36  ;;  %v945_v41 = vsel %vm817_vm0, %v909_v37, 0.0  ;;  %v948_v44 = vsel %vm817_vm0, %v910_v20, 0.0  ;;  %3927 = vmatprep.subr.bf16.mxu1 %v5596_v14 }
 0x26b   : > { %943 = vadd.xlane.f32.xlu0 %v942_v34  ;;  %946 = vadd.xlane.f32.xlu1 %v945_v41  ;;  %v862_v42 = vpop.xlane.xlu0 %861  ;;  %v865_v43 = vpop.xlane.xlu1 %864  ;;  %v5606_v36 = vshrl.u32 %v1027_v16, 7 }
 0x26c   : > { %v881_v45 = vmul.f32 0.03125, %v862_v42  ;;  %v882_v48 = vmul.f32 0.03125, %v865_v43  ;;  %v911_v49 = vmul.f32 %v5561_v40, %v5561_v40  ;;  %v912_v24 = vmul.f32 %v5564_v21, %v5564_v21  ;;  %3939 = vmatpush3.bf16.msra.mxu0 %v5599_v19 }
 0x26d   : > { %3972 = vmatprep.subr.bf16.mxu0 %v4904_v9 }
 0x26e   : > { %v5573_v50 = vsub.f32 %v5481_v28, %v881_v45  ;;  %v5576_v25 = vsub.f32 %v5484_v29, %v882_v48  ;;  %v951_v51 = vsel %vm817_vm0, %v911_v49, 0.0  ;;  %v954_v54 = vsel %vm817_vm0, %v912_v24, 0.0  ;;  %v5609_v24 = vld [vmem:[#allocation4] sm:$0xff] }
 0x26f   : > { %949 = vadd.xlane.f32.xlu0 %v948_v44  ;;  %952 = vadd.xlane.f32.xlu1 %v951_v51  ;;  %v1431_v52 = vpop.xlane.xlu0 %1430  ;;  %v1029_v45 = vsub.s32 0, %v5606_v36 }
 0x270   : > { %v1432_v53 = vmul.f32 0.03125, %v1431_v52  ;;  %v913_v55 = vmul.f32 %v5573_v50, %v5573_v50  ;;  %v914_v58 = vmul.f32 %v5576_v25, %v5576_v25 }
 0x272   : > { %v5585_v28 = vsub.f32 %v5490_v32, %v1432_v53  ;;  %v957_v29 = vsel %vm817_vm0, %v913_v55, 0.0  ;;  %v960_v59 = vsel %vm817_vm0, %v914_v58, 0.0  ;;  %v1049_v53 = vsub.s32 1, %v5606_v36 }
 0x273   : > { %955 = vadd.xlane.f32.xlu0 %v954_v54  ;;  %958 = vadd.xlane.f32.xlu1 %v957_v29  ;;  %v5613_v58 = vrot.slane %v5609_v24, %v1029_v45 }
 0x274   : > { %v1434_v60 = vmul.f32 %v5585_v28, %v5585_v28 }
 0x276   : > { %v1435_v0 = vsel %vm1428_vm1, %v1434_v60, 0.0 }
 0x277   : > { %961 = vadd.xlane.f32.xlu0 %v960_v59  ;;  %1436 = vadd.xlane.f32.xlu1 %v1435_v0  ;;  %v5617_v0 = vrot.slane %v5609_v24, %v1049_v53 }
 0x2e4   : > { %v917_v23 = vpop.xlane.xlu1 %916 }
 0x2e5   : > { %v963_v26 = vmul.f32 0.03125, %v917_v23 }
 0x2e7   : > { %v979_v30 = vadd.f32 1e-05, %v963_v26 }
 0x2e8   : > { %v923_v31 = vpop.xlane.xlu1 %922  ;;  %v920_v33 = vpop.xlane.xlu0 %919 }
 0x2e9   : > { %4321 = vrsqrt.f32 %v979_v30  ;;  %v965_v34 = vmul.f32 0.03125, %v923_v31  ;;  %v964_v35 = vmul.f32 0.03125, %v920_v33  ;;  %v1273_v31 = vld [vmem:[#allocation12 + $0x10] sm:$0xff]  ;;  %v1274_v33 = vld [vmem:[#allocation12 + $0x18] sm:$0xff] }
 0x2ea   : > { %v3930_v45 = vpack.c.bf16 %v1274_v33, %v1273_v31 }
 0x2eb   : > { %v981_v37 = vadd.f32 1e-05, %v965_v34  ;;  %v980_v20 = vadd.f32 1e-05, %v964_v35 }
 0x2ec   : > { %v929_v41 = vpop.xlane.xlu1 %928  ;;  %v926_v42 = vpop.xlane.xlu0 %925 }
 0x2ed   : > { %4323 = vrsqrt.f32 %v981_v37  ;;  %v967_v43 = vmul.f32 0.03125, %v929_v41  ;;  %v966_v44 = vmul.f32 0.03125, %v926_v42 }
 0x2ee   : > { %4325 = vrsqrt.f32 %v980_v20 }
 0x2ef   : > { %v983_v48 = vadd.f32 1e-05, %v967_v43  ;;  %v982_v49 = vadd.f32 1e-05, %v966_v44 }
 0x2f0   : > { %v935_v51 = vpop.xlane.xlu1 %934  ;;  %v932_v52 = vpop.xlane.xlu0 %931 }
 0x2f1   : > { %4327 = vrsqrt.f32 %v983_v48  ;;  %v969_v54 = vmul.f32 0.03125, %v935_v51  ;;  %v968_v55 = vmul.f32 0.03125, %v932_v52 }
 0x2f2   : > { %4329 = vrsqrt.f32 %v982_v49 }
 0x2f3   : > { %v4322_v29 = vpop.eup %4321  ;;  %v985_v59 = vadd.f32 1e-05, %v969_v54  ;;  %v984_v60 = vadd.f32 1e-05, %v968_v55 }
 0x2f4   : > { %v941_v61 = vpop.xlane.xlu1 %940  ;;  %v938_v62 = vpop.xlane.xlu0 %937  ;;  %v1011_v63 = vmul.f32 %v4322_v29, %v5494_v38 }
 0x2f5   : > { %4331 = vrsqrt.f32 %v985_v59  ;;  %v971_v1 = vmul.f32 0.03125, %v941_v61  ;;  %v970_v4 = vmul.f32 0.03125, %v938_v62 }
 0x2f6   : > { %4333 = vrsqrt.f32 %v984_v60  ;;  %v1031_v5 = vmul.f32 %v5613_v58, %v1011_v63 }
 0x2f7   : > { %v4324_v6 = vpop.eup %4323  ;;  %v987_v7 = vadd.f32 1e-05, %v971_v1  ;;  %v986_v10 = vadd.f32 1e-05, %v970_v4 }
 0x2f8   : > { %v4326_v11 = vpop.eup %4325  ;;  %v947_v15 = vpop.xlane.xlu1 %946  ;;  %v5621_v23 = vadd.f32 %v5617_v0, %v1031_v5  ;;  %v1013_v38 = vmul.f32 %v4324_v6, %v5496_v39 }
 0x2f9   : > { %v944_v18 = vpop.xlane.xlu0 %943  ;;  %4335 = vrsqrt.f32 %v987_v7  ;;  %v973_v26 = vmul.f32 0.03125, %v947_v15  ;;  %v1012_v30 = vmul.f32 %v4326_v11, %v5502_v46 }
 0x2fa   : > { %v972_v16 = vmul.f32 0.03125, %v944_v18  ;;  %4337 = vrsqrt.f32 %v986_v10  ;;  %3566 = vmatprep.mubr.msk.f32.mxu1 %vm817_vm0, %v5621_v23  ;;  %v1033_v34 = vmul.f32 %v5613_v58, %v1013_v38 }
 0x2fb   : > { %v4328_v35 = vpop.eup %4327  ;;  %v989_v37 = vadd.f32 1e-05, %v973_v26  ;;  %v1032_v41 = vmul.f32 %v5613_v58, %v1012_v30 }
 0x2fc   : > { %v988_v20 = vadd.f32 1e-05, %v972_v16  ;;  %v4330_v42 = vpop.eup %4329  ;;  %v953_v39 = vpop.xlane.xlu1 %952  ;;  %v5630_v44 = vadd.f32 %v5617_v0, %v1033_v34  ;;  %v1015_v46 = vmul.f32 %v4328_v35, %v5513_v56 }
 0x2fd   : > { %v950_v43 = vpop.xlane.xlu0 %949  ;;  %4339 = vrsqrt.f32 %v989_v37  ;;  %v975_v48 = vmul.f32 0.03125, %v953_v39  ;;  %v5634_v51 = vadd.f32 %v5617_v0, %v1032_v41  ;;  %v1014_v52 = vmul.f32 %v4330_v42, %v5504_v47 }
 0x2fe   : > { %v974_v49 = vmul.f32 0.03125, %v950_v43  ;;  %4341 = vrsqrt.f32 %v988_v20  ;;  %v1035_v53 = vmul.f32 %v5613_v58, %v1015_v46 }
 0x2ff   : > { %v4332_v54 = vpop.eup %4331  ;;  %v991_v55 = vadd.f32 1e-05, %v975_v48  ;;  %3567 = vmatmul.mubr.msk.f32.vlgmr.msra.gmra.mrb[0].mxu1 %vm817_vm0, %v5634_v51  ;;  %v1034_v61 = vmul.f32 %v5613_v58, %v1014_v52 }
 0x300   : > { %v990_v29 = vadd.f32 1e-05, %v974_v49  ;;  %v4334_v59 = vpop.eup %4333  ;;  %3569 = vmatprep.mubr.msk.f32.mxu1 %vm817_vm0, %v5630_v44  ;;  %v959_v56 = vpop.xlane.xlu1 %958  ;;  %v5644_v62 = vadd.f32 %v5617_v0, %v1035_v53  ;;  %v1017_v47 = vmul.f32 %v4332_v54, %v5525_v2  ;;  %3929 = vmatpush3.bf16.msra.mxu1 %v5596_v14  ;;  %v1444_v54 = vsub.s32 2, %v5606_v36 }
 0x301   : > { %v956_v60 = vpop.xlane.xlu0 %955  ;;  %4343 = vrsqrt.f32 %v991_v55  ;;  %v977_v63 = vmul.f32 0.03125, %v959_v56  ;;  %v1016_v4 = vmul.f32 %v4334_v59, %v5516_v57  ;;  %3931 = vmatprep.subr.bf16.mxu1 %v3930_v45  ;;  %v5650_v5 = vadd.f32 %v5617_v0, %v1034_v61 }
 0x302   : > { %v976_v1 = vmul.f32 0.03125, %v956_v60  ;;  %4345 = vrsqrt.f32 %v990_v29  ;;  %v1037_v6 = vmul.f32 %v5613_v58, %v1017_v47  ;;  %v1449_v56 = vsub.s32 3, %v5606_v36 }
 0x303   : > { %v4336_v7 = vpop.eup %4335  ;;  %v993_v10 = vadd.f32 1e-05, %v977_v63  ;;  %v1036_v15 = vmul.f32 %v5613_v58, %v1016_v4  ;;  %3570 = vmatmul.mubr.msk.f32.gmra.mrb[2].mxu1 %vm817_vm0, %v5650_v5  ;;  %v5697_v63 = vrot.slane %v5609_v24, %v1444_v54 }
 0x304   : > { %v992_v11 = vadd.f32 1e-05, %v976_v1  ;;  %v4338_v2 = vpop.eup %4337  ;;  %v1437_v14 = vpop.xlane.xlu1 %1436  ;;  %v5657_v57 = vadd.f32 %v5617_v0, %v1037_v6  ;;  %v1019_v38 = vmul.f32 %v4336_v7, %v5537_v12  ;;  %3572 = vmatprep.mubr.msk.f32.mxu1 %vm817_vm0, %v5644_v62  ;;  %3933 = vmatpush3.bf16.msra.mxu1 %v3930_v45  ;;  %v5703_v7 = vrot.slane %v5609_v24, %v1449_v56 }
 0x305   : > { %v962_v18 = vpop.xlane.xlu0 %961  ;;  %4347 = vrsqrt.f32 %v993_v10  ;;  %v1438_v26 = vmul.f32 0.03125, %v1437_v14  ;;  %v5663_v30 = vadd.f32 %v5617_v0, %v1036_v15  ;;  %v1018_v31 = vmul.f32 %v4338_v2, %v5528_v3  ;;  %3940 = vmatprep.subr.bf16.mxu1 %v4904_v9 }
 0x306   : > { %v978_v16 = vmul.f32 0.03125, %v962_v18  ;;  %4349 = vrsqrt.f32 %v992_v11  ;;  %v1039_v33 = vmul.f32 %v5613_v58, %v1019_v38 }
 0x307   : > { %v4340_v34 = vpop.eup %4339  ;;  %v1439_v35 = vadd.f32 1e-05, %v1438_v26  ;;  %3573 = vmatmul.mubr.msk.f32.gmra.mrb[4].mxu1 %vm817_vm0, %v5663_v30  ;;  %v1038_v20 = vmul.f32 %v5613_v58, %v1018_v31 }
 0x308   : > { %v994_v12 = vadd.f32 1e-05, %v978_v16  ;;  %v4342_v37 = vpop.eup %4341  ;;  %v1021_v41 = vmul.f32 %v4340_v34, %v5549_v27  ;;  %3575 = vmatprep.mubr.msk.f32.mxu1 %vm817_vm0, %v5657_v57  ;;  %v1059_v3 = vadd.f32 %v5617_v0, %v1039_v33 }
 0x309   : > { %4351 = vrsqrt.f32 %v1439_v35  ;;  %v1020_v42 = vmul.f32 %v4342_v37, %v5540_v13  ;;  %v1058_v39 = vadd.f32 %v5617_v0, %v1038_v20 }
 0x30a   : > { %4353 = vrsqrt.f32 %v994_v12  ;;  %v1041_v43 = vmul.f32 %v5613_v58, %v1021_v41 }
 0x30b   : > { %v4344_v46 = vpop.eup %4343  ;;  %v1040_v45 = vmul.f32 %v5613_v58, %v1020_v42  ;;  %3576 = vmatmul.mubr.msk.f32.gmra.mrb[6].mxu1 %vm817_vm0, %v1058_v39 }
 0x30c   : > { %v4346_v48 = vpop.eup %4345  ;;  %v1023_v27 = vmul.f32 %v4344_v46, %v5561_v40  ;;  %3578 = vmatprep.mubr.msk.f32.mxu1 %vm817_vm0, %v1059_v3  ;;  %v1061_v52 = vadd.f32 %v5617_v0, %v1041_v43 }
 0x30d   : > { %v1060_v49 = vadd.f32 %v5617_v0, %v1040_v45  ;;  %v1022_v13 = vmul.f32 %v4346_v48, %v5552_v17 }
 0x30e   : > { %v1043_v53 = vmul.f32 %v5613_v58, %v1023_v27 }
 0x30f   : > { %v4348_v55 = vpop.eup %4347  ;;  %v1042_v29 = vmul.f32 %v5613_v58, %v1022_v13  ;;  %3579 = vmatmul.mubr.msk.f32.gmra.mrb[8].mxu1 %vm817_vm0, %v1060_v49 }
 0x310   : > { %v4350_v59 = vpop.eup %4349  ;;  %v1025_v40 = vmul.f32 %v4348_v55, %v5573_v50  ;;  %3581 = vmatprep.mubr.msk.f32.mxu1 %vm817_vm0, %v1061_v52  ;;  %v1063_v17 = vadd.f32 %v5617_v0, %v1043_v53 }
 0x311   : > { %v1062_v60 = vadd.f32 %v5617_v0, %v1042_v29  ;;  %v1024_v61 = vmul.f32 %v4350_v59, %v5564_v21 }
 0x312   : > { %v1045_v47 = vmul.f32 %v5613_v58, %v1025_v40 }
 0x313   : > { %v4352_v1 = vpop.eup %4351  ;;  %v1044_v4 = vmul.f32 %v5613_v58, %v1024_v61  ;;  %3582 = vmatmul.mubr.msk.f32.gmra.mrb[10].mxu1 %vm817_vm0, %v1062_v60 }
 0x314   : > { %v4354_v6 = vpop.eup %4353  ;;  %v1441_v50 = vmul.f32 %v4352_v1, %v5585_v28  ;;  %3584 = vmatprep.mubr.msk.f32.mxu1 %vm817_vm0, %v1063_v17  ;;  %v1065_v10 = vadd.f32 %v5617_v0, %v1045_v47  ;;  %v3289_v47 = vld [vmem:[#allocation13] ss:$0 sm:$0xff] }
 0x315   : > { %v1064_v21 = vadd.f32 %v5617_v0, %v1044_v4  ;;  %v1026_v11 = vmul.f32 %v4354_v6, %v5576_v25  ;;  %v3272_v25 = vld [vmem:[#allocation10] ss:$0 sm:$0xff] }
 0x316   : > { %v1446_v15 = vmul.f32 %v5697_v63, %v1441_v50 }
 0x317   : > { %v1046_v2 = vmul.f32 %v5613_v58, %v1026_v11  ;;  %3585 = vmatmul.mubr.msk.f32.gmra.mrb[12].mxu1 %vm817_vm0, %v1064_v21 }
 0x318   : > { %v1451_v14 = vadd.f32 %v5703_v7, %v1446_v15  ;;  %3587 = vmatprep.mubr.msk.f32.mxu1 %vm817_vm0, %v1065_v10 }
 0x319   : > { %v1066_v28 = vadd.f32 %v5617_v0, %v1046_v2 }
 0x31a   : > { %3631 = vmatmul.mubr.msk.f32.vlgmr.msra.gmra.mrb[0].mxu0 %vm817_vm0, %v1451_v14 }
 0x31b   : > { %3700 = vmatprep.mubr.msk.f32.mxu0 %vm4905_vm2, %v4906_v22  ;;  %3588 = vmatmul.mubr.msk.f32.gmra.mrb[14].mxu1 %vm817_vm0, %v1066_v28 }
 0x31c   : > { %3598 = vmatprep.mubr.msk.f32.mxu1 %vm817_vm0, %v5621_v23 }
 0x31f   : > { %3599 = vmatmul.mubr.msk.f32.vlgmr.msra.gmra.mrb[16].mxu1 %vm817_vm0, %v5634_v51 }
 0x320   : > { %3601 = vmatprep.mubr.msk.f32.mxu1 %vm817_vm0, %v5630_v44 }
 0x323   : > { %3602 = vmatmul.mubr.msk.f32.gmra.mrb[18].mxu1 %vm817_vm0, %v5650_v5 }
 0x324   : > { %3604 = vmatprep.mubr.msk.f32.mxu1 %vm817_vm0, %v5644_v62 }
 0x327   : > { %3605 = vmatmul.mubr.msk.f32.gmra.mrb[20].mxu1 %vm817_vm0, %v5663_v30 }
 0x328   : > { %3607 = vmatprep.mubr.msk.f32.mxu1 %vm817_vm0, %v5657_v57 }
 0x32b   : > { %3608 = vmatmul.mubr.msk.f32.gmra.mrb[22].mxu1 %vm817_vm0, %v1058_v39 }
 0x32c   : > { %3610 = vmatprep.mubr.msk.f32.mxu1 %vm817_vm0, %v1059_v3 }
 0x32f   : > { %3611 = vmatmul.mubr.msk.f32.gmra.mrb[24].mxu1 %vm817_vm0, %v1060_v49 }
 0x330   : > { %3613 = vmatprep.mubr.msk.f32.mxu1 %vm817_vm0, %v1061_v52 }
 0x333   : > { %3614 = vmatmul.mubr.msk.f32.gmra.mrb[26].mxu1 %vm817_vm0, %v1062_v60 }
 0x334   : > { %3616 = vmatprep.mubr.msk.f32.mxu1 %vm817_vm0, %v1063_v17 }
 0x337   : > { %3617 = vmatmul.mubr.msk.f32.gmra.mrb[28].mxu1 %vm817_vm0, %v1064_v21 }
 0x338   : > { %3619 = vmatprep.mubr.msk.f32.mxu1 %vm817_vm0, %v1065_v10 }
 0x33b   : > { %3620 = vmatmul.mubr.msk.f32.gmra.mrb[30].mxu1 %vm817_vm0, %v1066_v28 }
 0x33c   : > { %3665 = vmatprep.mubr.msk.f32.mxu1 %vm4905_vm2, %v4906_v22 }
 0x3d2   : > { %v3568_v58 = vpop.f32.mrb[0].mxu1 }
 0x3d3   : > { %v1198_v0 = vadd.f32 %v3568_v58, %v3272_v25  ;;  %v1192_v23 = vpop.f32.mrb[1].mxu1 }
 0x3d4   : > { %v1193_v44 = vadd.f32 %v3272_v25, %v1192_v23 }
 0x3d6   : > { %v5750_v62 = vpack.c.bf16 %v1198_v0, %v1193_v44  ;;  %v3571_v5 = vpop.f32.mrb[2].mxu1 }
 0x3d7   : > { %v1208_v18 = vadd.f32 %v3571_v5, %v3272_v25  ;;  %v1202_v57 = vpop.f32.mrb[3].mxu1 }
 0x3d8   : > { %3943 = vmatpush3.bf16.xpose.msk.msra.mxu1 %vm5746_vm3, %v5750_v62  ;;  %v1203_v38 = vadd.f32 %v3272_v25, %v1202_v57 }
 0x3d9   : > { %3944 = vmatprep.subr.bf16.mxu1 %v4904_v9 }
 0x3da   : > { %v5756_v26 = vpack.c.bf16 %v1208_v18, %v1203_v38  ;;  %v3574_v16 = vpop.f32.mrb[4].mxu1 }
 0x3db   : > { %v1218_v30 = vadd.f32 %v3574_v16, %v3272_v25  ;;  %v1212_v31 = vpop.f32.mrb[5].mxu1 }
 0x3dc   : > { %v1213_v33 = vadd.f32 %v3272_v25, %v1212_v31 }
 0x3de   : > { %v5758_v34 = vpack.c.bf16 %v1218_v30, %v1213_v33  ;;  %v3577_v35 = vpop.f32.mrb[6].mxu1 }
 0x3df   : > { %v1228_v12 = vadd.f32 %v3577_v35, %v3272_v25  ;;  %v1222_v37 = vpop.f32.mrb[7].mxu1 }
 0x3e0   : > { %3947 = vmatpush3.bf16.xpose.msk.msra.mxu1 %vm5746_vm3, %v5756_v26  ;;  %v1223_v20 = vadd.f32 %v3272_v25, %v1222_v37 }
 0x3e1   : > { %3948 = vmatprep.subr.bf16.mxu1 %v4904_v9 }
 0x3e2   : > { %v5764_v41 = vpack.c.bf16 %v1228_v12, %v1223_v20  ;;  %v3580_v3 = vpop.f32.mrb[8].mxu1 }
 0x3e3   : > { %v1238_v42 = vadd.f32 %v3580_v3, %v3272_v25  ;;  %v1232_v39 = vpop.f32.mrb[9].mxu1 }
 0x3e4   : > { %v1233_v43 = vadd.f32 %v3272_v25, %v1232_v39 }
 0x3e6   : > { %v5766_v46 = vpack.c.bf16 %v1238_v42, %v1233_v43  ;;  %v3583_v45 = vpop.f32.mrb[10].mxu1 }
 0x3e7   : > { %v1248_v48 = vadd.f32 %v3583_v45, %v3272_v25  ;;  %v1242_v27 = vpop.f32.mrb[11].mxu1 }
 0x3e8   : > { %3951 = vmatpush3.bf16.xpose.msk.msra.mxu1 %vm5746_vm3, %v5758_v34  ;;  %v1243_v49 = vadd.f32 %v3272_v25, %v1242_v27 }
 0x3e9   : > { %3952 = vmatprep.subr.bf16.mxu1 %v4904_v9 }
 0x3ea   : > { %v5772_v52 = vpack.c.bf16 %v1248_v48, %v1243_v49  ;;  %v3586_v13 = vpop.f32.mrb[12].mxu1 }
 0x3eb   : > { %v1258_v53 = vadd.f32 %v3586_v13, %v3272_v25  ;;  %v1252_v54 = vpop.f32.mrb[13].mxu1 }
 0x3ec   : > { %v1253_v55 = vadd.f32 %v3272_v25, %v1252_v54 }
 0x3ed   : > { %v5774_v29 = vpop.f32.mrb[0].mxu0 }
 0x3ee   : > { %v3632_v59 = vpop.f32.mrb[1].mxu0  ;;  %v5776_v40 = vpack.c.bf16 %v1258_v53, %v1253_v55  ;;  %v3589_v56 = vpop.f32.mrb[14].mxu1 }
 0x3ef   : > { %v1268_v60 = vadd.f32 %v3589_v56, %v3272_v25  ;;  %v1262_v17 = vpop.f32.mrb[15].mxu1  ;;  %v5827_v59 = vld [vmem:[#allocation7] ss:$0 sm:$0xff] }
 0x3f0   : > { %3955 = vmatpush3.bf16.xpose.msk.msra.mxu1 %vm5746_vm3, %v5764_v41  ;;  %v1263_v61 = vadd.f32 %v3272_v25, %v1262_v17 }
 0x3f1   : > { %3956 = vmatprep.subr.bf16.mxu1 %v4904_v9 }
 0x3f2   : > { %v5782_v1 = vpack.c.bf16 %v1268_v60, %v1263_v61  ;;  %v3600_v4 = vpop.f32.mrb[16].mxu1  ;;  %v1533_v60 = vadd.f32 %v5827_v59, %v5774_v29 }
 0x3f3   : > { %v1354_v6 = vadd.f32 %v3600_v4, %v3289_v47  ;;  %v1348_v50 = vpop.f32.mrb[17].mxu1 }
 0x3f4   : > { %v1349_v21 = vadd.f32 %v3289_v47, %v1348_v50 }
 0x3f6   : > { %v5784_v10 = vpack.c.bf16 %v1354_v6, %v1349_v21  ;;  %v3603_v11 = vpop.f32.mrb[18].mxu1 }
 0x3f7   : > { %v1364_v15 = vadd.f32 %v3603_v11, %v3289_v47  ;;  %v1358_v2 = vpop.f32.mrb[19].mxu1 }
 0x3f8   : > { %3959 = vmatpush3.bf16.xpose.msk.msra.mxu1 %vm5746_vm3, %v5766_v46  ;;  %v1359_v14 = vadd.f32 %v3289_v47, %v1358_v2  ;;  %3974 = vmatpush3.bf16.msra.mxu0 %v5784_v10 }
 0x3f9   : > { %3960 = vmatprep.subr.bf16.mxu1 %v4904_v9  ;;  %3975 = vmatprep.subr.bf16.mxu0 %v4904_v9 }
 0x3fa   : > { %v5792_v28 = vpack.c.bf16 %v1364_v15, %v1359_v14  ;;  %v3606_v25 = vpop.f32.mrb[20].mxu1 }
 0x3fb   : > { %v1374_v58 = vadd.f32 %v3606_v25, %v3289_v47  ;;  %v1368_v0 = vpop.f32.mrb[21].mxu1 }
 0x3fc   : > { %v1369_v23 = vadd.f32 %v3289_v47, %v1368_v0  ;;  %3977 = vmatpush3.bf16.msra.mxu0 %v5792_v28 }
 0x3fd   : > { %3978 = vmatprep.subr.bf16.mxu0 %v4904_v9 }
 0x3fe   : > { %v5796_v44 = vpack.c.bf16 %v1374_v58, %v1369_v23  ;;  %v3609_v5 = vpop.f32.mrb[22].mxu1 }
 0x3ff   : > { %v1384_v18 = vadd.f32 %v3609_v5, %v3289_v47  ;;  %v1378_v57 = vpop.f32.mrb[23].mxu1 }
 0x400   : > { %3963 = vmatpush3.bf16.xpose.msk.msra.mxu1 %vm5746_vm3, %v5772_v52  ;;  %v1379_v38 = vadd.f32 %v3289_v47, %v1378_v57  ;;  %3980 = vmatpush3.bf16.msra.mxu0 %v5796_v44 }
 0x401   : > { %3964 = vmatprep.subr.bf16.mxu1 %v4904_v9  ;;  %3981 = vmatprep.subr.bf16.mxu0 %v4904_v9 }
 0x402   : > { %v5804_v16 = vpack.c.bf16 %v1384_v18, %v1379_v38  ;;  %v3612_v30 = vpop.f32.mrb[24].mxu1 }
 0x403   : > { %v1394_v31 = vadd.f32 %v3612_v30, %v3289_v47  ;;  %v1388_v33 = vpop.f32.mrb[25].mxu1 }
 0x404   : > { %v1389_v35 = vadd.f32 %v3289_v47, %v1388_v33  ;;  %3983 = vmatpush3.bf16.msra.mxu0 %v5804_v16 }
 0x405   : > { %3984 = vmatprep.subr.bf16.mxu0 %v4904_v9 }
 0x406   : > { %v5808_v12 = vpack.c.bf16 %v1394_v31, %v1389_v35  ;;  %v3615_v37 = vpop.f32.mrb[26].mxu1 }
 0x407   : > { %v1404_v20 = vadd.f32 %v3615_v37, %v3289_v47  ;;  %v1398_v3 = vpop.f32.mrb[27].mxu1  ;;  %v1838_v37 = vld [vmem:[#allocation16] sm:$0xff] }
 0x408   : > { %3967 = vmatpush3.bf16.xpose.msk.msra.mxu1 %vm5746_vm3, %v5776_v40  ;;  %v1399_v42 = vadd.f32 %v3289_v47, %v1398_v3  ;;  %3986 = vmatpush3.bf16.msra.mxu0 %v5808_v12  ;;  %v1840_v3 = vld [vmem:[#allocation16 + $0x10] sm:$0xff] }
 0x409   : > { %3968 = vmatprep.subr.bf16.mxu1 %v4904_v9  ;;  %3987 = vmatprep.subr.bf16.mxu0 %v4904_v9 }
 0x40a   : > { %v5816_v39 = vpack.c.bf16 %v1404_v20, %v1399_v42  ;;  %v3618_v43 = vpop.f32.mrb[28].mxu1  ;;  %v1839_v20 = vld [vmem:[#allocation16 + $0x8] sm:$0xff] }
 0x40b   : > { %v1414_v45 = vadd.f32 %v3618_v43, %v3289_v47  ;;  %v1408_v48 = vpop.f32.mrb[29].mxu1  ;;  %v5842_v42 = vpack.c.bf16 %v1839_v20, %v1838_v37  ;;  %v1841_v43 = vld [vmem:[#allocation16 + $0x18] sm:$0xff] }
 0x40c   : > { %v1409_v27 = vadd.f32 %v3289_v47, %v1408_v48  ;;  %3989 = vmatpush3.bf16.msra.mxu0 %v5816_v39 }
 0x40d   : > { %3990 = vmatprep.subr.bf16.mxu0 %v4904_v9 }
 0x40e   : > { %v5820_v49 = vpack.c.bf16 %v1414_v45, %v1409_v27  ;;  %v3621_v13 = vpop.f32.mrb[30].mxu1  ;;  %v5845_v45 = vpack.c.bf16 %v1841_v43, %v1840_v3  ;;  %v1754_v27 = vld [vmem:[#allocation15] sm:$0xff] }
 0x40f   : > { %v1424_v53 = vadd.f32 %v3621_v13, %v3289_v47  ;;  %v1418_v54 = vpop.f32.mrb[31].mxu1  ;;  %v1755_v13 = vld [vmem:[#allocation15 + $0x8] sm:$0xff] }
 0x410   : > { %3971 = vmatpush3.bf16.xpose.msk.msra.mxu1 %vm5746_vm3, %v5782_v1  ;;  %v1419_v55 = vadd.f32 %v3289_v47, %v1418_v54  ;;  %3992 = vmatpush3.bf16.msra.mxu0 %v5820_v49  ;;  %v5854_v54 = vpack.c.bf16 %v1755_v13, %v1754_v27  ;;  %v1974_v13 = vsub.s32 4, %v5606_v36 }
 0x411   : > { %4002 = vmatprep.subr.bf16.mxu1 %v4904_v9  ;;  %3993 = vmatprep.subr.bf16.mxu0 %v4904_v9 }
 0x412   : > { %v5830_v56 = vpack.c.bf16 %v1424_v53, %v1419_v55 }
 0x414   : > { %3995 = vmatpush3.bf16.msra.mxu0 %v5830_v56 }
 0x415   : > { %3996 = vmatprep.subr.bf16.mxu0 %v4904_v9 }
 0x417   : > { %3666 = vmatmul.mubr.msk.f32.vlgmr.msra.gmra.mrb[32].mxu1 %vm817_vm0, %v1533_v60  ;;  %v1756_v60 = vld [vmem:[#allocation15 + $0x10] sm:$0xff] }
 0x418   : > { %3722 = vmatprep.mubr.msk.f32.mxu1 %vm4905_vm2, %v4906_v22  ;;  %4004 = vmatpush3.bf16.msra.mxu1 %v5842_v42 }
 0x419   : > { %4005 = vmatprep.subr.bf16.mxu1 %v4904_v9 }
 0x41c   : > { %4007 = vmatpush3.bf16.msra.mxu1 %v5845_v45 }
 0x41d   : > { %4014 = vmatprep.subr.bf16.mxu1 %v4904_v9 }
 0x41f   : > { %3723 = vmatmul.mubr.msk.f32.vlgmr.msra.gmra.mrb[34].mxu1 %vm817_vm0, %v5490_v32  ;;  %v5864_v32 = vld [vmem:[#allocation19] ss:$0 sm:$0xff] }
 0x420   : > { %3744 = vmatprep.mubr.msk.f32.mxu1 %vm4905_vm2, %v4906_v22 }
 0x4ea   : > { %v1653_v17 = vpop.f32.mrb[32].mxu1 }
 0x4eb   : > { %v1657_v61 = vmul.f32 0.17677669, %v1653_v17  ;;  %v3667_v47 = vpop.f32.mrb[33].mxu1  ;;  %v1757_v17 = vld [vmem:[#allocation15 + $0x18] sm:$0xff] }
 0x4ed   : > { %v1659_v4 = vsel %vm1658_vm4, %v1657_v61, -inf }
 0x4ee   : > { %v1660_v6 = vrot.slane %v1659_v4, 4 }
 0x4f0   : > { %v1661_v50 = vmax.f32 %v1659_v4, %v1660_v6 }
 0x4f2   : > { %v1662_v21 = vrot.slane %v1661_v50, 2  ;;  %v1918_v47 = vpop.f32.mrb[34].mxu1 }
 0x4f3   : > { %v1919_v4 = vadd.f32 %v5864_v32, %v1918_v47  ;;  %v3724_v6 = vpop.f32.mrb[35].mxu1 }
 0x4f4   : > { %v1663_v11 = vmax.f32 %v1661_v50, %v1662_v21 }
 0x4f5   : > { %1930 = vrot.lane.b32.xlu1 %v1919_v4, %s4907_s3 }
 0x4f6   : > { %v1664_v29 = vrot.slane %v1663_v11, 1 }
 0x4f8   : > { %v1665_v15 = vmax.f32 %v1663_v11, %v1664_v29  ;;  %v5871_v11 = vld [vmem:[#allocation18] ss:$0 sm:$0xff] }
 0x4fa   : > { %v1666_v2 = vsub.f32 %v1657_v61, %v1665_v15  ;;  %v5857_v61 = vpack.c.bf16 %v1757_v17, %v1756_v60 }
 0x4fc   : > { %v1667_v14 = vmul.f32 1.442695, %v1666_v2 }
 0x4fe   : > { %4355 = vpow2.f32 %v1667_v14 }
 0x508   : > { %v4356_v25 = vpop.eup %4355 }
 0x509   : > { %v1669_v58 = vsel %vm1658_vm4, %v4356_v25, 0.0 }
 0x50a   : > { %v1670_v0 = vrot.slane %v1669_v58, 4 }
 0x50c   : > { %v1671_v23 = vadd.f32 %v1670_v0, %v1669_v58 }
 0x50e   : > { %v1672_v5 = vrot.slane %v1671_v23, 2 }
 0x510   : > { %v1673_v18 = vadd.f32 %v1672_v5, %v1671_v23 }
 0x512   : > { %v1674_v57 = vrot.slane %v1673_v18, 1 }
 0x514   : > { %v1675_v38 = vadd.f32 %v1674_v57, %v1673_v18 }
 0x516   : > { %4357 = vrcp.f32 %v1675_v38 }
 0x520   : > { %v4358_v30 = vpop.eup %4357 }
 0x521   : > { %v1677_v31 = vmul.f32 %v4358_v30, %v4356_v25 }
 0x523   : > { %v1678_v33 = vadd.f32 1e-08, %v1677_v31  ;;  %v4393_v31 = vld [vmem:[#allocation2] sm:$0xf] }
 0x525   : > { %v1679_v35 = vsel %vm1658_vm4, %v1678_v33, 0.0 }
 0x526   : > { %1680 = vadd.xlane.f32.xlu0 %v1679_v35 }
 0x567   : > { %v1931_v23 = vpop.permute.xlu1 %1930 }
 0x5b3   : > { %v1681_v48 = vpop.xlane.xlu0 %1680 }
 0x5b4   : > { %4359 = vrcp.f32 %v1681_v48 }
 0x5be   : > { %v4360_v53 = vpop.eup %4359 }
 0x5bf   : > { %v1683_v55 = vmul.f32 %v4360_v53, %v1678_v33  ;;  %v1975_v53 = vrot.slane %v5609_v24, %v1974_v13 }
 0x5c1   : > { %3701 = vmatmul.mubr.f32.vlgmr.msra.gmra.mrb[2].mxu0 %v1683_v55 }
 0x5c2   : > { %3998 = vmatpush3.bf16.msra.mxu0 %v5854_v54  ;;  %3711 = vmatprep.mubr.msk.f32.mxu0 %vm4905_vm2, %v4906_v22 }
 0x5c3   : > { %3999 = vmatprep.subr.bf16.mxu0 %v4904_v9 }
 0x5c6   : > { %4001 = vmatpush3.bf16.msra.mxu0 %v5857_v61 }
 0x5c7   : > { %4008 = vmatprep.subr.bf16.mxu0 %v4904_v9 }
 0x694   : > { %v1750_v50 = vpop.f32.mrb[2].mxu0 }
 0x695   : > { %v3702_v21 = vpop.f32.mrb[3].mxu0  ;;  %3712 = vmatmul.mubr.msk.f32.vlgmr.msra.gmra.mrb[4].mxu0 %vm817_vm0, %v1750_v50  ;;  %v1983_v50 = vsub.s32 5, %v5606_v36 }
 0x696   : > { %3733 = vmatprep.mubr.msk.f32.mxu0 %vm4905_vm2, %v4906_v22 }
 0x697   : > { %v1984_v21 = vrot.slane %v5609_v24, %v1983_v50 }
 0x768   : > { %v1834_v29 = vpop.f32.mrb[4].mxu0 }
 0x769   : > { %v1835_v15 = vadd.f32 %v5871_v11, %v1834_v29  ;;  %v3713_v2 = vpop.f32.mrb[5].mxu0  ;;  %v1990_v29 = vld [vmem:[#allocation21] sm:$0xff] }
 0x76a   : > { %v1992_v2 = vld [vmem:[#allocation21 + $0x10] sm:$0xff] }
 0x76b   : > { %v1922_v14 = vadd.f32 %v1919_v4, %v1835_v15 }
 0x76d   : > { %v3329_v25 = vmul.f32 -1.442695, %v1922_v14 }
 0x76f   : > { %4361 = vpow2.f32 %v3329_v25  ;;  %v1993_v25 = vld [vmem:[#allocation21 + $0x18] sm:$0xff] }
 0x779   : > { %v4362_v58 = vpop.eup %4361 }
 0x77a   : > { %v1926_v0 = vadd.f32 1.0, %v4362_v58  ;;  %v5894_v58 = vpack.c.bf16 %v1993_v25, %v1992_v2 }
 0x77c   : > { %4363 = vrcp.f32 %v1926_v0 }
 0x786   : > { %v4364_v5 = vpop.eup %4363 }
 0x787   : > { %v1933_v18 = vmul.f32 %v4364_v5, %v1931_v23  ;;  %v1940_v35 = vsub.f32 1.0, %v4364_v5  ;;  %v2077_v23 = vld [vmem:[#allocation24] sm:$0xff] }
 0x789   : > { %1935 = vrot.lane.b32.xlu0 %v1933_v18, %s4907_s3  ;;  %v2079_v18 = vld [vmem:[#allocation24 + $0x10] sm:$0xff] }
 0x7fb   : > { %v1936_v57 = vpop.permute.xlu0 %1935 }
 0x7fc   : > { %v1938_v38 = vadd.f32 %v1936_v57, %v1835_v15  ;;  %v1991_v15 = vld [vmem:[#allocation21 + $0x8] sm:$0xff] }
 0x7fd   : > { %v5891_v14 = vpack.c.bf16 %v1991_v15, %v1990_v29 }
 0x7fe   : > { %4365 = vtanh.f32 %v1938_v38  ;;  %v2080_v38 = vld [vmem:[#allocation24 + $0x18] sm:$0xff] }
 0x7ff   : > { %4010 = vmatpush3.bf16.msra.mxu0 %v5891_v14 }
 0x800   : > { %4011 = vmatprep.subr.bf16.mxu0 %v4904_v9 }
 0x803   : > { %4013 = vmatpush3.bf16.msra.mxu0 %v5894_v58 }
 0x804   : > { %4020 = vmatprep.subr.bf16.mxu0 %v4904_v9 }
 0x808   : > { %v4366_v30 = vpop.eup %4365 }
 0x809   : > { %1942 = vrot.lane.b32.xlu1 %v4366_v30, %s4908_s19  ;;  %v5902_v30 = vpack.c.bf16 %v2080_v38, %v2079_v18 }
 0x80d   : > { %1946 = vrot.lane.b32.xlu1 %v4393_v31, %s4909_s29 }
 0x87b   : > { %v1943_v33 = vpop.permute.xlu1 %1942 }
 0x87c   : > { %v1945_v20 = vmul.f32 %v1943_v33, %v1940_v35 }
 0x87f   : > { %v1947_v37 = vpop.permute.xlu1 %1946 }
 0x880   : > { %v1949_v3 = vmul.f32 %v4364_v5, %v1947_v37  ;;  %v2078_v5 = vld [vmem:[#allocation24 + $0x8] sm:$0xff] }
 0x881   : > { %v5899_v57 = vpack.c.bf16 %v2078_v5, %v2077_v23 }
 0x882   : > { %v5877_v43 = vadd.f32 %v1949_v3, %v1945_v20 }
 0x883   : > { %4016 = vmatpush3.bf16.msra.mxu1 %v5899_v57 }
 0x884   : > { %1952 = vrot.lane.b32.xlu1 %v5877_v43, %s4908_s19  ;;  %4017 = vmatprep.subr.bf16.mxu1 %v4904_v9 }
 0x887   : > { %4019 = vmatpush3.bf16.msra.mxu1 %v5902_v30 }
 0x888   : > { %4026 = vmatprep.subr.bf16.mxu1 %v4904_v9 }
 0x8f6   : > { %v1953_v48 = vpop.permute.xlu1 %1952 }
 0x8f7   : > { %v1955_v27 = vsel %vm1428_vm1, %v1953_v48, 0.0 }
 0x8f8   : > { %1956 = vadd.xlane.f32.xlu0 %v1955_v27  ;;  %v5921_v27 = vld [vmem:[#allocation22] ss:$0 sm:$0xff] }
 0x90e   : > { %1977 = vrot.lane.b32.xlu0 %v1975_v53, %s4909_s29 }
 0x985   : > { %v1957_v55 = vpop.xlane.xlu0 %1956 }
 0x986   : > { %v1958_v60 = vmul.f32 0.03125, %v1957_v55 }
 0x988   : > { %v1959_v17 = vsub.f32 %v5877_v43, %v1958_v60 }
 0x989   : > { %v5905_v33 = vpop.permute.xlu0 %1977 }
 0x98a   : > { %v1960_v47 = vmul.f32 %v1959_v17, %v1959_v17 }
 0x98c   : > { %1962 = vrot.lane.b32.xlu1 %v1960_v47, %s4908_s19 }
 0x9fe   : > { %v1963_v4 = vpop.permute.xlu1 %1962 }
 0x9ff   : > { %v1965_v6 = vsel %vm1428_vm1, %v1963_v4, 0.0 }
 0xa00   : > { %1966 = vadd.xlane.f32.xlu1 %v1965_v6 }
 0xa11   : > { %1986 = vrot.lane.b32.xlu1 %v1984_v21, %s4909_s29 }
 0xa8d   : > { %v1967_v36 = vpop.xlane.xlu1 %1966 }
 0xa8e   : > { %v1968_v24 = vmul.f32 0.03125, %v1967_v36 }
 0xa90   : > { %v1969_v0 = vadd.f32 1e-05, %v1968_v24 }
 0xa91   : > { %v5908_v37 = vpop.permute.xlu1 %1986 }
 0xa92   : > { %4367 = vrsqrt.f32 %v1969_v0 }
 0xa9c   : > { %v4368_v31 = vpop.eup %4367 }
 0xa9d   : > { %v1971_v35 = vmul.f32 %v4368_v31, %v1959_v17  ;;  %v3333_v17 = vld [vmem:[#allocation25] ss:$0 sm:$0xff] }
 0xa9e   : > { %2165 = vrot.lane.b32.xlu1 %v3333_v17, %s4909_s29 }
 0xa9f   : > { %v1980_v20 = vmul.f32 %v5905_v33, %v1971_v35 }
 0xaa1   : > { %v1989_v3 = vadd.f32 %v5908_v37, %v1980_v20 }
 0xaa3   : > { %2002 = vrot.lane.b32.xlu0 %v1989_v3, %s4908_s19 }
 0xb10   : > { %v5961_v50 = vpop.permute.xlu1 %2165 }
 0xb15   : > { %v2003_v48 = vpop.permute.xlu0 %2002 }
 0xb16   : > { %3734 = vmatmul.mubr.msk.f32.vlgmr.msra.gmra.mrb[6].mxu0 %vm817_vm0, %v2003_v48 }
 0xb17   : > { %4022 = vmatpush3.bf16.msra.mxu0 %v5592_v8  ;;  %3755 = vmatprep.mubr.msk.f32.mxu0 %vm4905_vm2, %v4906_v22 }
 0xb18   : > { %4023 = vmatprep.subr.bf16.mxu0 %v4904_v9 }
 0xb1b   : > { %4025 = vmatpush3.bf16.msra.mxu0 %v5599_v19 }
 0xb1c   : > { %4058 = vmatprep.subr.bf16.mxu0 %v4904_v9 }
 0xbe9   : > { %v2072_v13 = vpop.f32.mrb[6].mxu0 }
 0xbea   : > { %v2073_v53 = vadd.f32 %v5921_v27, %v2072_v13  ;;  %v3735_v55 = vpop.f32.mrb[7].mxu0 }
 0xbec   : > { %v2076_v60 = vmax.f32 %v2073_v53, 0.0 }
 0xbee   : > { %3745 = vmatmul.mubr.msk.f32.vlgmr.msra.gmra.mrb[36].mxu1 %vm817_vm0, %v2076_v60 }
 0xbef   : > { %4029 = vmatpush3.bf16.xpose.msk.msra.mxu1 %vm5746_vm3, %v5750_v62  ;;  %3790 = vmatprep.mubr.msk.f32.mxu1 %vm4905_vm2, %v4906_v22 }
 0xbf0   : > { %4030 = vmatprep.subr.bf16.mxu1 %v4904_v9 }
 0xbf7   : > { %4033 = vmatpush3.bf16.xpose.msk.msra.mxu1 %vm5746_vm3, %v5756_v26 }
 0xbf8   : > { %4034 = vmatprep.subr.bf16.mxu1 %v4904_v9 }
 0xbff   : > { %4037 = vmatpush3.bf16.xpose.msk.msra.mxu1 %vm5746_vm3, %v5758_v34 }
 0xc00   : > { %4038 = vmatprep.subr.bf16.mxu1 %v4904_v9 }
 0xc07   : > { %4041 = vmatpush3.bf16.xpose.msk.msra.mxu1 %vm5746_vm3, %v5764_v41 }
 0xc08   : > { %4042 = vmatprep.subr.bf16.mxu1 %v4904_v9 }
 0xc0f   : > { %4045 = vmatpush3.bf16.xpose.msk.msra.mxu1 %vm5746_vm3, %v5766_v46 }
 0xc10   : > { %4046 = vmatprep.subr.bf16.mxu1 %v4904_v9 }
 0xc17   : > { %4049 = vmatpush3.bf16.xpose.msk.msra.mxu1 %vm5746_vm3, %v5772_v52 }
 0xc18   : > { %4050 = vmatprep.subr.bf16.mxu1 %v4904_v9 }
 0xc1f   : > { %4053 = vmatpush3.bf16.xpose.msk.msra.mxu1 %vm5746_vm3, %v5776_v40 }
 0xc20   : > { %4054 = vmatprep.subr.bf16.mxu1 %v4904_v9 }
 0xc27   : > { %4057 = vmatpush3.bf16.xpose.msk.msra.mxu1 %vm5746_vm3, %v5782_v1 }
 0xc28   : > { %4106 = vmatprep.subr.bf16.mxu1 %v4904_v9 }
 0xcc1   : > { %v2150_v47 = vpop.f32.mrb[36].mxu1 }
 0xcc2   : > { %2155 = vrot.lane.b32.xlu0 %v2150_v47, %s4909_s29  ;;  %v3746_v4 = vpop.f32.mrb[37].mxu1 }
 0xd34   : > { %v2156_v6 = vpop.permute.xlu0 %2155 }
 0xd35   : > { %v2158_v21 = vadd.f32 %v2156_v6, %v5877_v43 }
 0xd37   : > { %v5965_v29 = vadd.f32 %v5961_v50, %v2158_v21 }
 0xd39   : > { %2170 = vrot.lane.b32.xlu0 %v5965_v29, %s4908_s19 }
 0xdab   : > { %v5969_v15 = vpop.permute.xlu0 %2170 }
 0xdac   : > { %v2173_v2 = vsel %vm1428_vm1, %v5969_v15, 0.0 }
 0xdad   : > { %2174 = vadd.xlane.f32.xlu1 %v2173_v2 }
 0xdbe   : > { %2196 = vrot.lane.b32.xlu1 %v5703_v7, %s4909_s29 }
 0xe3a   : > { %v2175_v25 = vpop.xlane.xlu1 %2174 }
 0xe3b   : > { %v2176_v36 = vmul.f32 0.03125, %v2175_v25 }
 0xe3d   : > { %v2177_v24 = vsub.f32 %v5965_v29, %v2176_v36 }
 0xe3e   : > { %v5982_v20 = vpop.permute.xlu1 %2196 }
 0xe3f   : > { %v2178_v43 = vmul.f32 %v2177_v24, %v2177_v24 }
 0xe41   : > { %2180 = vrot.lane.b32.xlu0 %v2178_v43, %s4908_s19 }
 0xeb3   : > { %v2181_v0 = vpop.permute.xlu0 %2180 }
 0xeb4   : > { %v2183_v23 = vsel %vm1428_vm1, %v2181_v0, 0.0 }
 0xeb5   : > { %2184 = vadd.xlane.f32.xlu0 %v2183_v23 }
 0xecb   : > { %2191 = vrot.lane.b32.xlu0 %v5697_v63, %s4909_s29 }
 0xf42   : > { %v2185_v5 = vpop.xlane.xlu0 %2184 }
 0xf43   : > { %v2186_v18 = vmul.f32 0.03125, %v2185_v5 }
 0xf45   : > { %v2187_v38 = vadd.f32 1e-05, %v2186_v18 }
 0xf46   : > { %v5980_v7 = vpop.permute.xlu0 %2191 }
 0xf47   : > { %4369 = vrsqrt.f32 %v2187_v38 }
 0xf51   : > { %v4370_v31 = vpop.eup %4369 }
 0xf52   : > { %v2189_v35 = vmul.f32 %v4370_v31, %v2177_v24 }
 0xf54   : > { %v2194_v3 = vmul.f32 %v5980_v7, %v2189_v35 }
 0xf56   : > { %v2199_v48 = vadd.f32 %v5982_v20, %v2194_v3 }
 0xf58   : > { %2201 = vrot.lane.b32.xlu1 %v2199_v48, %s4908_s19 }
 0xfca   : > { %v2202_v13 = vpop.permute.xlu1 %2201 }
 0xfcb   : > { %3756 = vmatmul.mubr.msk.f32.vlgmr.msra.gmra.mrb[8].mxu0 %vm817_vm0, %v2202_v13 }
 0xfcc   : > { %4060 = vmatpush3.bf16.msra.mxu0 %v5784_v10  ;;  %3825 = vmatprep.mubr.msk.f32.mxu0 %vm4905_vm2, %v4906_v22 }
 0xfcd   : > { %4061 = vmatprep.subr.bf16.mxu0 %v4904_v9 }
 0xfd0   : > { %4063 = vmatpush3.bf16.msra.mxu0 %v5792_v28 }
 0xfd1   : > { %4064 = vmatprep.subr.bf16.mxu0 %v4904_v9 }
 0xfd4   : > { %4066 = vmatpush3.bf16.msra.mxu0 %v5796_v44 }
 0xfd5   : > { %4067 = vmatprep.subr.bf16.mxu0 %v4904_v9 }
 0xfd8   : > { %4069 = vmatpush3.bf16.msra.mxu0 %v5804_v16 }
 0xfd9   : > { %4070 = vmatprep.subr.bf16.mxu0 %v4904_v9 }
 0xfdc   : > { %4072 = vmatpush3.bf16.msra.mxu0 %v5808_v12 }
 0xfdd   : > { %4073 = vmatprep.subr.bf16.mxu0 %v4904_v9 }
 0xfe0   : > { %4075 = vmatpush3.bf16.msra.mxu0 %v5816_v39 }
 0xfe1   : > { %4076 = vmatprep.subr.bf16.mxu0 %v4904_v9 }
 0xfe4   : > { %4078 = vmatpush3.bf16.msra.mxu0 %v5820_v49 }
 0xfe5   : > { %4079 = vmatprep.subr.bf16.mxu0 %v4904_v9 }
 0xfe8   : > { %4081 = vmatpush3.bf16.msra.mxu0 %v5830_v56 }
 0xfe9   : > { %4082 = vmatprep.subr.bf16.mxu0 %v4904_v9 }
0x109e   : > { %v2271_v63 = vpop.f32.mrb[8].mxu0 }
0x109f   : > { %v2272_v10 = vadd.f32 %v5827_v59, %v2271_v63  ;;  %v3757_v28 = vpop.f32.mrb[9].mxu0 }
0x10a1   : > { %3791 = vmatmul.mubr.msk.f32.vlgmr.msra.gmra.mrb[38].mxu1 %vm817_vm0, %v2272_v10 }
0x10a2   : > { %4108 = vmatpush3.bf16.msra.mxu1 %v5592_v8  ;;  %3880 = vmatprep.mubr.msk.f32.mxu1 %vm4905_vm2, %v4906_v22 }
0x10a3   : > { %4109 = vmatprep.subr.bf16.mxu1 %v4904_v9 }
0x10a6   : > { %4111 = vmatpush3.bf16.msra.mxu1 %v5599_v19 }
0x1174   : > { %v2344_v44 = vpop.f32.mrb[38].mxu1 }
0x1175   : > { %v2348_v16 = vmul.f32 0.17677669, %v2344_v44  ;;  %v3792_v12 = vpop.f32.mrb[39].mxu1 }
0x1177   : > { %v2349_v39 = vsel %vm1658_vm4, %v2348_v16, -inf }
0x1178   : > { %v2350_v49 = vrot.slane %v2349_v39, 4 }
0x117a   : > { %v2351_v56 = vmax.f32 %v2349_v39, %v2350_v49 }
0x117c   : > { %v2352_v53 = vrot.slane %v2351_v56, 2 }
0x117e   : > { %v2353_v55 = vmax.f32 %v2351_v56, %v2352_v53 }
0x1180   : > { %v2354_v60 = vrot.slane %v2353_v55, 1 }
0x1182   : > { %v2355_v17 = vmax.f32 %v2353_v55, %v2354_v60 }
0x1184   : > { %v2356_v47 = vsub.f32 %v2348_v16, %v2355_v17 }
0x1186   : > { %v2357_v8 = vmul.f32 1.442695, %v2356_v47 }
0x1188   : > { %4371 = vpow2.f32 %v2357_v8 }
0x1192   : > { %v4372_v4 = vpop.eup %4371 }
0x1193   : > { %v2359_v6 = vsel %vm1658_vm4, %v4372_v4, 0.0 }
0x1194   : > { %v2360_v21 = vrot.slane %v2359_v6, 4 }
0x1196   : > { %v2361_v2 = vadd.f32 %v2360_v21, %v2359_v6 }
0x1198   : > { %v2362_v19 = vrot.slane %v2361_v2, 2 }
0x119a   : > { %v2363_v25 = vadd.f32 %v2362_v19, %v2361_v2 }
0x119c   : > { %v2364_v36 = vrot.slane %v2363_v25, 1 }
0x119e   : > { %v2365_v24 = vadd.f32 %v2364_v36, %v2363_v25 }
0x11a0   : > { %4373 = vrcp.f32 %v2365_v24 }
0x11aa   : > { %v4374_v43 = vpop.eup %4373 }
0x11ab   : > { %v2367_v0 = vmul.f32 %v4374_v43, %v4372_v4 }
0x11ad   : > { %v2368_v23 = vadd.f32 1e-08, %v2367_v0 }
0x11af   : > { %v2369_v5 = vsel %vm1658_vm4, %v2368_v23, 0.0 }
0x11b0   : > { %2370 = vadd.xlane.f32.xlu1 %v2369_v5 }
0x123d   : > { %v2371_v18 = vpop.xlane.xlu1 %2370 }
0x123e   : > { %4375 = vrcp.f32 %v2371_v18 }
0x1248   : > { %v4376_v38 = vpop.eup %4375 }
0x1249   : > { %v2373_v31 = vmul.f32 %v4376_v38, %v2368_v23 }
0x124b   : > { %3826 = vmatmul.mubr.f32.vlgmr.msra.gmra.mrb[10].mxu0 %v2373_v31 }
0x124c   : > { %4084 = vmatpush3.bf16.msra.mxu0 %v5854_v54  ;;  %3836 = vmatprep.mubr.msk.f32.mxu0 %vm4905_vm2, %v4906_v22 }
0x124d   : > { %4085 = vmatprep.subr.bf16.mxu0 %v4904_v9 }
0x1250   : > { %4087 = vmatpush3.bf16.msra.mxu0 %v5857_v61 }
0x1251   : > { %4088 = vmatprep.subr.bf16.mxu0 %v4904_v9 }
0x131e   : > { %v2440_v35 = vpop.f32.mrb[10].mxu0 }
0x131f   : > { %v3827_v3 = vpop.f32.mrb[11].mxu0  ;;  %3837 = vmatmul.mubr.msk.f32.vlgmr.msra.gmra.mrb[12].mxu0 %vm817_vm0, %v2440_v35 }
0x1320   : > { %4090 = vmatpush3.bf16.msra.mxu0 %v5842_v42  ;;  %3847 = vmatprep.mubr.msk.f32.mxu0 %vm4905_vm2, %v4906_v22 }
0x1321   : > { %4091 = vmatprep.subr.bf16.mxu0 %v4904_v9 }
0x1324   : > { %4093 = vmatpush3.bf16.msra.mxu0 %v5845_v45 }
0x1325   : > { %4094 = vmatprep.subr.bf16.mxu0 %v4904_v9 }
0x1327   : > { %3848 = vmatmul.mubr.msk.f32.vlgmr.msra.gmra.mrb[14].mxu0 %vm817_vm0, %v5969_v15 }
0x1328   : > { %4096 = vmatpush3.bf16.msra.mxu0 %v5891_v14  ;;  %3858 = vmatprep.mubr.msk.f32.mxu0 %vm4905_vm2, %v4906_v22 }
0x1329   : > { %4097 = vmatprep.subr.bf16.mxu0 %v4904_v9 }
0x132c   : > { %4099 = vmatpush3.bf16.msra.mxu0 %v5894_v58 }
0x132d   : > { %4100 = vmatprep.subr.bf16.mxu0 %v4904_v9 }
0x13f2   : > { %v2513_v42 = vpop.f32.mrb[12].mxu0 }
0x13f3   : > { %v3838_v54 = vpop.f32.mrb[13].mxu0  ;;  %v2514_v15 = vadd.f32 %v5871_v11, %v2513_v42 }
0x13fa   : > { %v2585_v61 = vpop.f32.mrb[14].mxu0 }
0x13fb   : > { %v2586_v45 = vadd.f32 %v5864_v32, %v2585_v61  ;;  %v3849_v48 = vpop.f32.mrb[15].mxu0 }
0x13fd   : > { %2597 = vrot.lane.b32.xlu0 %v2586_v45, %s4907_s3  ;;  %v2589_v14 = vadd.f32 %v2586_v45, %v2514_v15 }
0x13ff   : > { %v3354_v13 = vmul.f32 -1.442695, %v2589_v14 }
0x1401   : > { %4377 = vpow2.f32 %v3354_v13 }
0x140b   : > { %v4378_v63 = vpop.eup %4377 }
0x140c   : > { %v2593_v10 = vadd.f32 1.0, %v4378_v63 }
0x140e   : > { %4379 = vrcp.f32 %v2593_v10 }
0x1418   : > { %v4380_v28 = vpop.eup %4379 }
0x1419   : > { %v2607_v39 = vsub.f32 1.0, %v4380_v28  ;;  %v2613_v11 = vmul.f32 %v4380_v28, %v5965_v29 }
0x146f   : > { %v2598_v58 = vpop.permute.xlu0 %2597 }
0x1470   : > { %v2600_v44 = vmul.f32 %v4380_v28, %v2598_v58 }
0x1472   : > { %2602 = vrot.lane.b32.xlu0 %v2600_v44, %s4907_s3 }
0x14e4   : > { %v2603_v16 = vpop.permute.xlu0 %2602 }
0x14e5   : > { %v2605_v12 = vadd.f32 %v2603_v16, %v2514_v15 }
0x14e7   : > { %4381 = vtanh.f32 %v2605_v12 }
0x14f1   : > { %v4382_v32 = vpop.eup %4381 }
0x14f2   : > { %2609 = vrot.lane.b32.xlu0 %v4382_v32, %s4908_s19 }
0x1564   : > { %v2610_v49 = vpop.permute.xlu0 %2609 }
0x1565   : > { %v2612_v56 = vmul.f32 %v2610_v49, %v2607_v39 }
0x1567   : > { %v2614_v53 = vadd.f32 %v2613_v11, %v2612_v56 }
0x1569   : > { %2616 = vrot.lane.b32.xlu0 %v2614_v53, %s4908_s19 }
0x15db   : > { %v2617_v55 = vpop.permute.xlu0 %2616 }
0x15dc   : > { %v2619_v60 = vsel %vm1428_vm1, %v2617_v55, 0.0 }
0x15dd   : > { %2620 = vadd.xlane.f32.xlu0 %v2619_v60 }
0x166a   : > { %v2621_v17 = vpop.xlane.xlu0 %2620 }
0x166b   : > { %v2622_v47 = vmul.f32 0.03125, %v2621_v17 }
0x166d   : > { %v2623_v8 = vsub.f32 %v2614_v53, %v2622_v47 }
0x166f   : > { %v2624_v4 = vmul.f32 %v2623_v8, %v2623_v8 }
0x1671   : > { %2626 = vrot.lane.b32.xlu1 %v2624_v4, %s4908_s19 }
0x16e3   : > { %v2627_v6 = vpop.permute.xlu1 %2626 }
0x16e4   : > { %v2629_v21 = vsel %vm1428_vm1, %v2627_v6, 0.0 }
0x16e5   : > { %2630 = vadd.xlane.f32.xlu0 %v2629_v21 }
0x1772   : > { %v2631_v2 = vpop.xlane.xlu0 %2630 }
0x1773   : > { %v2632_v29 = vmul.f32 0.03125, %v2631_v2 }
0x1775   : > { %v2633_v19 = vadd.f32 1e-05, %v2632_v29 }
0x1777   : > { %4383 = vrsqrt.f32 %v2633_v19 }
0x1781   : > { %v4384_v25 = vpop.eup %4383 }
0x1782   : > { %v2635_v36 = vmul.f32 %v4384_v25, %v2623_v8 }
0x1784   : > { %v2636_v24 = vmul.f32 %v2635_v36, %v5905_v33 }
0x1786   : > { %v2637_v43 = vadd.f32 %v2636_v24, %v5908_v37 }
0x1788   : > { %2639 = vrot.lane.b32.xlu0 %v2637_v43, %s4908_s19 }
0x17fa   : > { %v2640_v0 = vpop.permute.xlu0 %2639 }
0x17fb   : > { %3859 = vmatmul.mubr.msk.f32.vlgmr.msra.gmra.mrb[16].mxu0 %vm817_vm0, %v2640_v0 }
0x17fc   : > { %4102 = vmatpush3.bf16.msra.mxu0 %v5899_v57  ;;  %3869 = vmatprep.mubr.msk.f32.mxu0 %vm4905_vm2, %v4906_v22 }
0x17fd   : > { %4103 = vmatprep.subr.bf16.mxu0 %v4904_v9 }
0x1800   : > { %4105 = vmatpush3.bf16.msra.mxu0 %v5902_v30 }
0x1801   : > { %4112 = vmatprep.subr.bf16.mxu0 %v4904_v9 }
0x18ce   : > { %v2709_v23 = vpop.f32.mrb[16].mxu0 }
0x18cf   : > { %v2710_v33 = vadd.f32 %v5921_v27, %v2709_v23  ;;  %v3860_v37 = vpop.f32.mrb[17].mxu0 }
0x18d1   : > { %v2713_v5 = vmax.f32 %v2710_v33, 0.0 }
0x18d3   : > { %3870 = vmatmul.mubr.msk.f32.vlgmr.msra.gmra.mrb[18].mxu0 %vm817_vm0, %v2713_v5 }
0x18d4   : > { %4115 = vmatpush3.bf16.xpose.msk.msra.mxu0 %vm5746_vm3, %v5750_v62  ;;  %3915 = vmatprep.mubr.msk.f32.mxu0 %vm4905_vm2, %v4906_v22 }
0x18d5   : > { %4116 = vmatprep.subr.bf16.mxu0 %v4904_v9 }
0x18dc   : > { %4119 = vmatpush3.bf16.xpose.msk.msra.mxu0 %vm5746_vm3, %v5756_v26 }
0x18dd   : > { %4120 = vmatprep.subr.bf16.mxu0 %v4904_v9 }
0x18e4   : > { %4123 = vmatpush3.bf16.xpose.msk.msra.mxu0 %vm5746_vm3, %v5758_v34 }
0x18e5   : > { %4124 = vmatprep.subr.bf16.mxu0 %v4904_v9 }
0x18ec   : > { %4127 = vmatpush3.bf16.xpose.msk.msra.mxu0 %vm5746_vm3, %v5764_v41 }
0x18ed   : > { %4128 = vmatprep.subr.bf16.mxu0 %v4904_v9 }
0x18f4   : > { %4131 = vmatpush3.bf16.xpose.msk.msra.mxu0 %vm5746_vm3, %v5766_v46 }
0x18f5   : > { %4132 = vmatprep.subr.bf16.mxu0 %v4904_v9 }
0x18fc   : > { %4135 = vmatpush3.bf16.xpose.msk.msra.mxu0 %vm5746_vm3, %v5772_v52 }
0x18fd   : > { %4136 = vmatprep.subr.bf16.mxu0 %v4904_v9 }
0x1904   : > { %4139 = vmatpush3.bf16.xpose.msk.msra.mxu0 %vm5746_vm3, %v5776_v40 }
0x1905   : > { %4140 = vmatprep.subr.bf16.mxu0 %v4904_v9 }
0x190c   : > { %4143 = vmatpush3.bf16.xpose.msk.msra.mxu0 %vm5746_vm3, %v5782_v1 }
0x19a6   : > { %v2783_v22 = vpop.f32.mrb[18].mxu0 }
0x19a7   : > { %2788 = vrot.lane.b32.xlu1 %v2783_v22, %s4909_s29  ;;  %v3871_v62 = vpop.f32.mrb[19].mxu0 }
0x1a19   : > { %v2789_v26 = vpop.permute.xlu1 %2788 }
0x1a1a   : > { %v2791_v34 = vadd.f32 %v2789_v26, %v2614_v53 }
0x1a1c   : > { %v2792_v41 = vadd.f32 %v2791_v34, %v5961_v50 }
0x1a1e   : > { %2794 = vrot.lane.b32.xlu1 %v2792_v41, %s4908_s19 }
0x1a90   : > { %v2795_v46 = vpop.permute.xlu1 %2794 }
0x1a91   : > { %v2797_v52 = vsel %vm1428_vm1, %v2795_v46, 0.0 }
0x1a92   : > { %2798 = vadd.xlane.f32.xlu1 %v2797_v52 }
0x1b1f   : > { %v2799_v40 = vpop.xlane.xlu1 %2798 }
0x1b20   : > { %v2800_v9 = vmul.f32 0.03125, %v2799_v40 }
0x1b22   : > { %v2801_v57 = vsub.f32 %v2792_v41, %v2800_v9 }
0x1b24   : > { %v2802_v30 = vmul.f32 %v2801_v57, %v2801_v57 }
0x1b26   : > { %2804 = vrot.lane.b32.xlu0 %v2802_v30, %s4908_s19 }
0x1b98   : > { %v2805_v51 = vpop.permute.xlu0 %2804 }
0x1b99   : > { %v2807_v1 = vsel %vm1428_vm1, %v2805_v51, 0.0 }
0x1b9a   : > { %2808 = vadd.xlane.f32.xlu0 %v2807_v1 }
0x1c27   : > { %v2809_v27 = vpop.xlane.xlu0 %2808 }
0x1c28   : > { %v2810_v18 = vmul.f32 0.03125, %v2809_v27 }
0x1c2a   : > { %v2811_v38 = vadd.f32 1e-05, %v2810_v18 }
0x1c2c   : > { %4385 = vrsqrt.f32 %v2811_v38 }
0x1c36   : > { %v4386_v50 = vpop.eup %4385 }
0x1c37   : > { %v2813_v31 = vmul.f32 %v4386_v50, %v2801_v57 }
0x1c39   : > { %v2814_v35 = vmul.f32 %v2813_v31, %v5980_v7 }
0x1c3b   : > { %v2815_v3 = vadd.f32 %v2814_v35, %v5982_v20 }
0x1c3d   : > { %2817 = vrot.lane.b32.xlu1 %v2815_v3, %s4908_s19 }
0x1caf   : > { %v2818_v42 = vpop.permute.xlu1 %2817 }
0x1cb0   : > { %3881 = vmatmul.mubr.msk.f32.vlgmr.msra.gmra.mrb[40].mxu1 %vm817_vm0, %v2818_v42 }
0x1d83   : > { %v2887_v54 = vpop.f32.mrb[40].mxu1 }
0x1d84   : > { %v2888_v61 = vadd.f32 %v5827_v59, %v2887_v54  ;;  %v3882_v45 = vpop.f32.mrb[41].mxu1 }
0x1d86   : > { %3916 = vmatmul.mubr.msk.f32.vlgmr.msra.gmra.mrb[20].mxu0 %vm817_vm0, %v2888_v61 }
0x1e59   : > { %v2960_v48 = vpop.f32.mrb[20].mxu0 }
0x1e5a   : > { %v2964_v15 = vmul.f32 0.17677669, %v2960_v48  ;;  %v3917_v14 = vpop.f32.mrb[21].mxu0 }
0x1e5c   : > { %v2965_v13 = vsel %vm1658_vm4, %v2964_v15, -inf }
0x1e5d   : > { %v2966_v63 = vrot.slane %v2965_v13, 4 }
0x1e5f   : > { %v2967_v7 = vmax.f32 %v2965_v13, %v2966_v63 }
0x1e61   : > { %v2968_v10 = vrot.slane %v2967_v7, 2 }
0x1e63   : > { %v2969_v20 = vmax.f32 %v2967_v7, %v2968_v10 }
0x1e65   : > { %v2970_v28 = vrot.slane %v2969_v20, 1 }
0x1e67   : > { %v2971_v58 = vmax.f32 %v2969_v20, %v2970_v28 }
0x1e69   : > { %v2972_v44 = vsub.f32 %v2964_v15, %v2971_v58 }
0x1e6b   : > { %v2973_v16 = vmul.f32 1.442695, %v2972_v44 }
0x1e6d   : > { %4387 = vpow2.f32 %v2973_v16 }
0x1e77   : > { %v4388_v12 = vpop.eup %4387 }
0x1e78   : > { %v2975_v59 = vsel %vm1658_vm4, %v4388_v12, 0.0 }
0x1e79   : > { %v2976_v32 = vrot.slane %v2975_v59, 4 }
0x1e7b   : > { %v2977_v39 = vadd.f32 %v2976_v32, %v2975_v59 }
0x1e7d   : > { %v2978_v49 = vrot.slane %v2977_v39, 2 }
0x1e7f   : > { %v2979_v11 = vadd.f32 %v2978_v49, %v2977_v39 }
0x1e81   : > { %v2980_v56 = vrot.slane %v2979_v11, 1 }
0x1e83   : > { %v2981_v53 = vadd.f32 %v2980_v56, %v2979_v11 }
0x1e85   : > { %4389 = vrcp.f32 %v2981_v53 }
0x1e8f   : > { %v4390_v55 = vpop.eup %4389 }
0x1e90   : > { %v2983_v60 = vmul.f32 %v4390_v55, %v4388_v12 }
0x1e92   : > { %v2984_v17 = vadd.f32 1e-08, %v2983_v60 }
0x1e94   : > { %v2986_v47 = vsel %vm1658_vm4, %v2984_v17, 0.0  ;;  %2985 = vst [vmem:[%s795_s28] sm:$0xf] %v2984_v17 }
0x1e95   : > { %2987 = vadd.xlane.f32.xlu0 %v2986_v47 }
0x1f22   : > { %v2988_v8 = vpop.xlane.xlu0 %2987 }
0x1f23   : > { %4391 = vrcp.f32 %v2988_v8 }
0x1f2d   : > { %v4392_v4 = vpop.eup %4391 }
0x1f2e   : > { %v2990_v6 = vmul.f32 %v4392_v4, %v2984_v17 }
0x1f30   : > { %2991 = vst [vmem:[%s799_s18] sm:$0xf] %v2990_v6 }
0x1f31 PF: > { %s6192_s25 = sld [smem:[#allocation36_spill]] }
0x1f37   : > { %s38_s27 = sadd.s32 1, %s6192_s25  }
0x1f38   : > { %p35_p5 = scmp.ge.s32.totalorder %s38_s27, 4  }
0x1f3a   :  { %37 = sbr.rel (!%p35_p5) target bundleno = 18 (0x12), region = 195 }
0x1f41   :  { %3025 = vsyncpa [#allocation3], 1 }
0x1f42   :  { %3027 = vsyncpa [#allocation3 + $0x1], 1 }
0x1f43   :  { %3028 = vsyncpa [#allocation5], 1 }
0x1f44   :  { %3029 = vsyncpa [#allocation8], 1 }
0x1f45   :  { %3030 = vsyncpa [#allocation11], 1 }
0x1f46   :  { %3031 = vsyncpa [#allocation14], 1 }
0x1f47   :  { %3032 = vsyncpa [#allocation17], 1 }
0x1f48   :  { %3033 = vsyncpa [#allocation20], 1 }
0x1f49   :  { %3034 = vsyncpa [#allocation23], 1 }
0x1f4a   :  { %3035 = vsyncpa [#allocation26], 1 }

</bundles_post_ra>
